<compile_context>
chip_gen: v7x
topology: tpu7x:2x2x1
jax: 0.10.0
libtpu: 0.0.40
codegen_flags: <defaults>
</compile_context>

<pallas_src>
import jax
import jax.numpy as jnp
from jax.experimental import pallas as pl
from jax.experimental.pallas import tpu as pltpu

KERNELS = (1, 1, 2, 1, 2, 2)            # kernel == stride for every deconv layer
IN_CH   = (2048, 384, 232, 136, 96, 48)
OUT_CH  = (384, 232, 136, 96, 48, 32)
N_FINAL = 14
N_FINAL_PAD = 128                       # lane-dense output slab width
BN_EPS = 1e-5


# ------------------------- Fused Pallas kernel -------------------------

def _fold_groups(v, kk, cout):
    """Sum the kk lane-chunks of a (1, kk*cout) row vector -> (1, cout)."""
    if kk == 1:
        return v
    acc = v[:, 0:cout]
    for g in range(1, kk):
        acc = acc + v[:, g * cout:(g + 1) * cout]
    return acc


def _fused_forward_kernel(*refs):
    """Whole 7-stage forward as straight-line code on VMEM-resident operands."""
    in_refs = refs[:-1]
    out_ref = refs[-1]

    idx = 0
    act = in_refs[idx][...]              # (M0, 2048) bf16, rows = (n, i0, j0)
    idx += 1

    for layer, k in enumerate(KERNELS):
        kk = k * k
        cout = OUT_CH[layer]
        w = in_refs[idx][...]            # (Cin, kk*Cout) bf16, lane-packed groups
        gamma = in_refs[idx + 1][...]    # (1, Cout) f32
        beta = in_refs[idx + 2][...]     # (1, Cout) f32
        idx += 3

        m = act.shape[0]
        # One matmul per layer (groups lane-packed); bf16 x bf16 -> f32 on the MXU.
        y = jnp.dot(act, w, preferred_element_type=jnp.float32)   # (m, kk*Cout)

        # Training-mode BatchNorm statistics over ALL kk*m rows (biased variance).
        inv_total = 1.0 / float(m * kk)
        col_sum = jnp.sum(y, axis=0, keepdims=True)                # (1, kk*Cout)
        mean = _fold_groups(col_sum, kk, cout) * inv_total         # (1, Cout)
        mean_t = mean if kk == 1 else jnp.tile(mean, (1, kk))      # hoisted broadcast
        centered = y - mean_t                                      # reused for var & FMA
        sq_sum = jnp.sum(centered * centered, axis=0, keepdims=True)
        var = _fold_groups(sq_sum, kk, cout) * inv_total           # (1, Cout)
        scale = gamma * jax.lax.rsqrt(var + BN_EPS)                # fused BN scale

        if kk == 1:
            act_f = jnp.maximum(centered * scale + beta, 0.0)      # (m, Cout)
        else:
            scale_t = jnp.tile(scale, (1, kk))
            beta_t = jnp.tile(beta, (1, kk))
            act_pk = jnp.maximum(centered * scale_t + beta_t, 0.0)  # (m, kk*Cout)
            # Deferred pixel-shuffle: group g = 2*kh + kw becomes the most-significant
            # row digit.  Pure vreg-level concat -- no VMEM scratch round-trip.
            act_f = jnp.concatenate(
                [act_pk[:, g * cout:(g + 1) * cout] for g in range(kk)], axis=0)

        act = act_f.astype(jnp.bfloat16)

    # Final 1x1 conv (bf16 MXU, lane-dense zero-padded 128 cols) + sigmoid.
    w_final = in_refs[idx][...]          # (32, 128) bf16
    b_final = in_refs[idx + 1][...]      # (1, 128) f32
    logits = jnp.dot(act, w_final, preferred_element_type=jnp.float32) + b_final
    out_ref[...] = jax.nn.sigmoid(logits)


def fused_forward(x_mat, flat_ops):
    """Single pallas_call running the entire forward; everything fits in VMEM."""
    operands = (x_mat,) + tuple(flat_ops)

    m_out = x_mat.shape[0]
    for k in KERNELS:
        m_out *= k * k

    # Rough VMEM budget: operands (double-buffered) + output slab (double-buffered)
    # + live intermediates, with headroom; capped so it stays safe on v7x (64 MiB).
    total_bytes = sum(int(op.size) * op.dtype.itemsize for op in operands)
    total_bytes += m_out * N_FINAL_PAD * 4
    vmem_limit = int(min(48 << 20, max(32 << 20, 4 * total_bytes)))

    # Advisory cost estimate for XLA scheduling around the call.
    flops = 0
    m = x_mat.shape[0]
    for k, cin, cout in zip(KERNELS, IN_CH, OUT_CH):
        flops += 2 * m * cin * (k * k * cout)
        m *= k * k
    flops += 2 * m_out * OUT_CH[-1] * N_FINAL_PAD
    cost = pl.CostEstimate(flops=flops,
                           transcendentals=m_out * N_FINAL_PAD + sum(OUT_CH),
                           bytes_accessed=total_bytes)

    in_specs = [pl.BlockSpec(op.shape, lambda i: (0, 0)) for op in operands]
    return pl.pallas_call(
        _fused_forward_kernel,
        out_shape=jax.ShapeDtypeStruct((m_out, N_FINAL_PAD), jnp.float32),
        grid=(1,),
        in_specs=in_specs,
        out_specs=pl.BlockSpec((m_out, N_FINAL_PAD), lambda i: (0, 0)),
        compiler_params=pltpu.CompilerParams(
            dimension_semantics=("arbitrary",),
            vmem_limit_bytes=vmem_limit),
        cost_estimate=cost,
    )(*operands)


# ------------------------- Parameter preparation -------------------------

def init_params(key):
    deconv = []
    for i in range(6):
        key, k1, k2 = jax.random.split(key, 3)
        cin, cout, k = IN_CH[i], OUT_CH[i], KERNELS[i]
        bound = 1.0 / float(cin * k * k) ** 0.5
        # NOTE: layout here is (Cin, kH, kW, Cout). PyTorch ConvTranspose2d stores
        # (Cin, Cout, kH, kW) -> permute (0, 2, 3, 1) if loading real weights.
        w = jax.random.uniform(k1, (cin, k, k, cout), jnp.float32, -bound, bound)
        b = jax.random.uniform(k2, (cout,), jnp.float32, -bound, bound)
        deconv.append(dict(
            w=w, b=b,                                   # b is cancelled by train-mode BN
            gamma=jnp.ones((cout,), jnp.float32),       # PyTorch BN default init
            beta=jnp.zeros((cout,), jnp.float32),
        ))
    key, k1, k2 = jax.random.split(key, 3)
    bound = 1.0 / float(OUT_CH[-1]) ** 0.5
    final_w = jax.random.uniform(k1, (OUT_CH[-1], N_FINAL), jnp.float32, -bound, bound)
    final_b = jax.random.uniform(k2, (N_FINAL,), jnp.float32, -bound, bound)
    return dict(deconv=deconv, final_w=final_w, final_b=final_b)


def prepare_operands(params):
    """One-time conversion of module params into the fused kernel's operand list."""
    ops = []
    for i, k in enumerate(KERNELS):
        p = params["deconv"][i]
        w = p["w"]                                      # (Cin, k, k, Cout) f32
        cin, _, _, cout = w.shape
        kk = k * k
        # Lane-pack the (kh,kw) groups along the output-channel axis:
        # column block g = 2*kh + kw holds W[:, kh, kw, :].
        ops.append(w.reshape(cin, kk * cout).astype(jnp.bfloat16))
        ops.append(p["gamma"].reshape(1, cout).astype(jnp.float32))
        ops.append(p["beta"].reshape(1, cout).astype(jnp.float32))
        # p["b"] (ConvTranspose2d bias) intentionally NOT passed: training-mode BN's
        # mean subtraction cancels a constant per-channel bias exactly.
    wf = params["final_w"]                              # (32, 14)
    bf = params["final_b"]                              # (14,)
    wf_pad = jnp.zeros((wf.shape[0], N_FINAL_PAD), jnp.float32).at[:, :N_FINAL].set(wf)
    bf_pad = jnp.zeros((1, N_FINAL_PAD), jnp.float32).at[0, :N_FINAL].set(bf)
    ops.append(wf_pad.astype(jnp.bfloat16))             # bf16 final matmul
    ops.append(bf_pad)                                  # bias added in f32
    return tuple(ops)


# ------------------------- Forward wrapper -------------------------

@jax.jit
def _forward_impl(x_nchw, flat_ops):
    N, C, H, W = x_nchw.shape
    # bf16 cast fused with the NCHW->NHWC transpose: halves the largest input DMA and
    # removes the in-kernel convert for layer 1.
    x_mat = jnp.transpose(x_nchw, (0, 2, 3, 1)).reshape(N * H * W, C).astype(jnp.bfloat16)

    out_pad = fused_forward(x_mat, flat_ops)            # (64*N*H*W, 128) f32
    out = out_pad[:, :N_FINAL]                          # drop lane padding

    # Rows are ordered (a6, b6, a5, b5, a3, b3, n, i0, j0): each k=2 layer stacked
    # its (kh, kw) groups as the most-significant row digits.  Undo all deferred
    # pixel-shuffles and the NHWC->NCHW move with ONE transpose of a tiny array.
    ks_up = [k for k in KERNELS if k > 1]
    n_up = len(ks_up)
    lead = []
    for k in reversed(ks_up):
        lead += [k, k]
    out = out.reshape(*lead, N, H, W, N_FINAL)
    h_axes = [2 * n_up + 1] + [2 * (n_up - 1 - p) for p in range(n_up)]
    w_axes = [2 * n_up + 2] + [2 * (n_up - 1 - p) + 1 for p in range(n_up)]
    perm = [2 * n_up, 2 * n_up + 3] + h_axes + w_axes   # -> (n, c, H digits, W digits)
    out = jnp.transpose(out, perm)
    up = 1
    for k in ks_up:
        up *= k
    return out.reshape(N, N_FINAL, H * up, W * up)


def modely_forward(x_nchw, xs, flat_ops):
    # res_mode=False in the reference module, so xs (x1..x5) are accepted but unused.
    del xs
    return _forward_impl(x_nchw, flat_ops)


# ------------------------- Pure-JAX f32 reference (for verification) -------------------------

def reference_forward(x_nchw, params):
    x = jnp.transpose(x_nchw, (0, 2, 3, 1)).astype(jnp.float32)   # NHWC
    for i, k in enumerate(KERNELS):
        p = params["deconv"][i]
        w = p["w"]                                                 # (Cin, k, k, Cout)
        if k == 1:
            y = jnp.einsum("nhwc,cd->nhwd", x, w[:, 0, 0, :], precision="highest")
        else:
            y = jnp.einsum("nhwc,cabd->nhawbd", x, w, precision="highest")
            n_, h_, _, w_, _, d_ = y.shape
            y = y.reshape(n_, h_ * k, w_ * k, d_)                  # pixel shuffle
        y = y + p["b"]
        mean = jnp.mean(y, axis=(0, 1, 2))
        var = jnp.var(y, axis=(0, 1, 2))                           # biased, train-mode BN
        y = (y - mean) * jax.lax.rsqrt(var + BN_EPS) * p["gamma"] + p["beta"]
        x = jnp.maximum(y, 0.0)
    logits = jnp.einsum("nhwc,cd->nhwd", x, params["final_w"], precision="highest")
    logits = logits + params["final_b"]
    return jnp.transpose(jax.nn.sigmoid(logits), (0, 3, 1, 2))     # NCHW


# ------------------------- Main -------------------------

if __name__ == "__main__":
    key = jax.random.PRNGKey(0)
    key, kp, kx = jax.random.split(key, 3)

    params = init_params(kp)
    flat_ops = prepare_operands(params)   # one-time: bf16 lane-packed weights, padding

    # Small input consistent with the module: N=2, C=2048, spatial 2x2
    # (three 2x upsamplings -> final 16x16, 14 output channels).
    x = jax.random.normal(kx, (2, 2048, 2, 2), jnp.float32)

    # Dummy skip features (unused because res_mode=False).
    kxs = jax.random.split(key, 5)
    xs = (
        jax.random.normal(kxs[0], (2, 48, 8, 8), jnp.float32),
        jax.random.normal(kxs[1], (2, 96, 4, 4), jnp.float32),
        jax.random.normal(kxs[2], (2, 136, 4, 4), jnp.float32),
        jax.random.normal(kxs[3], (2, 232, 2, 2), jnp.float32),
        jax.random.normal(kxs[4], (2, 384, 2, 2), jnp.float32),
    )

    out = modely_forward(x, xs, flat_ops)
    out = jax.block_until_ready(out)

    assert out.shape == (2, 14, 16, 16), out.shape
    assert bool(jnp.all(jnp.isfinite(out)))
    assert bool(jnp.all(out >= 0.0)) and bool(jnp.all(out <= 1.0))  # sigmoid range

    # Verify against the pure-f32 JAX reference (bf16 matmuls -> loose-ish tolerance).
    ref = jax.block_until_ready(reference_forward(x, params))
    max_err = float(jnp.max(jnp.abs(out - ref)))
    mean_err = float(jnp.mean(jnp.abs(out - ref)))
    assert max_err < 8e-2, f"max |kernel - reference| = {max_err}"
    assert mean_err < 1.5e-2, f"mean |kernel - reference| = {mean_err}"

    print("KERNEL_OK")
</pallas_src>

<mosaic_0001>
module attributes {stable_mosaic.version = 11 : i64} {
  func.func @_fused_forward_kernel(%arg0: i32, %arg1: memref<8x2048xbf16, #tpu.memory_space<vmem>>, %arg2: memref<2048x384xbf16, #tpu.memory_space<vmem>>, %arg3: memref<1x384xf32, #tpu.memory_space<vmem>>, %arg4: memref<1x384xf32, #tpu.memory_space<vmem>>, %arg5: memref<384x232xbf16, #tpu.memory_space<vmem>>, %arg6: memref<1x232xf32, #tpu.memory_space<vmem>>, %arg7: memref<1x232xf32, #tpu.memory_space<vmem>>, %arg8: memref<232x544xbf16, #tpu.memory_space<vmem>>, %arg9: memref<1x136xf32, #tpu.memory_space<vmem>>, %arg10: memref<1x136xf32, #tpu.memory_space<vmem>>, %arg11: memref<136x96xbf16, #tpu.memory_space<vmem>>, %arg12: memref<1x96xf32, #tpu.memory_space<vmem>>, %arg13: memref<1x96xf32, #tpu.memory_space<vmem>>, %arg14: memref<96x192xbf16, #tpu.memory_space<vmem>>, %arg15: memref<1x48xf32, #tpu.memory_space<vmem>>, %arg16: memref<1x48xf32, #tpu.memory_space<vmem>>, %arg17: memref<48x128xbf16, #tpu.memory_space<vmem>>, %arg18: memref<1x32xf32, #tpu.memory_space<vmem>>, %arg19: memref<1x32xf32, #tpu.memory_space<vmem>>, %arg20: memref<32x128xbf16, #tpu.memory_space<vmem>>, %arg21: memref<1x128xf32, #tpu.memory_space<vmem>>, %arg22: memref<512x128xf32, #tpu.memory_space<vmem>>) attributes {dimension_semantics = [#tpu.dimension_semantics<arbitrary>], iteration_bounds = array<i64: 1>, scalar_prefetch = 0 : i64, scratch_operands = 0 : i64, tpu.core_type = #tpu.core_type<tc>, window_params = [{pipeline_mode = #tpu.pipeline_mode<synchronous>, transform_indices = @transform_0, window_bounds = array<i64: 8, 2048>}, {pipeline_mode = #tpu.pipeline_mode<synchronous>, transform_indices = @transform_1, window_bounds = array<i64: 2048, 384>}, {pipeline_mode = #tpu.pipeline_mode<synchronous>, transform_indices = @transform_2, window_bounds = array<i64: 1, 384>}, {pipeline_mode = #tpu.pipeline_mode<synchronous>, transform_indices = @transform_3, window_bounds = array<i64: 1, 384>}, {pipeline_mode = #tpu.pipeline_mode<synchronous>, transform_indices = @transform_4, window_bounds = array<i64: 384, 232>}, {pipeline_mode = #tpu.pipeline_mode<synchronous>, transform_indices = @transform_5, window_bounds = array<i64: 1, 232>}, {pipeline_mode = #tpu.pipeline_mode<synchronous>, transform_indices = @transform_6, window_bounds = array<i64: 1, 232>}, {pipeline_mode = #tpu.pipeline_mode<synchronous>, transform_indices = @transform_7, window_bounds = array<i64: 232, 544>}, {pipeline_mode = #tpu.pipeline_mode<synchronous>, transform_indices = @transform_8, window_bounds = array<i64: 1, 136>}, {pipeline_mode = #tpu.pipeline_mode<synchronous>, transform_indices = @transform_9, window_bounds = array<i64: 1, 136>}, {pipeline_mode = #tpu.pipeline_mode<synchronous>, transform_indices = @transform_10, window_bounds = array<i64: 136, 96>}, {pipeline_mode = #tpu.pipeline_mode<synchronous>, transform_indices = @transform_11, window_bounds = array<i64: 1, 96>}, {pipeline_mode = #tpu.pipeline_mode<synchronous>, transform_indices = @transform_12, window_bounds = array<i64: 1, 96>}, {pipeline_mode = #tpu.pipeline_mode<synchronous>, transform_indices = @transform_13, window_bounds = array<i64: 96, 192>}, {pipeline_mode = #tpu.pipeline_mode<synchronous>, transform_indices = @transform_14, window_bounds = array<i64: 1, 48>}, {pipeline_mode = #tpu.pipeline_mode<synchronous>, transform_indices = @transform_15, window_bounds = array<i64: 1, 48>}, {pipeline_mode = #tpu.pipeline_mode<synchronous>, transform_indices = @transform_16, window_bounds = array<i64: 48, 128>}, {pipeline_mode = #tpu.pipeline_mode<synchronous>, transform_indices = @transform_17, window_bounds = array<i64: 1, 32>}, {pipeline_mode = #tpu.pipeline_mode<synchronous>, transform_indices = @transform_18, window_bounds = array<i64: 1, 32>}, {pipeline_mode = #tpu.pipeline_mode<synchronous>, transform_indices = @transform_19, window_bounds = array<i64: 32, 128>}, {pipeline_mode = #tpu.pipeline_mode<synchronous>, transform_indices = @transform_20, window_bounds = array<i64: 1, 128>}, {pipeline_mode = #tpu.pipeline_mode<synchronous>, transform_indices = @transform_21, window_bounds = array<i64: 512, 128>}]} {
    %c0 = arith.constant 0 : index
    %c0_0 = arith.constant 0 : index
    %0 = vector.load %arg1[%c0, %c0_0] : memref<8x2048xbf16, #tpu.memory_space<vmem>>, vector<8x2048xbf16>
    %c0_1 = arith.constant 0 : index
    %c0_2 = arith.constant 0 : index
    %1 = vector.load %arg2[%c0_1, %c0_2] : memref<2048x384xbf16, #tpu.memory_space<vmem>>, vector<2048x384xbf16>
    %c0_3 = arith.constant 0 : index
    %c0_4 = arith.constant 0 : index
    %2 = vector.load %arg3[%c0_3, %c0_4] : memref<1x384xf32, #tpu.memory_space<vmem>>, vector<1x384xf32>
    %c0_5 = arith.constant 0 : index
    %c0_6 = arith.constant 0 : index
    %3 = vector.load %arg4[%c0_5, %c0_6] : memref<1x384xf32, #tpu.memory_space<vmem>>, vector<1x384xf32>
    %cst = arith.constant dense<0.000000e+00> : vector<8x384xf32>
    %4 = tpu.matmul %0, %1, %cst {dimension_numbers = #tpu.dot_dimension_numbers<[1], [0], [0], [1], [0, 0, 1, 1], [], []>} : vector<8x2048xbf16>, vector<2048x384xbf16>, vector<8x384xf32> -> vector<8x384xf32>
    %cst_7 = arith.constant dense<0.000000e+00> : vector<384xf32>
    %5 = vector.multi_reduction <add>, %4, %cst_7 [0] : vector<8x384xf32> to vector<384xf32>
    %6 = vector.shape_cast %5 : vector<384xf32> to vector<1x384xf32>
    %cst_8 = arith.constant 1.250000e-01 : f32
    %7 = vector.broadcast %cst_8 : f32 to vector<1x384xf32>
    %8 = arith.mulf %6, %7 : vector<1x384xf32>
    %9 = vector.broadcast %8 : vector<1x384xf32> to vector<8x384xf32>
    %10 = arith.subf %4, %9 : vector<8x384xf32>
    %11 = arith.mulf %10, %10 : vector<8x384xf32>
    %cst_9 = arith.constant dense<0.000000e+00> : vector<384xf32>
    %12 = vector.multi_reduction <add>, %11, %cst_9 [0] : vector<8x384xf32> to vector<384xf32>
    %13 = vector.shape_cast %12 : vector<384xf32> to vector<1x384xf32>
    %cst_10 = arith.constant 1.250000e-01 : f32
    %14 = vector.broadcast %cst_10 : f32 to vector<1x384xf32>
    %15 = arith.mulf %13, %14 : vector<1x384xf32>
    %cst_11 = arith.constant 9.99999974E-6 : f32
    %16 = vector.broadcast %cst_11 : f32 to vector<1x384xf32>
    %17 = arith.addf %15, %16 : vector<1x384xf32>
    %18 = math.rsqrt %17 : vector<1x384xf32>
    %19 = arith.mulf %2, %18 : vector<1x384xf32>
    %20 = vector.broadcast %19 : vector<1x384xf32> to vector<8x384xf32>
    %21 = arith.mulf %10, %20 : vector<8x384xf32>
    %22 = vector.broadcast %3 : vector<1x384xf32> to vector<8x384xf32>
    %23 = arith.addf %21, %22 : vector<8x384xf32>
    %cst_12 = arith.constant 0.000000e+00 : f32
    %24 = vector.broadcast %cst_12 : f32 to vector<8x384xf32>
    %25 = arith.maximumf %23, %24 : vector<8x384xf32>
    %26 = arith.truncf %25 : vector<8x384xf32> to vector<8x384xbf16>
    %c0_13 = arith.constant 0 : index
    %c0_14 = arith.constant 0 : index
    %27 = vector.load %arg5[%c0_13, %c0_14] : memref<384x232xbf16, #tpu.memory_space<vmem>>, vector<384x232xbf16>
    %c0_15 = arith.constant 0 : index
    %c0_16 = arith.constant 0 : index
    %28 = vector.load %arg6[%c0_15, %c0_16] : memref<1x232xf32, #tpu.memory_space<vmem>>, vector<1x232xf32>
    %c0_17 = arith.constant 0 : index
    %c0_18 = arith.constant 0 : index
    %29 = vector.load %arg7[%c0_17, %c0_18] : memref<1x232xf32, #tpu.memory_space<vmem>>, vector<1x232xf32>
    %cst_19 = arith.constant dense<0.000000e+00> : vector<8x232xf32>
    %30 = tpu.matmul %26, %27, %cst_19 {dimension_numbers = #tpu.dot_dimension_numbers<[1], [0], [0], [1], [0, 0, 1, 1], [], []>} : vector<8x384xbf16>, vector<384x232xbf16>, vector<8x232xf32> -> vector<8x232xf32>
    %cst_20 = arith.constant dense<0.000000e+00> : vector<232xf32>
    %31 = vector.multi_reduction <add>, %30, %cst_20 [0] : vector<8x232xf32> to vector<232xf32>
    %32 = vector.shape_cast %31 : vector<232xf32> to vector<1x232xf32>
    %cst_21 = arith.constant 1.250000e-01 : f32
    %33 = vector.broadcast %cst_21 : f32 to vector<1x232xf32>
    %34 = arith.mulf %32, %33 : vector<1x232xf32>
    %35 = vector.broadcast %34 : vector<1x232xf32> to vector<8x232xf32>
    %36 = arith.subf %30, %35 : vector<8x232xf32>
    %37 = arith.mulf %36, %36 : vector<8x232xf32>
    %cst_22 = arith.constant dense<0.000000e+00> : vector<232xf32>
    %38 = vector.multi_reduction <add>, %37, %cst_22 [0] : vector<8x232xf32> to vector<232xf32>
    %39 = vector.shape_cast %38 : vector<232xf32> to vector<1x232xf32>
    %cst_23 = arith.constant 1.250000e-01 : f32
    %40 = vector.broadcast %cst_23 : f32 to vector<1x232xf32>
    %41 = arith.mulf %39, %40 : vector<1x232xf32>
    %cst_24 = arith.constant 9.99999974E-6 : f32
    %42 = vector.broadcast %cst_24 : f32 to vector<1x232xf32>
    %43 = arith.addf %41, %42 : vector<1x232xf32>
    %44 = math.rsqrt %43 : vector<1x232xf32>
    %45 = arith.mulf %28, %44 : vector<1x232xf32>
    %46 = vector.broadcast %45 : vector<1x232xf32> to vector<8x232xf32>
    %47 = arith.mulf %36, %46 : vector<8x232xf32>
    %48 = vector.broadcast %29 : vector<1x232xf32> to vector<8x232xf32>
    %49 = arith.addf %47, %48 : vector<8x232xf32>
    %cst_25 = arith.constant 0.000000e+00 : f32
    %50 = vector.broadcast %cst_25 : f32 to vector<8x232xf32>
    %51 = arith.maximumf %49, %50 : vector<8x232xf32>
    %52 = arith.truncf %51 : vector<8x232xf32> to vector<8x232xbf16>
    %c0_26 = arith.constant 0 : index
    %c0_27 = arith.constant 0 : index
    %53 = vector.load %arg8[%c0_26, %c0_27] : memref<232x544xbf16, #tpu.memory_space<vmem>>, vector<232x544xbf16>
    %c0_28 = arith.constant 0 : index
    %c0_29 = arith.constant 0 : index
    %54 = vector.load %arg9[%c0_28, %c0_29] : memref<1x136xf32, #tpu.memory_space<vmem>>, vector<1x136xf32>
    %c0_30 = arith.constant 0 : index
    %c0_31 = arith.constant 0 : index
    %55 = vector.load %arg10[%c0_30, %c0_31] : memref<1x136xf32, #tpu.memory_space<vmem>>, vector<1x136xf32>
    %cst_32 = arith.constant dense<0.000000e+00> : vector<8x544xf32>
    %56 = tpu.matmul %52, %53, %cst_32 {dimension_numbers = #tpu.dot_dimension_numbers<[1], [0], [0], [1], [0, 0, 1, 1], [], []>} : vector<8x232xbf16>, vector<232x544xbf16>, vector<8x544xf32> -> vector<8x544xf32>
    %cst_33 = arith.constant dense<0.000000e+00> : vector<544xf32>
    %57 = vector.multi_reduction <add>, %56, %cst_33 [0] : vector<8x544xf32> to vector<544xf32>
    %58 = vector.shape_cast %57 : vector<544xf32> to vector<1x544xf32>
    %59 = vector.extract_strided_slice %58 {offsets = [0, 0], sizes = [1, 136], strides = [1, 1]} : vector<1x544xf32> to vector<1x136xf32>
    %60 = vector.extract_strided_slice %58 {offsets = [0, 136], sizes = [1, 136], strides = [1, 1]} : vector<1x544xf32> to vector<1x136xf32>
    %61 = arith.addf %59, %60 : vector<1x136xf32>
    %62 = vector.extract_strided_slice %58 {offsets = [0, 272], sizes = [1, 136], strides = [1, 1]} : vector<1x544xf32> to vector<1x136xf32>
    %63 = arith.addf %61, %62 : vector<1x136xf32>
    %64 = vector.extract_strided_slice %58 {offsets = [0, 408], sizes = [1, 136], strides = [1, 1]} : vector<1x544xf32> to vector<1x136xf32>
    %65 = arith.addf %63, %64 : vector<1x136xf32>
    %cst_34 = arith.constant 3.125000e-02 : f32
    %66 = vector.broadcast %cst_34 : f32 to vector<1x136xf32>
    %67 = arith.mulf %65, %66 : vector<1x136xf32>
    %68 = tpu.concatenate %67, %67, %67, %67 in 1 : vector<1x136xf32>, vector<1x136xf32>, vector<1x136xf32>, vector<1x136xf32> -> vector<1x544xf32>
    %69 = vector.broadcast %68 : vector<1x544xf32> to vector<8x544xf32>
    %70 = arith.subf %56, %69 : vector<8x544xf32>
    %71 = arith.mulf %70, %70 : vector<8x544xf32>
    %cst_35 = arith.constant dense<0.000000e+00> : vector<544xf32>
    %72 = vector.multi_reduction <add>, %71, %cst_35 [0] : vector<8x544xf32> to vector<544xf32>
    %73 = vector.shape_cast %72 : vector<544xf32> to vector<1x544xf32>
    %74 = vector.extract_strided_slice %73 {offsets = [0, 0], sizes = [1, 136], strides = [1, 1]} : vector<1x544xf32> to vector<1x136xf32>
    %75 = vector.extract_strided_slice %73 {offsets = [0, 136], sizes = [1, 136], strides = [1, 1]} : vector<1x544xf32> to vector<1x136xf32>
    %76 = arith.addf %74, %75 : vector<1x136xf32>
    %77 = vector.extract_strided_slice %73 {offsets = [0, 272], sizes = [1, 136], strides = [1, 1]} : vector<1x544xf32> to vector<1x136xf32>
    %78 = arith.addf %76, %77 : vector<1x136xf32>
    %79 = vector.extract_strided_slice %73 {offsets = [0, 408], sizes = [1, 136], strides = [1, 1]} : vector<1x544xf32> to vector<1x136xf32>
    %80 = arith.addf %78, %79 : vector<1x136xf32>
    %cst_36 = arith.constant 3.125000e-02 : f32
    %81 = vector.broadcast %cst_36 : f32 to vector<1x136xf32>
    %82 = arith.mulf %80, %81 : vector<1x136xf32>
    %cst_37 = arith.constant 9.99999974E-6 : f32
    %83 = vector.broadcast %cst_37 : f32 to vector<1x136xf32>
    %84 = arith.addf %82, %83 : vector<1x136xf32>
    %85 = math.rsqrt %84 : vector<1x136xf32>
    %86 = arith.mulf %54, %85 : vector<1x136xf32>
    %87 = tpu.concatenate %86, %86, %86, %86 in 1 : vector<1x136xf32>, vector<1x136xf32>, vector<1x136xf32>, vector<1x136xf32> -> vector<1x544xf32>
    %88 = tpu.concatenate %55, %55, %55, %55 in 1 : vector<1x136xf32>, vector<1x136xf32>, vector<1x136xf32>, vector<1x136xf32> -> vector<1x544xf32>
    %89 = vector.broadcast %87 : vector<1x544xf32> to vector<8x544xf32>
    %90 = arith.mulf %70, %89 : vector<8x544xf32>
    %91 = vector.broadcast %88 : vector<1x544xf32> to vector<8x544xf32>
    %92 = arith.addf %90, %91 : vector<8x544xf32>
    %cst_38 = arith.constant 0.000000e+00 : f32
    %93 = vector.broadcast %cst_38 : f32 to vector<8x544xf32>
    %94 = arith.maximumf %92, %93 : vector<8x544xf32>
    %95 = vector.extract_strided_slice %94 {offsets = [0, 0], sizes = [8, 136], strides = [1, 1]} : vector<8x544xf32> to vector<8x136xf32>
    %96 = vector.extract_strided_slice %94 {offsets = [0, 136], sizes = [8, 136], strides = [1, 1]} : vector<8x544xf32> to vector<8x136xf32>
    %97 = vector.extract_strided_slice %94 {offsets = [0, 272], sizes = [8, 136], strides = [1, 1]} : vector<8x544xf32> to vector<8x136xf32>
    %98 = vector.extract_strided_slice %94 {offsets = [0, 408], sizes = [8, 136], strides = [1, 1]} : vector<8x544xf32> to vector<8x136xf32>
    %99 = tpu.concatenate %95, %96, %97, %98 in 0 : vector<8x136xf32>, vector<8x136xf32>, vector<8x136xf32>, vector<8x136xf32> -> vector<32x136xf32>
    %100 = arith.truncf %99 : vector<32x136xf32> to vector<32x136xbf16>
    %c0_39 = arith.constant 0 : index
    %c0_40 = arith.constant 0 : index
    %101 = vector.load %arg11[%c0_39, %c0_40] : memref<136x96xbf16, #tpu.memory_space<vmem>>, vector<136x96xbf16>
    %c0_41 = arith.constant 0 : index
    %c0_42 = arith.constant 0 : index
    %102 = vector.load %arg12[%c0_41, %c0_42] : memref<1x96xf32, #tpu.memory_space<vmem>>, vector<1x96xf32>
    %c0_43 = arith.constant 0 : index
    %c0_44 = arith.constant 0 : index
    %103 = vector.load %arg13[%c0_43, %c0_44] : memref<1x96xf32, #tpu.memory_space<vmem>>, vector<1x96xf32>
    %cst_45 = arith.constant dense<0.000000e+00> : vector<32x96xf32>
    %104 = tpu.matmul %100, %101, %cst_45 {dimension_numbers = #tpu.dot_dimension_numbers<[1], [0], [0], [1], [0, 0, 1, 1], [], []>} : vector<32x136xbf16>, vector<136x96xbf16>, vector<32x96xf32> -> vector<32x96xf32>
    %cst_46 = arith.constant dense<0.000000e+00> : vector<96xf32>
    %105 = vector.multi_reduction <add>, %104, %cst_46 [0] : vector<32x96xf32> to vector<96xf32>
    %106 = vector.shape_cast %105 : vector<96xf32> to vector<1x96xf32>
    %cst_47 = arith.constant 3.125000e-02 : f32
    %107 = vector.broadcast %cst_47 : f32 to vector<1x96xf32>
    %108 = arith.mulf %106, %107 : vector<1x96xf32>
    %109 = vector.broadcast %108 : vector<1x96xf32> to vector<32x96xf32>
    %110 = arith.subf %104, %109 : vector<32x96xf32>
    %111 = arith.mulf %110, %110 : vector<32x96xf32>
    %cst_48 = arith.constant dense<0.000000e+00> : vector<96xf32>
    %112 = vector.multi_reduction <add>, %111, %cst_48 [0] : vector<32x96xf32> to vector<96xf32>
    %113 = vector.shape_cast %112 : vector<96xf32> to vector<1x96xf32>
    %cst_49 = arith.constant 3.125000e-02 : f32
    %114 = vector.broadcast %cst_49 : f32 to vector<1x96xf32>
    %115 = arith.mulf %113, %114 : vector<1x96xf32>
    %cst_50 = arith.constant 9.99999974E-6 : f32
    %116 = vector.broadcast %cst_50 : f32 to vector<1x96xf32>
    %117 = arith.addf %115, %116 : vector<1x96xf32>
    %118 = math.rsqrt %117 : vector<1x96xf32>
    %119 = arith.mulf %102, %118 : vector<1x96xf32>
    %120 = vector.broadcast %119 : vector<1x96xf32> to vector<32x96xf32>
    %121 = arith.mulf %110, %120 : vector<32x96xf32>
    %122 = vector.broadcast %103 : vector<1x96xf32> to vector<32x96xf32>
    %123 = arith.addf %121, %122 : vector<32x96xf32>
    %cst_51 = arith.constant 0.000000e+00 : f32
    %124 = vector.broadcast %cst_51 : f32 to vector<32x96xf32>
    %125 = arith.maximumf %123, %124 : vector<32x96xf32>
    %126 = arith.truncf %125 : vector<32x96xf32> to vector<32x96xbf16>
    %c0_52 = arith.constant 0 : index
    %c0_53 = arith.constant 0 : index
    %127 = vector.load %arg14[%c0_52, %c0_53] : memref<96x192xbf16, #tpu.memory_space<vmem>>, vector<96x192xbf16>
    %c0_54 = arith.constant 0 : index
    %c0_55 = arith.constant 0 : index
    %128 = vector.load %arg15[%c0_54, %c0_55] : memref<1x48xf32, #tpu.memory_space<vmem>>, vector<1x48xf32>
    %c0_56 = arith.constant 0 : index
    %c0_57 = arith.constant 0 : index
    %129 = vector.load %arg16[%c0_56, %c0_57] : memref<1x48xf32, #tpu.memory_space<vmem>>, vector<1x48xf32>
    %cst_58 = arith.constant dense<0.000000e+00> : vector<32x192xf32>
    %130 = tpu.matmul %126, %127, %cst_58 {dimension_numbers = #tpu.dot_dimension_numbers<[1], [0], [0], [1], [0, 0, 1, 1], [], []>} : vector<32x96xbf16>, vector<96x192xbf16>, vector<32x192xf32> -> vector<32x192xf32>
    %cst_59 = arith.constant dense<0.000000e+00> : vector<192xf32>
    %131 = vector.multi_reduction <add>, %130, %cst_59 [0] : vector<32x192xf32> to vector<192xf32>
    %132 = vector.shape_cast %131 : vector<192xf32> to vector<1x192xf32>
    %133 = vector.extract_strided_slice %132 {offsets = [0, 0], sizes = [1, 48], strides = [1, 1]} : vector<1x192xf32> to vector<1x48xf32>
    %134 = vector.extract_strided_slice %132 {offsets = [0, 48], sizes = [1, 48], strides = [1, 1]} : vector<1x192xf32> to vector<1x48xf32>
    %135 = arith.addf %133, %134 : vector<1x48xf32>
    %136 = vector.extract_strided_slice %132 {offsets = [0, 96], sizes = [1, 48], strides = [1, 1]} : vector<1x192xf32> to vector<1x48xf32>
    %137 = arith.addf %135, %136 : vector<1x48xf32>
    %138 = vector.extract_strided_slice %132 {offsets = [0, 144], sizes = [1, 48], strides = [1, 1]} : vector<1x192xf32> to vector<1x48xf32>
    %139 = arith.addf %137, %138 : vector<1x48xf32>
    %cst_60 = arith.constant 7.812500e-03 : f32
    %140 = vector.broadcast %cst_60 : f32 to vector<1x48xf32>
    %141 = arith.mulf %139, %140 : vector<1x48xf32>
    %142 = tpu.concatenate %141, %141, %141, %141 in 1 : vector<1x48xf32>, vector<1x48xf32>, vector<1x48xf32>, vector<1x48xf32> -> vector<1x192xf32>
    %143 = vector.broadcast %142 : vector<1x192xf32> to vector<32x192xf32>
    %144 = arith.subf %130, %143 : vector<32x192xf32>
    %145 = arith.mulf %144, %144 : vector<32x192xf32>
    %cst_61 = arith.constant dense<0.000000e+00> : vector<192xf32>
    %146 = vector.multi_reduction <add>, %145, %cst_61 [0] : vector<32x192xf32> to vector<192xf32>
    %147 = vector.shape_cast %146 : vector<192xf32> to vector<1x192xf32>
    %148 = vector.extract_strided_slice %147 {offsets = [0, 0], sizes = [1, 48], strides = [1, 1]} : vector<1x192xf32> to vector<1x48xf32>
    %149 = vector.extract_strided_slice %147 {offsets = [0, 48], sizes = [1, 48], strides = [1, 1]} : vector<1x192xf32> to vector<1x48xf32>
    %150 = arith.addf %148, %149 : vector<1x48xf32>
    %151 = vector.extract_strided_slice %147 {offsets = [0, 96], sizes = [1, 48], strides = [1, 1]} : vector<1x192xf32> to vector<1x48xf32>
    %152 = arith.addf %150, %151 : vector<1x48xf32>
    %153 = vector.extract_strided_slice %147 {offsets = [0, 144], sizes = [1, 48], strides = [1, 1]} : vector<1x192xf32> to vector<1x48xf32>
    %154 = arith.addf %152, %153 : vector<1x48xf32>
    %cst_62 = arith.constant 7.812500e-03 : f32
    %155 = vector.broadcast %cst_62 : f32 to vector<1x48xf32>
    %156 = arith.mulf %154, %155 : vector<1x48xf32>
    %cst_63 = arith.constant 9.99999974E-6 : f32
    %157 = vector.broadcast %cst_63 : f32 to vector<1x48xf32>
    %158 = arith.addf %156, %157 : vector<1x48xf32>
    %159 = math.rsqrt %158 : vector<1x48xf32>
    %160 = arith.mulf %128, %159 : vector<1x48xf32>
    %161 = tpu.concatenate %160, %160, %160, %160 in 1 : vector<1x48xf32>, vector<1x48xf32>, vector<1x48xf32>, vector<1x48xf32> -> vector<1x192xf32>
    %162 = tpu.concatenate %129, %129, %129, %129 in 1 : vector<1x48xf32>, vector<1x48xf32>, vector<1x48xf32>, vector<1x48xf32> -> vector<1x192xf32>
    %163 = vector.broadcast %161 : vector<1x192xf32> to vector<32x192xf32>
    %164 = arith.mulf %144, %163 : vector<32x192xf32>
    %165 = vector.broadcast %162 : vector<1x192xf32> to vector<32x192xf32>
    %166 = arith.addf %164, %165 : vector<32x192xf32>
    %cst_64 = arith.constant 0.000000e+00 : f32
    %167 = vector.broadcast %cst_64 : f32 to vector<32x192xf32>
    %168 = arith.maximumf %166, %167 : vector<32x192xf32>
    %169 = vector.extract_strided_slice %168 {offsets = [0, 0], sizes = [32, 48], strides = [1, 1]} : vector<32x192xf32> to vector<32x48xf32>
    %170 = vector.extract_strided_slice %168 {offsets = [0, 48], sizes = [32, 48], strides = [1, 1]} : vector<32x192xf32> to vector<32x48xf32>
    %171 = vector.extract_strided_slice %168 {offsets = [0, 96], sizes = [32, 48], strides = [1, 1]} : vector<32x192xf32> to vector<32x48xf32>
    %172 = vector.extract_strided_slice %168 {offsets = [0, 144], sizes = [32, 48], strides = [1, 1]} : vector<32x192xf32> to vector<32x48xf32>
    %173 = tpu.concatenate %169, %170, %171, %172 in 0 : vector<32x48xf32>, vector<32x48xf32>, vector<32x48xf32>, vector<32x48xf32> -> vector<128x48xf32>
    %174 = arith.truncf %173 : vector<128x48xf32> to vector<128x48xbf16>
    %c0_65 = arith.constant 0 : index
    %c0_66 = arith.constant 0 : index
    %175 = vector.load %arg17[%c0_65, %c0_66] : memref<48x128xbf16, #tpu.memory_space<vmem>>, vector<48x128xbf16>
    %c0_67 = arith.constant 0 : index
    %c0_68 = arith.constant 0 : index
    %176 = vector.load %arg18[%c0_67, %c0_68] : memref<1x32xf32, #tpu.memory_space<vmem>>, vector<1x32xf32>
    %c0_69 = arith.constant 0 : index
    %c0_70 = arith.constant 0 : index
    %177 = vector.load %arg19[%c0_69, %c0_70] : memref<1x32xf32, #tpu.memory_space<vmem>>, vector<1x32xf32>
    %cst_71 = arith.constant dense<0.000000e+00> : vector<128x128xf32>
    %178 = tpu.matmul %174, %175, %cst_71 {dimension_numbers = #tpu.dot_dimension_numbers<[1], [0], [0], [1], [0, 0, 1, 1], [], []>} : vector<128x48xbf16>, vector<48x128xbf16>, vector<128x128xf32> -> vector<128x128xf32>
    %cst_72 = arith.constant dense<0.000000e+00> : vector<128xf32>
    %179 = vector.multi_reduction <add>, %178, %cst_72 [0] : vector<128x128xf32> to vector<128xf32>
    %180 = vector.shape_cast %179 : vector<128xf32> to vector<1x128xf32>
    %181 = vector.extract_strided_slice %180 {offsets = [0, 0], sizes = [1, 32], strides = [1, 1]} : vector<1x128xf32> to vector<1x32xf32>
    %182 = vector.extract_strided_slice %180 {offsets = [0, 32], sizes = [1, 32], strides = [1, 1]} : vector<1x128xf32> to vector<1x32xf32>
    %183 = arith.addf %181, %182 : vector<1x32xf32>
    %184 = vector.extract_strided_slice %180 {offsets = [0, 64], sizes = [1, 32], strides = [1, 1]} : vector<1x128xf32> to vector<1x32xf32>
    %185 = arith.addf %183, %184 : vector<1x32xf32>
    %186 = vector.extract_strided_slice %180 {offsets = [0, 96], sizes = [1, 32], strides = [1, 1]} : vector<1x128xf32> to vector<1x32xf32>
    %187 = arith.addf %185, %186 : vector<1x32xf32>
    %cst_73 = arith.constant 0.001953125 : f32
    %188 = vector.broadcast %cst_73 : f32 to vector<1x32xf32>
    %189 = arith.mulf %187, %188 : vector<1x32xf32>
    %190 = tpu.concatenate %189, %189, %189, %189 in 1 : vector<1x32xf32>, vector<1x32xf32>, vector<1x32xf32>, vector<1x32xf32> -> vector<1x128xf32>
    %191 = vector.broadcast %190 : vector<1x128xf32> to vector<128x128xf32>
    %192 = arith.subf %178, %191 : vector<128x128xf32>
    %193 = arith.mulf %192, %192 : vector<128x128xf32>
    %cst_74 = arith.constant dense<0.000000e+00> : vector<128xf32>
    %194 = vector.multi_reduction <add>, %193, %cst_74 [0] : vector<128x128xf32> to vector<128xf32>
    %195 = vector.shape_cast %194 : vector<128xf32> to vector<1x128xf32>
    %196 = vector.extract_strided_slice %195 {offsets = [0, 0], sizes = [1, 32], strides = [1, 1]} : vector<1x128xf32> to vector<1x32xf32>
    %197 = vector.extract_strided_slice %195 {offsets = [0, 32], sizes = [1, 32], strides = [1, 1]} : vector<1x128xf32> to vector<1x32xf32>
    %198 = arith.addf %196, %197 : vector<1x32xf32>
    %199 = vector.extract_strided_slice %195 {offsets = [0, 64], sizes = [1, 32], strides = [1, 1]} : vector<1x128xf32> to vector<1x32xf32>
    %200 = arith.addf %198, %199 : vector<1x32xf32>
    %201 = vector.extract_strided_slice %195 {offsets = [0, 96], sizes = [1, 32], strides = [1, 1]} : vector<1x128xf32> to vector<1x32xf32>
    %202 = arith.addf %200, %201 : vector<1x32xf32>
    %cst_75 = arith.constant 0.001953125 : f32
    %203 = vector.broadcast %cst_75 : f32 to vector<1x32xf32>
    %204 = arith.mulf %202, %203 : vector<1x32xf32>
    %cst_76 = arith.constant 9.99999974E-6 : f32
    %205 = vector.broadcast %cst_76 : f32 to vector<1x32xf32>
    %206 = arith.addf %204, %205 : vector<1x32xf32>
    %207 = math.rsqrt %206 : vector<1x32xf32>
    %208 = arith.mulf %176, %207 : vector<1x32xf32>
    %209 = tpu.concatenate %208, %208, %208, %208 in 1 : vector<1x32xf32>, vector<1x32xf32>, vector<1x32xf32>, vector<1x32xf32> -> vector<1x128xf32>
    %210 = tpu.concatenate %177, %177, %177, %177 in 1 : vector<1x32xf32>, vector<1x32xf32>, vector<1x32xf32>, vector<1x32xf32> -> vector<1x128xf32>
    %211 = vector.broadcast %209 : vector<1x128xf32> to vector<128x128xf32>
    %212 = arith.mulf %192, %211 : vector<128x128xf32>
    %213 = vector.broadcast %210 : vector<1x128xf32> to vector<128x128xf32>
    %214 = arith.addf %212, %213 : vector<128x128xf32>
    %cst_77 = arith.constant 0.000000e+00 : f32
    %215 = vector.broadcast %cst_77 : f32 to vector<128x128xf32>
    %216 = arith.maximumf %214, %215 : vector<128x128xf32>
    %217 = vector.extract_strided_slice %216 {offsets = [0, 0], sizes = [128, 32], strides = [1, 1]} : vector<128x128xf32> to vector<128x32xf32>
    %218 = vector.extract_strided_slice %216 {offsets = [0, 32], sizes = [128, 32], strides = [1, 1]} : vector<128x128xf32> to vector<128x32xf32>
    %219 = vector.extract_strided_slice %216 {offsets = [0, 64], sizes = [128, 32], strides = [1, 1]} : vector<128x128xf32> to vector<128x32xf32>
    %220 = vector.extract_strided_slice %216 {offsets = [0, 96], sizes = [128, 32], strides = [1, 1]} : vector<128x128xf32> to vector<128x32xf32>
    %221 = tpu.concatenate %217, %218, %219, %220 in 0 : vector<128x32xf32>, vector<128x32xf32>, vector<128x32xf32>, vector<128x32xf32> -> vector<512x32xf32>
    %222 = arith.truncf %221 : vector<512x32xf32> to vector<512x32xbf16>
    %c0_78 = arith.constant 0 : index
    %c0_79 = arith.constant 0 : index
    %223 = vector.load %arg20[%c0_78, %c0_79] : memref<32x128xbf16, #tpu.memory_space<vmem>>, vector<32x128xbf16>
    %c0_80 = arith.constant 0 : index
    %c0_81 = arith.constant 0 : index
    %224 = vector.load %arg21[%c0_80, %c0_81] : memref<1x128xf32, #tpu.memory_space<vmem>>, vector<1x128xf32>
    %cst_82 = arith.constant dense<0.000000e+00> : vector<512x128xf32>
    %225 = tpu.matmul %222, %223, %cst_82 {dimension_numbers = #tpu.dot_dimension_numbers<[1], [0], [0], [1], [0, 0, 1, 1], [], []>} : vector<512x32xbf16>, vector<32x128xbf16>, vector<512x128xf32> -> vector<512x128xf32>
    %226 = vector.broadcast %224 : vector<1x128xf32> to vector<512x128xf32>
    %227 = arith.addf %225, %226 : vector<512x128xf32>
    %228 = arith.negf %227 : vector<512x128xf32>
    %229 = math.exp %228 : vector<512x128xf32>
    %cst_83 = arith.constant 1.000000e+00 : f32
    %230 = vector.broadcast %cst_83 : f32 to vector<512x128xf32>
    %231 = arith.addf %230, %229 : vector<512x128xf32>
    %232 = arith.divf %230, %231 : vector<512x128xf32>
    %c0_84 = arith.constant 0 : index
    %c0_85 = arith.constant 0 : index
    %233 = vector.load %arg22[%c0_84, %c0_85] : memref<512x128xf32, #tpu.memory_space<vmem>>, vector<512x128xf32>
    tpu.vector_store %arg22[%c0_84, %c0_85], %232 {strides = array<i32>} : memref<512x128xf32, #tpu.memory_space<vmem>>, vector<512x128xf32>,
    return
  }
  func.func @transform_0(%arg0: i32) -> (i32, i32) {
    %c0_i32 = arith.constant 0 : i32
    %c0_i32_0 = arith.constant 0 : i32
    %c0_i32_1 = arith.constant 0 : i32
    return %c0_i32, %c0_i32_0 : i32, i32
  }
  func.func @transform_1(%arg0: i32) -> (i32, i32) {
    %c0_i32 = arith.constant 0 : i32
    %c0_i32_0 = arith.constant 0 : i32
    %c0_i32_1 = arith.constant 0 : i32
    return %c0_i32, %c0_i32_0 : i32, i32
  }
  func.func @transform_2(%arg0: i32) -> (i32, i32) {
    %c0_i32 = arith.constant 0 : i32
    %c0_i32_0 = arith.constant 0 : i32
    %c0_i32_1 = arith.constant 0 : i32
    return %c0_i32, %c0_i32_0 : i32, i32
  }
  func.func @transform_3(%arg0: i32) -> (i32, i32) {
    %c0_i32 = arith.constant 0 : i32
    %c0_i32_0 = arith.constant 0 : i32
    %c0_i32_1 = arith.constant 0 : i32
    return %c0_i32, %c0_i32_0 : i32, i32
  }
  func.func @transform_4(%arg0: i32) -> (i32, i32) {
    %c0_i32 = arith.constant 0 : i32
    %c0_i32_0 = arith.constant 0 : i32
    %c0_i32_1 = arith.constant 0 : i32
    return %c0_i32, %c0_i32_0 : i32, i32
  }
  func.func @transform_5(%arg0: i32) -> (i32, i32) {
    %c0_i32 = arith.constant 0 : i32
    %c0_i32_0 = arith.constant 0 : i32
    %c0_i32_1 = arith.constant 0 : i32
    return %c0_i32, %c0_i32_0 : i32, i32
  }
  func.func @transform_6(%arg0: i32) -> (i32, i32) {
    %c0_i32 = arith.constant 0 : i32
    %c0_i32_0 = arith.constant 0 : i32
    %c0_i32_1 = arith.constant 0 : i32
    return %c0_i32, %c0_i32_0 : i32, i32
  }
  func.func @transform_7(%arg0: i32) -> (i32, i32) {
    %c0_i32 = arith.constant 0 : i32
    %c0_i32_0 = arith.constant 0 : i32
    %c0_i32_1 = arith.constant 0 : i32
    return %c0_i32, %c0_i32_0 : i32, i32
  }
  func.func @transform_8(%arg0: i32) -> (i32, i32) {
    %c0_i32 = arith.constant 0 : i32
    %c0_i32_0 = arith.constant 0 : i32
    %c0_i32_1 = arith.constant 0 : i32
    return %c0_i32, %c0_i32_0 : i32, i32
  }
  func.func @transform_9(%arg0: i32) -> (i32, i32) {
    %c0_i32 = arith.constant 0 : i32
    %c0_i32_0 = arith.constant 0 : i32
    %c0_i32_1 = arith.constant 0 : i32
    return %c0_i32, %c0_i32_0 : i32, i32
  }
  func.func @transform_10(%arg0: i32) -> (i32, i32) {
    %c0_i32 = arith.constant 0 : i32
    %c0_i32_0 = arith.constant 0 : i32
    %c0_i32_1 = arith.constant 0 : i32
    return %c0_i32, %c0_i32_0 : i32, i32
  }
  func.func @transform_11(%arg0: i32) -> (i32, i32) {
    %c0_i32 = arith.constant 0 : i32
    %c0_i32_0 = arith.constant 0 : i32
    %c0_i32_1 = arith.constant 0 : i32
    return %c0_i32, %c0_i32_0 : i32, i32
  }
  func.func @transform_12(%arg0: i32) -> (i32, i32) {
    %c0_i32 = arith.constant 0 : i32
    %c0_i32_0 = arith.constant 0 : i32
    %c0_i32_1 = arith.constant 0 : i32
    return %c0_i32, %c0_i32_0 : i32, i32
  }
  func.func @transform_13(%arg0: i32) -> (i32, i32) {
    %c0_i32 = arith.constant 0 : i32
    %c0_i32_0 = arith.constant 0 : i32
    %c0_i32_1 = arith.constant 0 : i32
    return %c0_i32, %c0_i32_0 : i32, i32
  }
  func.func @transform_14(%arg0: i32) -> (i32, i32) {
    %c0_i32 = arith.constant 0 : i32
    %c0_i32_0 = arith.constant 0 : i32
    %c0_i32_1 = arith.constant 0 : i32
    return %c0_i32, %c0_i32_0 : i32, i32
  }
  func.func @transform_15(%arg0: i32) -> (i32, i32) {
    %c0_i32 = arith.constant 0 : i32
    %c0_i32_0 = arith.constant 0 : i32
    %c0_i32_1 = arith.constant 0 : i32
    return %c0_i32, %c0_i32_0 : i32, i32
  }
  func.func @transform_16(%arg0: i32) -> (i32, i32) {
    %c0_i32 = arith.constant 0 : i32
    %c0_i32_0 = arith.constant 0 : i32
    %c0_i32_1 = arith.constant 0 : i32
    return %c0_i32, %c0_i32_0 : i32, i32
  }
  func.func @transform_17(%arg0: i32) -> (i32, i32) {
    %c0_i32 = arith.constant 0 : i32
    %c0_i32_0 = arith.constant 0 : i32
    %c0_i32_1 = arith.constant 0 : i32
    return %c0_i32, %c0_i32_0 : i32, i32
  }
  func.func @transform_18(%arg0: i32) -> (i32, i32) {
    %c0_i32 = arith.constant 0 : i32
    %c0_i32_0 = arith.constant 0 : i32
    %c0_i32_1 = arith.constant 0 : i32
    return %c0_i32, %c0_i32_0 : i32, i32
  }
  func.func @transform_19(%arg0: i32) -> (i32, i32) {
    %c0_i32 = arith.constant 0 : i32
    %c0_i32_0 = arith.constant 0 : i32
    %c0_i32_1 = arith.constant 0 : i32
    return %c0_i32, %c0_i32_0 : i32, i32
  }
  func.func @transform_20(%arg0: i32) -> (i32, i32) {
    %c0_i32 = arith.constant 0 : i32
    %c0_i32_0 = arith.constant 0 : i32
    %c0_i32_1 = arith.constant 0 : i32
    return %c0_i32, %c0_i32_0 : i32, i32
  }
  func.func @transform_21(%arg0: i32) -> (i32, i32) {
    %c0_i32 = arith.constant 0 : i32
    %c0_i32_0 = arith.constant 0 : i32
    %c0_i32_1 = arith.constant 0 : i32
    return %c0_i32, %c0_i32_0 : i32, i32
  }
}

</mosaic_0001>

<bundles_post_ra>
// kernel: _forward_impl.1
= control target key start
LH: loop header
LB: loop body
LE: loop exit
PB: predicated region body
PF: predicated region fallthrough
CT: control target
= control target key end

     0   :  { %s11428_s0 = inlined_call_operand.vmem [shape: bf16[8,2048], index: 0, kind: input, shape index: {}]   ;;  %s11429_s1 = inlined_call_operand.hbm [shape: bf16[2048,384], index: 1, kind: input, shape index: {}]   ;;  %s11430_s2 = inlined_call_operand.hbm [shape: f32[1,384], index: 2, kind: input, shape index: {}]   ;;  %s11431_s3 = inlined_call_operand.hbm [shape: f32[1,384], index: 3, kind: input, shape index: {}]   ;;  %s11432_s4 = inlined_call_operand.vmem [shape: bf16[384,232], index: 4, kind: input, shape index: {}]   ;;  %s11433_s5 = inlined_call_operand.hbm [shape: f32[1,232], index: 5, kind: input, shape index: {}]   ;;  %s11434_s6 = inlined_call_operand.hbm [shape: f32[1,232], index: 6, kind: input, shape index: {}]   ;;  %s11435_s7 = inlined_call_operand.vmem [shape: bf16[232,544], index: 7, kind: input, shape index: {}]   ;;  %s11436_s8 = inlined_call_operand.hbm [shape: f32[1,136], index: 8, kind: input, shape index: {}]   ;;  %s11437_s9 = inlined_call_operand.hbm [shape: f32[1,136], index: 9, kind: input, shape index: {}]   ;;  %s11438_s10 = inlined_call_operand.hbm [shape: bf16[136,96], index: 10, kind: input, shape index: {}]   ;;  %s11439_s11 = inlined_call_operand.hbm [shape: f32[1,96], index: 11, kind: input, shape index: {}]   ;;  %s11440_s12 = inlined_call_operand.hbm [shape: f32[1,96], index: 12, kind: input, shape index: {}]   ;;  %s11441_s13 = inlined_call_operand.hbm [shape: bf16[96,192], index: 13, kind: input, shape index: {}]   ;;  %s11442_s14 = inlined_call_operand.hbm [shape: f32[1,48], index: 14, kind: input, shape index: {}]   ;;  %s11443_s15 = inlined_call_operand.hbm [shape: f32[1,48], index: 15, kind: input, shape index: {}]   ;;  %s11444_s16 = inlined_call_operand.hbm [shape: bf16[48,128], index: 16, kind: input, shape index: {}]   ;;  %s11445_s17 = inlined_call_operand.hbm [shape: f32[1,32], index: 17, kind: input, shape index: {}]   ;;  %s11446_s18 = inlined_call_operand.hbm [shape: f32[1,32], index: 18, kind: input, shape index: {}]   ;;  %s11447_s19 = inlined_call_operand.hbm [shape: bf16[32,128], index: 19, kind: input, shape index: {}]   ;;  %s11448_s20 = inlined_call_operand.hbm [shape: f32[1,128], index: 20, kind: input, shape index: {}]   ;;  %s11449_s21 = inlined_call_operand.vmem [shape: f32[512,128], index: 21, kind: output, shape index: {}]  }
   0x1   :  { %11456 = sst [smem:[#allocation40_spill]] %s11428_s0 }
   0x2   :  { %11457 = sst [smem:[#allocation41_spill]] %s11429_s1 }
   0x3   :  { %11458 = sst [smem:[#allocation42_spill]] %s11430_s2 }
   0x4   :  { %11459 = sst [smem:[#allocation43_spill]] %s11431_s3 }
   0x5   :  { %11460 = sst [smem:[#allocation44_spill]] %s11432_s4 }
   0x6   :  { %11461 = sst [smem:[#allocation45_spill]] %s11433_s5 }
   0x7   :  { %26 = vsyncpa [#allocation3], 0 }
   0x8   :  { %27 = vsyncpa [#allocation5], 0 }
   0x9   :  { %28 = vsyncpa [#allocation8], 0 }
   0xa   :  { %29 = vsyncpa [#allocation11], 0 }
   0xb   :  { %30 = vsyncpa [#allocation14], 0 }
   0xc   :  { %31 = vsyncpa [#allocation17], 0 }
   0xd   :  { %32 = vsyncpa [#allocation20], 0 }
   0xe   :  { %33 = vsyncpa [#allocation23], 0 }
   0xf   :  { %34 = vsyncpa [#allocation26], 0 }
  0x10   :  { %35 = vsyncpa [#allocation29], 0  ;;  %s9777_s2 = smov [#allocation4]   ;;  %s9778_s26 = smov [#allocation7]  }
  0x11   :  { %s56_s25 = sshll.u32 %s9777_s2, 4  ;;  %s78_s27 = sshll.u32 %s9778_s26, 4  ;;  %s57_s25 = int_to_ptr.vmem [resolvable:$true] %s56_s25  ;;  %s79_s27 = int_to_ptr.vmem [resolvable:$true] %s78_s27 }
  0x12   :  { %s11462_s29 = sld [smem:[#allocation42_spill]] }
  0x18   :  { %s9361_s0 = scalar_lea.hbm %s11462_s29, 48 }
  0x19   :  { %p9362_p0 = scmp.ne.s32.totalorder %s11462_s29, %s9361_s0  ;;  %p9365_p1 = scmp.lt.u32.totalorder %s9361_s0, %s11462_s29 }
  0x1b   :  { %p9367_p2 = pnand %p9365_p1, %p9362_p0 }
  0x1d   :  { %9370 = shalt.err (!%p9367_p2)
}
  0x1e   :  { %s9371_s23 = scalar_lea.vmem %s57_s25, 48  ;;  %s9375_s1 = scalar_lea.vmem %s57_s25, 64 }
  0x1f   :  { %p9372_p3 = scmp.ne.s32.totalorder %s57_s25, %s9371_s23  ;;  %p9376_p4 = scmp.lt.s32.totalorder %s57_s25, %s57_s25 }
  0x20   :  { %p9377_p5 = scmp.lt.s32.totalorder %s9375_s1, %s9371_s23 }
  0x22   :  { %p9378_p6 = por %p9377_p5, %p9376_p4 }
  0x24   :  { %p9379_p7 = pnand %p9378_p6, %p9372_p3 }
  0x26   :  { %9382 = shalt.err (!%p9379_p7)
}
  0x27   :  { %59 = dma.hbm_to_vmem [thread:$0]  %s11462_s29, 48, %s57_s25, [#allocation5]  }
  0x28   :  { %s11463_s28 = sld [smem:[#allocation45_spill]] }
  0x2e   :  { %s9383_s4 = scalar_lea.hbm %s11463_s28, 32 }
  0x2f   :  { %p9384_p8 = scmp.ne.s32.totalorder %s11463_s28, %s9383_s4  ;;  %p9387_p9 = scmp.lt.u32.totalorder %s9383_s4, %s11463_s28 }
  0x31   :  { %p9389_p10 = pnand %p9387_p9, %p9384_p8 }
  0x33   :  { %9392 = shalt.err (!%p9389_p10)
}
  0x34   :  { %s9393_s23 = scalar_lea.vmem %s79_s27, 32  ;;  %p9398_p12 = scmp.lt.s32.totalorder %s79_s27, %s79_s27 }
  0x35   :  { %p9394_p11 = scmp.ne.s32.totalorder %s79_s27, %s9393_s23  ;;  %p9399_p13 = scmp.lt.s32.totalorder %s9393_s23, %s9393_s23 }
  0x37   :  { %p9400_p0 = por %p9399_p13, %p9398_p12 }
  0x39   :  { %p9401_p1 = pnand %p9400_p0, %p9394_p11 }
  0x3b   :  { %9404 = shalt.err (!%p9401_p1)
}
  0x3c   :  { %81 = dma.hbm_to_vmem [thread:$0]  %s11463_s28, 32, %s79_s27, [#allocation8]  }
  0x3d   :  { %s9779_s1 = smov [#allocation10]   ;;  %s9780_s2 = smov [#allocation13]  }
  0x3e   :  { %s100_s24 = sshll.u32 %s9779_s1, 4  ;;  %s119_s26 = sshll.u32 %s9780_s2, 4  ;;  %s101_s24 = int_to_ptr.vmem [resolvable:$true] %s100_s24  ;;  %s9946_s26 = int_to_ptr.vmem [resolvable:$true] %s119_s26 }
  0x3f   :  { %s9405_s30 = scalar_lea.hbm %s11436_s8, 32 }
  0x40   :  { %p9406_p2 = scmp.ne.s32.totalorder %s11436_s8, %s9405_s30  ;;  %p9409_p3 = scmp.lt.u32.totalorder %s9405_s30, %s11436_s8 }
  0x42   :  { %p9411_p4 = pnand %p9409_p3, %p9406_p2 }
  0x44   :  { %9414 = shalt.err (!%p9411_p4)
}
  0x45   :  { %s9415_s27 = scalar_lea.vmem %s101_s24, 32  ;;  %p9420_p6 = scmp.lt.s32.totalorder %s101_s24, %s101_s24 }
  0x46   :  { %p9416_p5 = scmp.ne.s32.totalorder %s101_s24, %s9415_s27  ;;  %p9421_p7 = scmp.lt.s32.totalorder %s9415_s27, %s9415_s27 }
  0x48   :  { %p9422_p8 = por %p9421_p7, %p9420_p6 }
  0x4a   :  { %p9423_p9 = pnand %p9422_p8, %p9416_p5 }
  0x4c   :  { %9426 = shalt.err (!%p9423_p9)
}
  0x4d   :  { %103 = dma.hbm_to_vmem [thread:$0]  %s11436_s8, 32, %s101_s24, [#allocation11]  }
  0x4e   :  { %s9427_s2 = scalar_lea.hbm %s11438_s10, 1088 }
  0x4f   :  { %p9428_p10 = scmp.ne.s32.totalorder %s11438_s10, %s9427_s2  ;;  %p9431_p11 = scmp.lt.u32.totalorder %s9427_s2, %s11438_s10 }
  0x51   :  { %p9433_p12 = pnand %p9431_p11, %p9428_p10 }
  0x53   :  { %9436 = shalt.err (!%p9433_p12)
}
  0x54   :  { %s9437_s5 = scalar_lea.vmem %s9946_s26, 1088  ;;  %p9442_p0 = scmp.lt.s32.totalorder %s9946_s26, %s9946_s26 }
  0x55   :  { %p9438_p13 = scmp.ne.s32.totalorder %s9946_s26, %s9437_s5  ;;  %p9443_p1 = scmp.lt.s32.totalorder %s9437_s5, %s9437_s5 }
  0x57   :  { %p9444_p2 = por %p9443_p1, %p9442_p0 }
  0x59   :  { %p9445_p3 = pnand %p9444_p2, %p9438_p13 }
  0x5b   :  { %9448 = shalt.err (!%p9445_p3)
}
  0x5c   :  { %s9781_s8 = smov 64   ;;  %s9782_s24 = smov 4  }
  0x5d   :  { %125 = dma.hbm_to_vmem [thread:$0]  %s11438_s10, 1088, %s9946_s26, [#allocation14], %s9781_s8, %s9781_s8, %s9782_s24  }
  0x5e   :  { %s9783_s27 = smov [#allocation16]   ;;  %s9784_s25 = smov [#allocation19]  }
  0x5f   :  { %s142_s28 = sshll.u32 %s9783_s27, 4  ;;  %s164_s29 = sshll.u32 %s9784_s25, 4  ;;  %s143_s28 = int_to_ptr.vmem [resolvable:$true] %s142_s28  ;;  %s165_s29 = int_to_ptr.vmem [resolvable:$true] %s164_s29 }
  0x60   :  { %s9449_s3 = scalar_lea.hbm %s11440_s12, 16 }
  0x61   :  { %p9450_p4 = scmp.ne.s32.totalorder %s11440_s12, %s9449_s3  ;;  %p9453_p5 = scmp.lt.u32.totalorder %s9449_s3, %s11440_s12 }
  0x63   :  { %p9455_p6 = pnand %p9453_p5, %p9450_p4 }
  0x65   :  { %9458 = shalt.err (!%p9455_p6)
}
  0x66   :  { %s9459_s10 = scalar_lea.vmem %s143_s28, 16  ;;  %s9463_s26 = scalar_lea.vmem %s143_s28, 32 }
  0x67   :  { %p9460_p7 = scmp.ne.s32.totalorder %s143_s28, %s9459_s10  ;;  %p9464_p8 = scmp.lt.s32.totalorder %s143_s28, %s143_s28 }
  0x68   :  { %p9465_p9 = scmp.lt.s32.totalorder %s9463_s26, %s9459_s10 }
  0x6a   :  { %p9466_p10 = por %p9465_p9, %p9464_p8 }
  0x6c   :  { %p9467_p11 = pnand %p9466_p10, %p9460_p7 }
  0x6e   :  { %9470 = shalt.err (!%p9467_p11)
}
  0x6f   :  { %145 = dma.hbm_to_vmem [thread:$0]  %s11440_s12, 16, %s143_s28, [#allocation17]  }
  0x70   :  { %s9471_s1 = scalar_lea.hbm %s11442_s14, 16 }
  0x71   :  { %p9472_p12 = scmp.ne.s32.totalorder %s11442_s14, %s9471_s1  ;;  %p9475_p13 = scmp.lt.u32.totalorder %s9471_s1, %s11442_s14 }
  0x73   :  { %p9477_p0 = pnand %p9475_p13, %p9472_p12 }
  0x75   :  { %9480 = shalt.err (!%p9477_p0)
}
  0x76   :  { %s9481_s0 = scalar_lea.vmem %s165_s29, 16  ;;  %s9485_s5 = scalar_lea.vmem %s165_s29, 32 }
  0x77   :  { %p9482_p1 = scmp.ne.s32.totalorder %s165_s29, %s9481_s0  ;;  %p9486_p2 = scmp.lt.s32.totalorder %s165_s29, %s165_s29 }
  0x78   :  { %p9487_p3 = scmp.lt.s32.totalorder %s9485_s5, %s9481_s0 }
  0x7a   :  { %p9488_p4 = por %p9487_p3, %p9486_p2 }
  0x7c   :  { %p9489_p5 = pnand %p9488_p4, %p9482_p1 }
  0x7e   :  { %9492 = shalt.err (!%p9489_p5)
}
  0x7f   :  { %167 = dma.hbm_to_vmem [thread:$0]  %s11442_s14, 16, %s165_s29, [#allocation20]  }
  0x80   :  { %s9785_s10 = smov [#allocation22]   ;;  %s9786_s22 = smov [#allocation25]  }
  0x81   :  { %s183_s26 = sshll.u32 %s9785_s10, 4  ;;  %s206_s23 = sshll.u32 %s9786_s22, 4  ;;  %s184_s26 = int_to_ptr.vmem [resolvable:$true] %s183_s26  ;;  %s207_s23 = int_to_ptr.vmem [resolvable:$true] %s206_s23 }
  0x82   :  { %s9493_s1 = scalar_lea.hbm %s11444_s16, 384 }
  0x83   :  { %p9494_p6 = scmp.ne.s32.totalorder %s11444_s16, %s9493_s1  ;;  %p9497_p7 = scmp.lt.u32.totalorder %s9493_s1, %s11444_s16 }
  0x85   :  { %p9499_p8 = pnand %p9497_p7, %p9494_p6 }
  0x87   :  { %9502 = shalt.err (!%p9499_p8)
}
  0x88   :  { %s9503_s14 = scalar_lea.vmem %s184_s26, 384  ;;  %p9508_p10 = scmp.lt.s32.totalorder %s184_s26, %s184_s26 }
  0x89   :  { %p9504_p9 = scmp.ne.s32.totalorder %s184_s26, %s9503_s14  ;;  %p9509_p11 = scmp.lt.s32.totalorder %s9503_s14, %s9503_s14 }
  0x8b   :  { %p9510_p12 = por %p9509_p11, %p9508_p10 }
  0x8d   :  { %p9511_p13 = pnand %p9510_p12, %p9504_p9 }
  0x8f   :  { %9514 = shalt.err (!%p9511_p13)
}
  0x90   :  { %189 = dma.hbm_to_vmem [thread:$0]  %s11444_s16, 384, %s184_s26, [#allocation23], %s9781_s8, %s9781_s8, %s9782_s24  }
  0x91   :  { %s9515_s28 = scalar_lea.hbm %s11446_s18, 16 }
  0x92   :  { %p9516_p0 = scmp.ne.s32.totalorder %s11446_s18, %s9515_s28  ;;  %p9519_p1 = scmp.lt.u32.totalorder %s9515_s28, %s11446_s18 }
  0x94   :  { %p9521_p2 = pnand %p9519_p1, %p9516_p0 }
  0x96   :  { %9524 = shalt.err (!%p9521_p2)
}
  0x97   :  { %s9525_s1 = scalar_lea.vmem %s207_s23, 16  ;;  %s9529_s2 = scalar_lea.vmem %s207_s23, 32 }
  0x98   :  { %p9526_p3 = scmp.ne.s32.totalorder %s207_s23, %s9525_s1  ;;  %p9530_p4 = scmp.lt.s32.totalorder %s207_s23, %s207_s23 }
  0x99   :  { %p9531_p5 = scmp.lt.s32.totalorder %s9529_s2, %s9525_s1 }
  0x9b   :  { %p9532_p6 = por %p9531_p5, %p9530_p4 }
  0x9d   :  { %p9533_p7 = pnand %p9532_p6, %p9526_p3 }
  0x9f   :  { %9536 = shalt.err (!%p9533_p7)
}
  0xa0   :  { %209 = dma.hbm_to_vmem [thread:$0]  %s11446_s18, 16, %s207_s23, [#allocation26]  }
  0xa1   :  { %s9787_s3 = smov [#allocation2]   ;;  %s11464_s29 = sld [smem:[#allocation41_spill]] }
  0xa2   :  { %s43_s4 = sshll.u32 %s9787_s3, 4  ;;  %s44_s4 = int_to_ptr.vmem [resolvable:$true] %s43_s4 }
  0xa7   :  { %s9537_s0 = scalar_lea.hbm %s11464_s29, 49152 }
  0xa8   :  { %p9538_p8 = scmp.ne.s32.totalorder %s11464_s29, %s9537_s0  ;;  %p9541_p9 = scmp.lt.u32.totalorder %s9537_s0, %s11464_s29 }
  0xaa   :  { %p9543_p10 = pnand %p9541_p9, %p9538_p8 }
  0xac   :  { %9546 = shalt.err (!%p9543_p10)
}
  0xad   :  { %s9547_s22 = scalar_lea.vmem %s44_s4, 49152  ;;  %p9552_p12 = scmp.lt.s32.totalorder %s44_s4, %s44_s4 }
  0xae   :  { %p9548_p11 = scmp.ne.s32.totalorder %s44_s4, %s9547_s22  ;;  %p9553_p13 = scmp.lt.s32.totalorder %s9547_s22, %s9547_s22 }
  0xb0   :  { %p9554_p0 = por %p9553_p13, %p9552_p12 }
  0xb2   :  { %p9555_p1 = pnand %p9554_p0, %p9548_p11 }
  0xb4   :  { %9558 = shalt.err (!%p9555_p1)
}
  0xb5   :  { %s9788_s18 = smov 192   ;;  %s9789_s23 = smov 12  }
  0xb6   :  { %49 = dma.hbm_to_vmem [thread:$0]  %s11464_s29, 49152, %s44_s4, [#allocation3], %s9788_s18, %s9788_s18, %s9789_s23  }
  0xb7   :  { %s9790_s1 = smov [#allocation6]   ;;  %s9791_s16 = smov [#allocation9]  }
  0xb8   :  { %s66_s2 = sshll.u32 %s9790_s1, 4  ;;  %s88_s26 = sshll.u32 %s9791_s16, 4  ;;  %s67_s2 = int_to_ptr.vmem [resolvable:$true] %s66_s2  ;;  %s89_s26 = int_to_ptr.vmem [resolvable:$true] %s88_s26 }
  0xb9   :  { %s11465_s14 = sld [smem:[#allocation43_spill]] }
  0xbf   :  { %s9559_s0 = scalar_lea.hbm %s11465_s14, 48 }
  0xc0   :  { %p9560_p2 = scmp.ne.s32.totalorder %s11465_s14, %s9559_s0  ;;  %p9563_p3 = scmp.lt.u32.totalorder %s9559_s0, %s11465_s14 }
  0xc2   :  { %p9565_p4 = pnand %p9563_p3, %p9560_p2 }
  0xc4   :  { %9568 = shalt.err (!%p9565_p4)
}
  0xc5   :  { %s9569_s4 = scalar_lea.vmem %s67_s2, 48  ;;  %s9573_s29 = scalar_lea.vmem %s67_s2, 64 }
  0xc6   :  { %p9570_p5 = scmp.ne.s32.totalorder %s67_s2, %s9569_s4  ;;  %p9574_p6 = scmp.lt.s32.totalorder %s67_s2, %s67_s2 }
  0xc7   :  { %p9575_p7 = scmp.lt.s32.totalorder %s9573_s29, %s9569_s4 }
  0xc9   :  { %p9576_p8 = por %p9575_p7, %p9574_p6 }
  0xcb   :  { %p9577_p9 = pnand %p9576_p8, %p9570_p5 }
  0xcd   :  { %9580 = shalt.err (!%p9577_p9)
}
  0xce   :  { %69 = dma.hbm_to_vmem [thread:$0]  %s11465_s14, 48, %s67_s2, [#allocation5]  }
  0xcf   :  { %s9581_s25 = scalar_lea.hbm %s11434_s6, 32 }
  0xd0   :  { %p9582_p10 = scmp.ne.s32.totalorder %s11434_s6, %s9581_s25  ;;  %p9585_p11 = scmp.lt.u32.totalorder %s9581_s25, %s11434_s6 }
  0xd2   :  { %p9587_p12 = pnand %p9585_p11, %p9582_p10 }
  0xd4   :  { %9590 = shalt.err (!%p9587_p12)
}
  0xd5   :  { %s9591_s0 = scalar_lea.vmem %s89_s26, 32  ;;  %p9596_p0 = scmp.lt.s32.totalorder %s89_s26, %s89_s26 }
  0xd6   :  { %p9592_p13 = scmp.ne.s32.totalorder %s89_s26, %s9591_s0  ;;  %p9597_p1 = scmp.lt.s32.totalorder %s9591_s0, %s9591_s0 }
  0xd8   :  { %p9598_p2 = por %p9597_p1, %p9596_p0 }
  0xda   :  { %p9599_p3 = pnand %p9598_p2, %p9592_p13 }
  0xdc   :  { %9602 = shalt.err (!%p9599_p3)
}
  0xdd   :  { %91 = dma.hbm_to_vmem [thread:$0]  %s11434_s6, 32, %s89_s26, [#allocation8]  }
  0xde   :  { %s9792_s5 = smov [#allocation12]   ;;  %s9793_s28 = smov [#allocation15]  }
  0xdf   :  { %s110_s12 = sshll.u32 %s9792_s5, 4  ;;  %s132_s10 = sshll.u32 %s9793_s28, 4  ;;  %s111_s12 = int_to_ptr.vmem [resolvable:$true] %s110_s12  ;;  %s133_s10 = int_to_ptr.vmem [resolvable:$true] %s132_s10 }
  0xe0   :  { %s9603_s22 = scalar_lea.hbm %s11437_s9, 32 }
  0xe1   :  { %p9604_p4 = scmp.ne.s32.totalorder %s11437_s9, %s9603_s22  ;;  %p9607_p5 = scmp.lt.u32.totalorder %s9603_s22, %s11437_s9 }
  0xe3   :  { %p9609_p6 = pnand %p9607_p5, %p9604_p4 }
  0xe5   :  { %9612 = shalt.err (!%p9609_p6)
}
  0xe6   :  { %s9613_s6 = scalar_lea.vmem %s111_s12, 32  ;;  %p9618_p8 = scmp.lt.s32.totalorder %s111_s12, %s111_s12 }
  0xe7   :  { %p9614_p7 = scmp.ne.s32.totalorder %s111_s12, %s9613_s6  ;;  %p9619_p9 = scmp.lt.s32.totalorder %s9613_s6, %s9613_s6 }
  0xe9   :  { %p9620_p10 = por %p9619_p9, %p9618_p8 }
  0xeb   :  { %p9621_p11 = pnand %p9620_p10, %p9614_p7 }
  0xed   :  { %9624 = shalt.err (!%p9621_p11)
}
  0xee   :  { %113 = dma.hbm_to_vmem [thread:$0]  %s11437_s9, 32, %s111_s12, [#allocation11]  }
  0xef   :  { %s9625_s30 = scalar_lea.hbm %s11439_s11, 16 }
  0xf0   :  { %p9626_p12 = scmp.ne.s32.totalorder %s11439_s11, %s9625_s30  ;;  %p9629_p13 = scmp.lt.u32.totalorder %s9625_s30, %s11439_s11 }
  0xf2   :  { %p9631_p0 = pnand %p9629_p13, %p9626_p12 }
  0xf4   :  { %9634 = shalt.err (!%p9631_p0)
}
  0xf5   :  { %s9635_s28 = scalar_lea.vmem %s133_s10, 16  ;;  %s9639_s4 = scalar_lea.vmem %s133_s10, 32 }
  0xf6   :  { %p9636_p1 = scmp.ne.s32.totalorder %s133_s10, %s9635_s28  ;;  %p9640_p2 = scmp.lt.s32.totalorder %s133_s10, %s133_s10 }
  0xf7   :  { %p9641_p3 = scmp.lt.s32.totalorder %s9639_s4, %s9635_s28 }
  0xf9   :  { %p9642_p4 = por %p9641_p3, %p9640_p2 }
  0xfb   :  { %p9643_p5 = pnand %p9642_p4, %p9636_p1 }
  0xfd   :  { %9646 = shalt.err (!%p9643_p5)
}
  0xfe   :  { %135 = dma.hbm_to_vmem [thread:$0]  %s11439_s11, 16, %s133_s10, [#allocation14]  }
  0xff   :  { %s9794_s29 = smov [#allocation18]   ;;  %s9647_s27 = scalar_lea.hbm %s11441_s13, 1536 }
 0x100   :  { %s151_s22 = sshll.u32 %s9794_s29, 4  ;;  %p9648_p6 = scmp.ne.s32.totalorder %s11441_s13, %s9647_s27  ;;  %s152_s22 = int_to_ptr.vmem [resolvable:$true] %s151_s22 }
 0x101   :  { %p9651_p7 = scmp.lt.u32.totalorder %s9647_s27, %s11441_s13 }
 0x103   :  { %p9653_p8 = pnand %p9651_p7, %p9648_p6 }
 0x105   :  { %9656 = shalt.err (!%p9653_p8)
}
 0x106   :  { %s9657_s16 = scalar_lea.vmem %s152_s22, 1536  ;;  %p9662_p10 = scmp.lt.s32.totalorder %s152_s22, %s152_s22 }
 0x107   :  { %p9658_p9 = scmp.ne.s32.totalorder %s152_s22, %s9657_s16  ;;  %p9663_p11 = scmp.lt.s32.totalorder %s9657_s16, %s9657_s16 }
 0x109   :  { %p9664_p12 = por %p9663_p11, %p9662_p10 }
 0x10b   :  { %p9665_p13 = pnand %p9664_p12, %p9658_p9 }
 0x10d   :  { %9668 = shalt.err (!%p9665_p13)
}
 0x10e   :  { %s9795_s11 = smov 128   ;;  %s9796_s10 = smov 8  }
 0x10f   :  { %157 = dma.hbm_to_vmem [thread:$0]  %s11441_s13, 1536, %s152_s22, [#allocation17], %s9795_s11, %s9795_s11, %s9796_s10  }
 0x110   :  { %s9797_s0 = smov [#allocation21]   ;;  %s9798_s14 = smov [#allocation24]  }
 0x111   :  { %s174_s2 = sshll.u32 %s9797_s0, 4  ;;  %s196_s5 = sshll.u32 %s9798_s14, 4  ;;  %s175_s2 = int_to_ptr.vmem [resolvable:$true] %s174_s2  ;;  %s197_s5 = int_to_ptr.vmem [resolvable:$true] %s196_s5 }
 0x112   :  { %s9669_s9 = scalar_lea.hbm %s11443_s15, 16 }
 0x113   :  { %p9670_p0 = scmp.ne.s32.totalorder %s11443_s15, %s9669_s9  ;;  %p9673_p1 = scmp.lt.u32.totalorder %s9669_s9, %s11443_s15 }
 0x115   :  { %p9675_p2 = pnand %p9673_p1, %p9670_p0 }
 0x117   :  { %9678 = shalt.err (!%p9675_p2)
}
 0x118   :  { %s9679_s13 = scalar_lea.vmem %s175_s2, 16  ;;  %s9683_s22 = scalar_lea.vmem %s175_s2, 32 }
 0x119   :  { %p9680_p3 = scmp.ne.s32.totalorder %s175_s2, %s9679_s13  ;;  %p9684_p4 = scmp.lt.s32.totalorder %s175_s2, %s175_s2 }
 0x11a   :  { %p9685_p5 = scmp.lt.s32.totalorder %s9683_s22, %s9679_s13 }
 0x11c   :  { %p9686_p6 = por %p9685_p5, %p9684_p4 }
 0x11e   :  { %p9687_p7 = pnand %p9686_p6, %p9680_p3 }
 0x120   :  { %9690 = shalt.err (!%p9687_p7)
}
 0x121   :  { %177 = dma.hbm_to_vmem [thread:$0]  %s11443_s15, 16, %s175_s2, [#allocation20]  }
 0x122   :  { %s9691_s1 = scalar_lea.hbm %s11445_s17, 16 }
 0x123   :  { %p9692_p8 = scmp.ne.s32.totalorder %s11445_s17, %s9691_s1  ;;  %p9695_p9 = scmp.lt.u32.totalorder %s9691_s1, %s11445_s17 }
 0x125   :  { %p9697_p10 = pnand %p9695_p9, %p9692_p8 }
 0x127   :  { %9700 = shalt.err (!%p9697_p10)
}
 0x128   :  { %s9701_s0 = scalar_lea.vmem %s197_s5, 16  ;;  %s9705_s14 = scalar_lea.vmem %s197_s5, 32 }
 0x129   :  { %p9702_p11 = scmp.ne.s32.totalorder %s197_s5, %s9701_s0  ;;  %p9706_p12 = scmp.lt.s32.totalorder %s197_s5, %s197_s5 }
 0x12a   :  { %p9707_p13 = scmp.lt.s32.totalorder %s9705_s14, %s9701_s0 }
 0x12c   :  { %p9708_p0 = por %p9707_p13, %p9706_p12 }
 0x12e   :  { %p9709_p1 = pnand %p9708_p0, %p9702_p11 }
 0x130   :  { %9712 = shalt.err (!%p9709_p1)
}
 0x131   :  { %199 = dma.hbm_to_vmem [thread:$0]  %s11445_s17, 16, %s197_s5, [#allocation23]  }
 0x132   :  { %s9799_s28 = smov [#allocation27]   ;;  %s9800_s9 = smov [#allocation28]  }
 0x133   :  { %s215_s4 = sshll.u32 %s9799_s28, 4  ;;  %s228_s12 = sshll.u32 %s9800_s9, 4  ;;  %s216_s4 = int_to_ptr.vmem [resolvable:$true] %s215_s4  ;;  %s229_s12 = int_to_ptr.vmem [resolvable:$true] %s228_s12 }
 0x134   :  { %s9713_s23 = scalar_lea.hbm %s11447_s19, 256 }
 0x135   :  { %p9714_p2 = scmp.ne.s32.totalorder %s11447_s19, %s9713_s23  ;;  %p9717_p3 = scmp.lt.u32.totalorder %s9713_s23, %s11447_s19 }
 0x137   :  { %p9719_p4 = pnand %p9717_p3, %p9714_p2 }
 0x139   :  { %9722 = shalt.err (!%p9719_p4)
}
 0x13a   :  { %s9723_s17 = scalar_lea.vmem %s216_s4, 256  ;;  %p9728_p6 = scmp.lt.s32.totalorder %s216_s4, %s216_s4 }
 0x13b   :  { %p9724_p5 = scmp.ne.s32.totalorder %s216_s4, %s9723_s17  ;;  %p9729_p7 = scmp.lt.s32.totalorder %s9723_s17, %s9723_s17 }
 0x13d   :  { %p9730_p8 = por %p9729_p7, %p9728_p6 }
 0x13f   :  { %p9731_p9 = pnand %p9730_p8, %p9724_p5 }
 0x141   :  { %9734 = shalt.err (!%p9731_p9)
}
 0x142   :  { %221 = dma.hbm_to_vmem [thread:$0]  %s11447_s19, 256, %s216_s4, [#allocation26], %s9781_s8, %s9781_s8, %s9782_s24  }
 0x143   :  { %s9735_s16 = scalar_lea.hbm %s11448_s20, 16 }
 0x144   :  { %p9736_p10 = scmp.ne.s32.totalorder %s11448_s20, %s9735_s16  ;;  %p9739_p11 = scmp.lt.u32.totalorder %s9735_s16, %s11448_s20 }
 0x146   :  { %p9741_p12 = pnand %p9739_p11, %p9736_p10 }
 0x148   :  { %9744 = shalt.err (!%p9741_p12)
}
 0x149   :  { %s9745_s14 = scalar_lea.vmem %s229_s12, 16  ;;  %s9749_s15 = scalar_lea.vmem %s229_s12, 32 }
 0x14a   :  { %p9746_p13 = scmp.ne.s32.totalorder %s229_s12, %s9745_s14  ;;  %p9750_p0 = scmp.lt.s32.totalorder %s229_s12, %s229_s12 }
 0x14b   :  { %p9751_p1 = scmp.lt.s32.totalorder %s9749_s15, %s9745_s14 }
 0x14d   :  { %p9752_p2 = por %p9751_p1, %p9750_p0 }
 0x14f   :  { %p9753_p3 = pnand %p9752_p2, %p9746_p13 }
 0x151   :  { %9756 = shalt.err (!%p9753_p3)
}
 0x152   :  { %231 = dma.hbm_to_vmem [thread:$0]  %s11448_s20, 16, %s229_s12, [#allocation29]  }
 0x153   :  { %9757 = dma.done.wait [#allocation3], 49152  }
 0x154   :  { %9758 = vsyncadd [#allocation3], 4294918144 }
 0x155   :  { %9759 = dma.done.wait [#allocation5], 96  }
 0x156   :  { %9760 = vsyncadd [#allocation5], 4294967200 }
 0x157   :  { %9761 = dma.done.wait [#allocation8], 64  }
 0x158   :  { %9762 = vsyncadd [#allocation8], 4294967232 }
 0x159   :  { %9763 = dma.done.wait [#allocation11], 64  }
 0x15a   :  { %9764 = vsyncadd [#allocation11], 4294967232 }
 0x15b   :  { %9765 = dma.done.wait [#allocation14], 1104  }
 0x15c   :  { %9766 = vsyncadd [#allocation14], 4294966192 }
 0x15d   :  { %9767 = dma.done.wait [#allocation17], 1552  }
 0x15e   :  { %9768 = vsyncadd [#allocation17], 4294965744 }
 0x15f   :  { %9769 = dma.done.wait [#allocation20], 32  }
 0x160   :  { %9770 = vsyncadd [#allocation20], 4294967264 }
 0x161   :  { %9771 = dma.done.wait [#allocation23], 400  }
 0x162   :  { %9772 = vsyncadd [#allocation23], 4294966896 }
 0x163   :  { %9773 = dma.done.wait [#allocation26], 272  }
 0x164   :  { %9774 = vsyncadd [#allocation26], 4294967024 }
 0x165   :  { %9775 = dma.done.wait [#allocation29], 16  }
 0x166   :  { %9776 = vsyncadd [#allocation29], 4294967280  ;;  %v8350_v0 = vld [vmem:[#allocation2 + $0x4] ss:$12 sps:$4 sm:$0xff]   ;;  %v8352_v1 = vld [vmem:[#allocation2] ss:$12 sps:$4 sm:$0xff]  }
 0x167   :  { %2913 = vmatprep.subr.bf16.mxu0 %v8350_v0  ;;  %v8353_v2 = vld [vmem:[#allocation2 + $0x1c] ss:$12 sps:$4 sm:$0xff]   ;;  %v8355_v3 = vld [vmem:[#allocation2 + $0x18] ss:$12 sps:$4 sm:$0xff]   ;;  %v8356_v4 = vld [vmem:[#allocation2 + $0x34] ss:$12 sps:$4 sm:$0xff]  }
 0x168   :  { %2914 = vmatpush1.bf16.msra.mxu0 %v8352_v1  ;;  %v8358_v5 = vld [vmem:[#allocation2 + $0x30] ss:$12 sps:$4 sm:$0xff]   ;;  %v8359_v6 = vld [vmem:[#allocation2 + $0x4c] ss:$12 sps:$4 sm:$0xff]   ;;  %v8368_v7 = vld [vmem:[#allocation2 + $0xc8] ss:$12 sps:$4 sm:$0xff]  }
 0x169   :  { %2915 = vmatprep.subr.bf16.mxu0 %v8353_v2  ;;  %v8369_v8 = vld [vmem:[#allocation2 + $0x8] ss:$12 sps:$4 sm:$0xff]   ;;  %7793 = vmatprep.subr.bf16.mxu1 %v8368_v7  ;;  %v8362_v10 = vld [vmem:[#allocation2 + $0x64] ss:$12 sps:$4 sm:$0xff]   ;;  %v8373_v11 = vld [vmem:[#allocation2 + $0xe0] ss:$12 sps:$4 sm:$0xff]  }
 0x16a   :  { %v8361_v9 = vld [vmem:[#allocation2 + $0x48] ss:$12 sps:$4 sm:$0xff]   ;;  %7794 = vmatpush3.bf16.msra.mxu1 %v8369_v8  ;;  %v8374_v12 = vld [vmem:[#allocation2 + $0x20] ss:$12 sps:$4 sm:$0xff]   ;;  %v8378_v15 = vld [vmem:[#allocation2 + $0xf8] ss:$12 sps:$4 sm:$0xff]  }
 0x16b   :  { %v8364_v13 = vld [vmem:[#allocation2 + $0x60] ss:$12 sps:$4 sm:$0xff]   ;;  %v8365_v14 = vld [vmem:[#allocation2 + $0x7c] ss:$12 sps:$4 sm:$0xff]   ;;  %7795 = vmatprep.subr.bf16.mxu1 %v8373_v11  ;;  %v8379_v16 = vld [vmem:[#allocation2 + $0x38] ss:$12 sps:$4 sm:$0xff]  }
 0x16c   :  { %2916 = vmatpush1.bf16.msra.mxu0 %v8355_v3  ;;  %v8367_v17 = vld [vmem:[#allocation2 + $0x78] ss:$12 sps:$4 sm:$0xff]   ;;  %v8383_v18 = vld [vmem:[#allocation2 + $0x110] ss:$12 sps:$4 sm:$0xff]   ;;  %v8370_v20 = vld [vmem:[#allocation2 + $0x94] ss:$12 sps:$4 sm:$0xff]  }
 0x16d   :  { %2917 = vmatprep.subr.bf16.mxu0 %v8356_v4  ;;  %v8384_v19 = vld [vmem:[#allocation2 + $0x50] ss:$12 sps:$4 sm:$0xff]   ;;  %v8388_v22 = vld [vmem:[#allocation2 + $0x128] ss:$12 sps:$4 sm:$0xff]   ;;  %v8375_v24 = vld [vmem:[#allocation2 + $0xac] ss:$12 sps:$4 sm:$0xff]  }
 0x16e   :  { %7796 = vmatpush3.bf16.msra.mxu1 %v8374_v12  ;;  %v8372_v21 = vld [vmem:[#allocation2 + $0x90] ss:$12 sps:$4 sm:$0xff]   ;;  %v8389_v23 = vld [vmem:[#allocation2 + $0x68] ss:$12 sps:$4 sm:$0xff]   ;;  %v8393_v25 = vld [vmem:[#allocation2 + $0x140] ss:$12 sps:$4 sm:$0xff]  }
 0x16f   :  { %7797 = vmatprep.subr.bf16.mxu1 %v8378_v15  ;;  %v8377_v26 = vld [vmem:[#allocation2 + $0xa8] ss:$12 sps:$4 sm:$0xff]   ;;  %v8380_v27 = vld [vmem:[#allocation2 + $0xc4] ss:$12 sps:$4 sm:$0xff]   ;;  %v8394_v28 = vld [vmem:[#allocation2 + $0x80] ss:$12 sps:$4 sm:$0xff]  }
 0x170   :  { %2918 = vmatpush1.bf16.msra.mxu0 %v8358_v5  ;;  %v8398_v29 = vld [vmem:[#allocation2 + $0x158] ss:$12 sps:$4 sm:$0xff]   ;;  %v8382_v30 = vld [vmem:[#allocation2 + $0xc0] ss:$12 sps:$4 sm:$0xff]   ;;  %v8385_v31 = vld [vmem:[#allocation2 + $0xdc] ss:$12 sps:$4 sm:$0xff]  }
 0x171   :  { %2919 = vmatprep.subr.bf16.mxu0 %v8359_v6  ;;  %v8399_v32 = vld [vmem:[#allocation2 + $0x98] ss:$12 sps:$4 sm:$0xff]   ;;  %v8403_v33 = vld [vmem:[#allocation2 + $0x170] ss:$12 sps:$4 sm:$0xff]   ;;  %v8390_v35 = vld [vmem:[#allocation2 + $0xf4] ss:$12 sps:$4 sm:$0xff]  }
 0x172   :  { %7798 = vmatpush3.bf16.msra.mxu1 %v8379_v16  ;;  %v8387_v34 = vld [vmem:[#allocation2 + $0xd8] ss:$12 sps:$4 sm:$0xff]   ;;  %s11466_s28 = sld [smem:[#allocation40_spill]]  ;;  %v8404_v37 = vld [vmem:[#allocation2 + $0xb0] ss:$12 sps:$4 sm:$0xff]   ;;  %s11467_s11 = sld [smem:[#allocation44_spill]] }
 0x173   :  { %7799 = vmatprep.subr.bf16.mxu1 %v8383_v18  ;;  %v8410_v39 = vld [vmem:[#allocation2 + $0x248] ss:$12 sps:$4 sm:$0xff]   ;;  %v8392_v40 = vld [vmem:[#allocation2 + $0xf0] ss:$12 sps:$4 sm:$0xff]   ;;  %v8395_v41 = vld [vmem:[#allocation2 + $0x10c] ss:$12 sps:$4 sm:$0xff]  }
 0x174   :  { %2920 = vmatpush1.bf16.msra.mxu0 %v8361_v9  ;;  %v8411_v43 = vld [vmem:[#allocation2 + $0x188] ss:$12 sps:$4 sm:$0xff]   ;;  %v8415_v44 = vld [vmem:[#allocation2 + $0x260] ss:$12 sps:$4 sm:$0xff]   ;;  %v8400_v47 = vld [vmem:[#allocation2 + $0x124] ss:$12 sps:$4 sm:$0xff]  }
 0x175   :  { %2921 = vmatprep.subr.bf16.mxu0 %v8362_v10  ;;  %v8397_v45 = vld [vmem:[#allocation2 + $0x108] ss:$12 sps:$4 sm:$0xff]   ;;  %v8416_v46 = vld [vmem:[#allocation2 + $0x1a0] ss:$12 sps:$4 sm:$0xff]   ;;  %v8420_v48 = vld [vmem:[#allocation2 + $0x278] ss:$12 sps:$4 sm:$0xff]  }
 0x176   :  { %7800 = vmatpush3.bf16.msra.mxu1 %v8384_v19  ;;  %v8402_v49 = vld [vmem:[#allocation2 + $0x120] ss:$12 sps:$4 sm:$0xff]   ;;  %v8405_v50 = vld [vmem:[#allocation2 + $0x13c] ss:$12 sps:$4 sm:$0xff]   ;;  %v8421_v51 = vld [vmem:[#allocation2 + $0x1b8] ss:$12 sps:$4 sm:$0xff]  }
 0x177   :  { %7801 = vmatprep.subr.bf16.mxu1 %v8388_v22  ;;  %v8425_v52 = vld [vmem:[#allocation2 + $0x290] ss:$12 sps:$4 sm:$0xff]   ;;  %v8407_v53 = vld [vmem:[#allocation2 + $0x138] ss:$12 sps:$4 sm:$0xff]   ;;  %v8412_v54 = vld [vmem:[#allocation2 + $0x154] ss:$12 sps:$4 sm:$0xff]  }
 0x178   :  { %2922 = vmatpush1.bf16.msra.mxu0 %v8364_v13  ;;  %v287_v36 = vld [vmem:[%s11466_s28] sm:$0xff]  ;;  %v8426_v55 = vld [vmem:[#allocation2 + $0x1d0] ss:$12 sps:$4 sm:$0xff]   ;;  %v8430_v56 = vld [vmem:[#allocation2 + $0x2a8] ss:$12 sps:$4 sm:$0xff]   ;;  %vm4616_vm0 = vcmask 1043456  }
 0x179   :  { %2923 = vmatprep.subr.bf16.mxu0 %v8365_v14  ;;  %v7130_v38 = vcombine.high %v287_v36, %v287_v36  ;;  %v7129_v42 = vcombine.low %v287_v36, %v287_v36  ;;  %v8414_v57 = vld [vmem:[#allocation2 + $0x150] ss:$12 sps:$4 sm:$0xff]   ;;  %v8417_v58 = vld [vmem:[#allocation2 + $0x16c] ss:$12 sps:$4 sm:$0xff]   ;;  %v8431_v59 = vld [vmem:[#allocation2 + $0x1e8] ss:$12 sps:$4 sm:$0xff]  }
 0x17a   :  { %7802 = vmatpush3.bf16.msra.mxu1 %v8389_v23  ;;  %v8435_v60 = vld [vmem:[#allocation2 + $0x2c0] ss:$12 sps:$4 sm:$0xff]   ;;  %v8419_v61 = vld [vmem:[#allocation2 + $0x168] ss:$12 sps:$4 sm:$0xff]   ;;  %v8424_v62 = vld [vmem:[#allocation2 + $0x184] ss:$12 sps:$4 sm:$0xff]  }
 0x17b   :  { %7803 = vmatprep.subr.bf16.mxu1 %v8393_v25  ;;  %3273 = vmatprep.mubr.bf16.mxu1 %v7130_v38  ;;  %v8436_v63 = vld [vmem:[#allocation2 + $0x200] ss:$12 sps:$4 sm:$0xff]   ;;  %v8440_v0 = vld [vmem:[#allocation2 + $0x2d8] ss:$12 sps:$4 sm:$0xff]   ;;  %v8429_v3 = vld [vmem:[#allocation2 + $0x19c] ss:$12 sps:$4 sm:$0xff]  }
 0x17c   :  { %2924 = vmatpush1.bf16.msra.mxu0 %v8367_v17  ;;  %2945 = vmatprep.mubr.bf16.mxu0 %v7130_v38  ;;  %v8422_v1 = vld [vmem:[#allocation2 + $0x180] ss:$12 sps:$4 sm:$0xff]   ;;  %v8441_v5 = vld [vmem:[#allocation2 + $0x218] ss:$12 sps:$4 sm:$0xff]   ;;  %v8445_v6 = vld [vmem:[#allocation2 + $0x2f0] ss:$12 sps:$4 sm:$0xff]  }
 0x17d   :  { %2925 = vmatprep.subr.bf16.mxu0 %v8370_v20  ;;  %v288_v2 = vld [vmem:[%s11466_s28 + $0x8] sm:$0xff]  ;;  %v8427_v7 = vld [vmem:[#allocation2 + $0x198] ss:$12 sps:$4 sm:$0xff]   ;;  %v8446_v8 = vld [vmem:[#allocation2 + $0x230] ss:$12 sps:$4 sm:$0xff]   ;;  %vm4065_vm1 = vcmask 850944  }
 0x17e   :  { %7804 = vmatpush3.bf16.msra.mxu1 %v8394_v28  ;;  %v7132_v4 = vcombine.high %v288_v2, %v288_v2  ;;  %v8434_v9 = vld [vmem:[#allocation2 + $0x1b4] ss:$12 sps:$4 sm:$0xff]   ;;  %v8432_v11 = vld [vmem:[#allocation2 + $0x1b0] ss:$12 sps:$4 sm:$0xff]   ;;  %v10161_v12 = vcombine.low %v288_v2, %v288_v2  ;;  %v8439_v13 = vld [vmem:[#allocation2 + $0x1cc] ss:$12 sps:$4 sm:$0xff]  }
 0x17f   :  { %7805 = vmatprep.subr.bf16.mxu1 %v8398_v29  ;;  %v8452_v10 = vld [vmem:[#allocation2 + $0x3c8] ss:$12 sps:$4 sm:$0xff]   ;;  %v8457_v15 = vld [vmem:[#allocation2 + $0x3e0] ss:$12 sps:$4 sm:$0xff]   ;;  %v8444_v17 = vld [vmem:[#allocation2 + $0x1e4] ss:$12 sps:$4 sm:$0xff]  }
 0x180   :  { %2926 = vmatpush1.bf16.msra.mxu0 %v8372_v21  ;;  %v8453_v14 = vld [vmem:[#allocation2 + $0x308] ss:$12 sps:$4 sm:$0xff]   ;;  %v8458_v18 = vld [vmem:[#allocation2 + $0x320] ss:$12 sps:$4 sm:$0xff]   ;;  %v8462_v19 = vld [vmem:[#allocation2 + $0x3f8] ss:$12 sps:$4 sm:$0xff]  }
 0x181   :  { %2927 = vmatprep.subr.bf16.mxu0 %v8375_v24  ;;  %v8437_v16 = vld [vmem:[#allocation2 + $0x1c8] ss:$12 sps:$4 sm:$0xff]   ;;  %v8442_v20 = vld [vmem:[#allocation2 + $0x1e0] ss:$12 sps:$4 sm:$0xff]   ;;  %v8463_v22 = vld [vmem:[#allocation2 + $0x338] ss:$12 sps:$4 sm:$0xff]  }
 0x182   :  { %7806 = vmatpush3.bf16.msra.mxu1 %v8399_v32  ;;  %v8449_v21 = vld [vmem:[#allocation2 + $0x1fc] ss:$12 sps:$4 sm:$0xff]   ;;  %v8447_v24 = vld [vmem:[#allocation2 + $0x1f8] ss:$12 sps:$4 sm:$0xff]   ;;  %v8456_v25 = vld [vmem:[#allocation2 + $0x214] ss:$12 sps:$4 sm:$0xff]  }
 0x183   :  { %7807 = vmatprep.subr.bf16.mxu1 %v8403_v33  ;;  %v8467_v23 = vld [vmem:[#allocation2 + $0x410] ss:$12 sps:$4 sm:$0xff]   ;;  %v8473_v29 = vld [vmem:[#allocation2 + $0x368] ss:$12 sps:$4 sm:$0xff]   ;;  %v8478_v36 = vld [vmem:[#allocation2 + $0x380] ss:$12 sps:$4 sm:$0xff]  }
 0x184   :  { %2928 = vmatpush1.bf16.msra.mxu0 %v8377_v26  ;;  %v8468_v26 = vld [vmem:[#allocation2 + $0x350] ss:$12 sps:$4 sm:$0xff]   ;;  %v8459_v33 = vld [vmem:[#allocation2 + $0x228] ss:$12 sps:$4 sm:$0xff]   ;;  %v8464_v38 = vld [vmem:[#allocation2 + $0x240] ss:$12 sps:$4 sm:$0xff]  }
 0x185   :  { %2929 = vmatprep.subr.bf16.mxu0 %v8380_v27  ;;  %v8472_v27 = vld [vmem:[#allocation2 + $0x428] ss:$12 sps:$4 sm:$0xff]   ;;  %v8454_v28 = vld [vmem:[#allocation2 + $0x210] ss:$12 sps:$4 sm:$0xff]   ;;  %v8503_v2 = vld [vmem:[#allocation2 + $0x2ec] ss:$12 sps:$4 sm:$0xff]  }
 0x186   :  { %7808 = vmatpush3.bf16.msra.mxu1 %v8404_v37  ;;  %v289_v32 = vld [vmem:[%s11466_s28 + $0x10] sm:$0xff]  ;;  %v8482_v37 = vld [vmem:[#allocation2 + $0x458] ss:$12 sps:$4 sm:$0xff]   ;;  %s9804_s3 = smov 112   ;;  %s9805_s30 = smov 104   ;;  %vm4778_vm2 = vcmask 261120  }
 0x187   :  { %7815 = vmatprep.subr.bf16.mxu1 %v8410_v39  ;;  %v8471_v39 = vld [vmem:[#allocation2 + $0x25c] ss:$12 sps:$4 sm:$0xff]   ;;  %vm4792_vm3 = vcmask 982016   ;;  %vm4803_vm4 = vcmask 916480   ;;  %s9806_s0 = smov 16   ;;  %s9807_s14 = smov 24  }
 0x188   :  { %2930 = vmatpush1.bf16.msra.mxu0 %v8382_v30  ;;  %v8461_v30 = vld [vmem:[#allocation2 + $0x22c] ss:$12 sps:$4 sm:$0xff]   ;;  %vm4827_vm5 = vcmask 64512   ;;  %vm4835_vm6 = vcmask 130048   ;;  %vm4843_vm7 = vcmask 195584   ;;  %vm5249_vm8 = vcmask 785408  }
 0x189   :  { %2931 = vmatprep.subr.bf16.mxu0 %v8385_v31  ;;  %3274 = vmatmul.mubr.bf16.vlgmr.msra.gmra.mrb[0].mxu1 %v7129_v42  ;;  %v8477_v31 = vld [vmem:[#allocation2 + $0x440] ss:$12 sps:$4 sm:$0xff]   ;;  %vm5457_vm9 = vcmask 523264   ;;  %s9809_s15 = smov 80   ;;  %s9810_s19 = smov 96   ;;  %vm5499_vm10 = vcmask 392192  }
 0x18a   :  { %7816 = vmatpush3.bf16.msra.mxu1 %v8411_v43  ;;  %3313 = vmatprep.mubr.bf16.mxu1 %v7132_v4  ;;  %v8476_v43 = vld [vmem:[#allocation2 + $0x274] ss:$12 sps:$4 sm:$0xff]   ;;  %s9811_s24 = smov 48  }
 0x18b   :  { %7817 = vmatprep.subr.bf16.mxu1 %v8415_v44  ;;  %v8488_v44 = vld [vmem:[#allocation2 + $0x3b0] ss:$12 sps:$4 sm:$0xff]  }
 0x18c   :  { %2932 = vmatpush1.bf16.msra.mxu0 %v8387_v34  ;;  %v10167_v34 = vcombine.high %v289_v32, %v289_v32 }
 0x18d   :  { %2933 = vmatprep.subr.bf16.mxu0 %v8390_v35  ;;  %v8466_v35 = vld [vmem:[#allocation2 + $0x244] ss:$12 sps:$4 sm:$0xff]  }
 0x18e   :  { %7818 = vmatpush3.bf16.msra.mxu1 %v8416_v46  ;;  %v8474_v46 = vld [vmem:[#allocation2 + $0x270] ss:$12 sps:$4 sm:$0xff]  }
 0x18f   :  { %7819 = vmatprep.subr.bf16.mxu1 %v8420_v48  ;;  %v10170_v48 = vcombine.low %v289_v32, %v289_v32  ;;  %v8531_v32 = vld [vmem:[#allocation2 + $0x378] ss:$12 sps:$4 sm:$0xff]  }
 0x190   :  { %2934 = vmatpush1.bf16.msra.mxu0 %v8392_v40  ;;  %v8483_v40 = vld [vmem:[#allocation2 + $0x398] ss:$12 sps:$4 sm:$0xff]  }
 0x191   :  { %2935 = vmatprep.subr.bf16.mxu0 %v8395_v41  ;;  %v8487_v41 = vld [vmem:[#allocation2 + $0x470] ss:$12 sps:$4 sm:$0xff]  }
 0x192   :  { %7820 = vmatpush3.bf16.msra.mxu1 %v8421_v51  ;;  %v8479_v51 = vld [vmem:[#allocation2 + $0x288] ss:$12 sps:$4 sm:$0xff]  }
 0x193   :  { %7821 = vmatprep.subr.bf16.mxu1 %v8425_v52  ;;  %v8500_v52 = vld [vmem:[#allocation2 + $0x4a0] ss:$12 sps:$4 sm:$0xff]  }
 0x194   :  { %2936 = vmatpush1.bf16.msra.mxu0 %v8397_v45  ;;  %v8494_v45 = vld [vmem:[#allocation2 + $0x548] ss:$12 sps:$4 sm:$0xff]  }
 0x195   :  { %2937 = vmatprep.subr.bf16.mxu0 %v8400_v47  ;;  %v8481_v47 = vld [vmem:[#allocation2 + $0x28c] ss:$12 sps:$4 sm:$0xff]  }
 0x196   :  { %7822 = vmatpush3.bf16.msra.mxu1 %v8426_v55  ;;  %v8484_v55 = vld [vmem:[#allocation2 + $0x2a0] ss:$12 sps:$4 sm:$0xff]  }
 0x197   :  { %7823 = vmatprep.subr.bf16.mxu1 %v8430_v56  ;;  %v8491_v56 = vld [vmem:[#allocation2 + $0x2bc] ss:$12 sps:$4 sm:$0xff]  }
 0x198   :  { %2938 = vmatpush1.bf16.msra.mxu0 %v8402_v49  ;;  %v8495_v49 = vld [vmem:[#allocation2 + $0x488] ss:$12 sps:$4 sm:$0xff]  }
 0x199   :  { %2939 = vmatprep.subr.bf16.mxu0 %v8405_v50  ;;  %v8499_v50 = vld [vmem:[#allocation2 + $0x560] ss:$12 sps:$4 sm:$0xff]  }
 0x19a   :  { %7824 = vmatpush3.bf16.msra.mxu1 %v8431_v59  ;;  %v8489_v59 = vld [vmem:[#allocation2 + $0x2b8] ss:$12 sps:$4 sm:$0xff]  }
 0x19b   :  { %7825 = vmatprep.subr.bf16.mxu1 %v8435_v60  ;;  %v8498_v60 = vld [vmem:[#allocation2 + $0x2d4] ss:$12 sps:$4 sm:$0xff]  }
 0x19c   :  { %2940 = vmatpush1.bf16.msra.mxu0 %v8407_v53  ;;  %v8486_v53 = vld [vmem:[#allocation2 + $0x2a4] ss:$12 sps:$4 sm:$0xff]  }
 0x19d   :  { %2941 = vmatprep.subr.bf16.mxu0 %v8412_v54  ;;  %v8504_v54 = vld [vmem:[#allocation2 + $0x578] ss:$12 sps:$4 sm:$0xff]  }
 0x19e   :  { %7826 = vmatpush3.bf16.msra.mxu1 %v8436_v63  ;;  %v8514_v63 = vld [vmem:[#allocation2 + $0x5a8] ss:$12 sps:$4 sm:$0xff]  }
 0x19f   :  { %7827 = vmatprep.subr.bf16.mxu1 %v8440_v0 }
 0x1a0   :  { %2942 = vmatpush1.bf16.msra.mxu0 %v8414_v57  ;;  %v8505_v57 = vld [vmem:[#allocation2 + $0x4b8] ss:$12 sps:$4 sm:$0xff]  }
 0x1a1   :  { %2943 = vmatprep.subr.bf16.mxu0 %v8417_v58  ;;  %v8509_v58 = vld [vmem:[#allocation2 + $0x590] ss:$12 sps:$4 sm:$0xff]  }
 0x1a2   :  { %7828 = vmatpush3.bf16.msra.mxu1 %v8441_v5  ;;  %v8501_v5 = vld [vmem:[#allocation2 + $0x2e8] ss:$12 sps:$4 sm:$0xff]  }
 0x1a3   :  { %7829 = vmatprep.subr.bf16.mxu1 %v8445_v6  ;;  %v8508_v6 = vld [vmem:[#allocation2 + $0x304] ss:$12 sps:$4 sm:$0xff]  }
 0x1a4   :  { %2944 = vmatpush1.bf16.msra.mxu0 %v8419_v61  ;;  %v8510_v61 = vld [vmem:[#allocation2 + $0x4d0] ss:$12 sps:$4 sm:$0xff]  }
 0x1a5   :  { %2954 = vmatprep.subr.bf16.mxu0 %v8424_v62  ;;  %v290_v62 = vld [vmem:[%s11466_s28 + $0x18] sm:$0xff] }
 0x1a6   :  { %7830 = vmatpush3.bf16.msra.mxu1 %v8446_v8  ;;  %v10176_v0 = vcombine.high %v290_v62, %v290_v62  ;;  %v8524_v8 = vld [vmem:[#allocation2 + $0x5d8] ss:$12 sps:$4 sm:$0xff]  }
 0x1a7   :  { %2946 = vmatmul.mubr.bf16.vlgmr.msra.gmra.mrb[0].mxu0 %v7129_v42  ;;  %7837 = vmatprep.subr.bf16.mxu1 %v8452_v10  ;;  %v8469_v42 = vld [vmem:[#allocation2 + $0x258] ss:$12 sps:$4 sm:$0xff]   ;;  %v8513_v10 = vld [vmem:[#allocation2 + $0x31c] ss:$12 sps:$4 sm:$0xff]  }
 0x1a8   :  { %2955 = vmatpush1.bf16.msra.mxu0 %v8422_v1  ;;  %2986 = vmatprep.mubr.bf16.mxu0 %v7132_v4  ;;  %v8496_v1 = vld [vmem:[#allocation2 + $0x2d0] ss:$12 sps:$4 sm:$0xff]   ;;  %v8519_v4 = vld [vmem:[#allocation2 + $0x5c0] ss:$12 sps:$4 sm:$0xff]  }
 0x1a9   :  { %2956 = vmatprep.subr.bf16.mxu0 %v8429_v3  ;;  %3314 = vmatmul.mubr.bf16.vlgmr.msra.gmra.mrb[4].mxu1 %v10161_v12  ;;  %v8515_v3 = vld [vmem:[#allocation2 + $0x4e8] ss:$12 sps:$4 sm:$0xff]  }
 0x1aa   :  { %7838 = vmatpush3.bf16.msra.mxu1 %v8453_v14  ;;  %3353 = vmatprep.mubr.bf16.mxu1 %v10167_v34  ;;  %v8511_v14 = vld [vmem:[#allocation2 + $0x318] ss:$12 sps:$4 sm:$0xff]  }
 0x1ab   :  { %7839 = vmatprep.subr.bf16.mxu1 %v8457_v15  ;;  %v8530_v15 = vld [vmem:[#allocation2 + $0x530] ss:$12 sps:$4 sm:$0xff]  }
 0x1ac   :  { %2957 = vmatpush1.bf16.msra.mxu0 %v8427_v7  ;;  %v8520_v7 = vld [vmem:[#allocation2 + $0x500] ss:$12 sps:$4 sm:$0xff]  }
 0x1ad   :  { %2958 = vmatprep.subr.bf16.mxu0 %v8434_v9  ;;  %v8506_v9 = vld [vmem:[#allocation2 + $0x300] ss:$12 sps:$4 sm:$0xff]  }
 0x1ae   :  { %7840 = vmatpush3.bf16.msra.mxu1 %v8458_v18  ;;  %v8516_v18 = vld [vmem:[#allocation2 + $0x330] ss:$12 sps:$4 sm:$0xff]  }
 0x1af   :  { %7841 = vmatprep.subr.bf16.mxu1 %v8462_v19  ;;  %v10181_v19 = vcombine.low %v290_v62, %v290_v62  ;;  %v8584_v62 = vld [vmem:[#allocation2 + $0x7a0] ss:$12 sps:$4 sm:$0xff]  }
 0x1b0   :  { %2959 = vmatpush1.bf16.msra.mxu0 %v8432_v11  ;;  %v8525_v11 = vld [vmem:[#allocation2 + $0x518] ss:$12 sps:$4 sm:$0xff]  }
 0x1b1   :  { %2960 = vmatprep.subr.bf16.mxu0 %v8439_v13  ;;  %v8529_v13 = vld [vmem:[#allocation2 + $0x5f0] ss:$12 sps:$4 sm:$0xff]  }
 0x1b2   :  { %7842 = vmatpush3.bf16.msra.mxu1 %v8463_v22  ;;  %v8521_v22 = vld [vmem:[#allocation2 + $0x348] ss:$12 sps:$4 sm:$0xff]  }
 0x1b3   :  { %7843 = vmatprep.subr.bf16.mxu1 %v8467_v23  ;;  %v8528_v23 = vld [vmem:[#allocation2 + $0x364] ss:$12 sps:$4 sm:$0xff]  }
 0x1b4   :  { %2961 = vmatpush1.bf16.msra.mxu0 %v8437_v16  ;;  %v8518_v16 = vld [vmem:[#allocation2 + $0x334] ss:$12 sps:$4 sm:$0xff]  }
 0x1b5   :  { %2962 = vmatprep.subr.bf16.mxu0 %v8444_v17  ;;  %v8536_v17 = vld [vmem:[#allocation2 + $0x6c8] ss:$12 sps:$4 sm:$0xff]  }
 0x1b6   :  { %7844 = vmatpush3.bf16.msra.mxu1 %v8468_v26  ;;  %v8526_v26 = vld [vmem:[#allocation2 + $0x360] ss:$12 sps:$4 sm:$0xff]  }
 0x1b7   :  { %7845 = vmatprep.subr.bf16.mxu1 %v8472_v27  ;;  %v8533_v27 = vld [vmem:[#allocation2 + $0x37c] ss:$12 sps:$4 sm:$0xff]  }
 0x1b8   :  { %2963 = vmatpush1.bf16.msra.mxu0 %v8442_v20  ;;  %v8523_v20 = vld [vmem:[#allocation2 + $0x34c] ss:$12 sps:$4 sm:$0xff]  }
 0x1b9   :  { %2964 = vmatprep.subr.bf16.mxu0 %v8449_v21  ;;  %v8537_v21 = vld [vmem:[#allocation2 + $0x608] ss:$12 sps:$4 sm:$0xff]  }
 0x1ba   :  { %7846 = vmatpush3.bf16.msra.mxu1 %v8473_v29  ;;  %v8547_v29 = vld [vmem:[#allocation2 + $0x638] ss:$12 sps:$4 sm:$0xff]  }
 0x1bb   :  { %7847 = vmatprep.subr.bf16.mxu1 %v8477_v31  ;;  %v8551_v31 = vld [vmem:[#allocation2 + $0x710] ss:$12 sps:$4 sm:$0xff]  }
 0x1bc   :  { %2965 = vmatpush1.bf16.msra.mxu0 %v8447_v24  ;;  %v8542_v24 = vld [vmem:[#allocation2 + $0x620] ss:$12 sps:$4 sm:$0xff]  }
 0x1bd   :  { %2966 = vmatprep.subr.bf16.mxu0 %v8456_v25  ;;  %v8546_v25 = vld [vmem:[#allocation2 + $0x6f8] ss:$12 sps:$4 sm:$0xff]  }
 0x1be   :  { %7848 = vmatpush3.bf16.msra.mxu1 %v8478_v36  ;;  %v8538_v36 = vld [vmem:[#allocation2 + $0x390] ss:$12 sps:$4 sm:$0xff]  }
 0x1bf   :  { %7849 = vmatprep.subr.bf16.mxu1 %v8482_v37  ;;  %v8557_v37 = vld [vmem:[#allocation2 + $0x668] ss:$12 sps:$4 sm:$0xff]  }
 0x1c0   :  { %2967 = vmatpush1.bf16.msra.mxu0 %v8454_v28  ;;  %v291_v28 = vld [vmem:[%s11466_s28 + $0x20] sm:$0xff] }
 0x1c1   :  { %2968 = vmatprep.subr.bf16.mxu0 %v8461_v30  ;;  %v10187_v30 = vcombine.high %v291_v28, %v291_v28 }
 0x1c2   :  { %7850 = vmatpush3.bf16.msra.mxu1 %v8483_v40  ;;  %v8543_v40 = vld [vmem:[#allocation2 + $0x3a8] ss:$12 sps:$4 sm:$0xff]  }
 0x1c3   :  { %7851 = vmatprep.subr.bf16.mxu1 %v8487_v41  ;;  %v8550_v41 = vld [vmem:[#allocation2 + $0x3c4] ss:$12 sps:$4 sm:$0xff]  }
 0x1c4   :  { %2969 = vmatpush1.bf16.msra.mxu0 %v8459_v33  ;;  %v8540_v33 = vld [vmem:[#allocation2 + $0x394] ss:$12 sps:$4 sm:$0xff]  }
 0x1c5   :  { %2970 = vmatprep.subr.bf16.mxu0 %v8466_v35  ;;  %v8556_v35 = vld [vmem:[#allocation2 + $0x728] ss:$12 sps:$4 sm:$0xff]  }
 0x1c6   :  { %7852 = vmatpush3.bf16.msra.mxu1 %v8488_v44  ;;  %v8548_v44 = vld [vmem:[#allocation2 + $0x3c0] ss:$12 sps:$4 sm:$0xff]  }
 0x1c7   :  { %7859 = vmatprep.subr.bf16.mxu1 %v8494_v45  ;;  %v8555_v45 = vld [vmem:[#allocation2 + $0x3dc] ss:$12 sps:$4 sm:$0xff]  }
 0x1c8   :  { %2971 = vmatpush1.bf16.msra.mxu0 %v8464_v38  ;;  %v8545_v38 = vld [vmem:[#allocation2 + $0x3ac] ss:$12 sps:$4 sm:$0xff]  }
 0x1c9   :  { %2972 = vmatprep.subr.bf16.mxu0 %v8471_v39  ;;  %3354 = vmatmul.mubr.bf16.vlgmr.msra.gmra.mrb[8].mxu1 %v10170_v48  ;;  %v8561_v39 = vld [vmem:[#allocation2 + $0x740] ss:$12 sps:$4 sm:$0xff]  }
 0x1ca   :  { %7860 = vmatpush3.bf16.msra.mxu1 %v8495_v49  ;;  %3393 = vmatprep.mubr.bf16.mxu1 %v10176_v0  ;;  %v8553_v49 = vld [vmem:[#allocation2 + $0x3d8] ss:$12 sps:$4 sm:$0xff]  }
 0x1cb   :  { %7861 = vmatprep.subr.bf16.mxu1 %v8499_v50  ;;  %v8560_v50 = vld [vmem:[#allocation2 + $0x3f4] ss:$12 sps:$4 sm:$0xff]  }
 0x1cc   :  { %2973 = vmatpush1.bf16.msra.mxu0 %v8469_v42  ;;  %v8562_v42 = vld [vmem:[#allocation2 + $0x680] ss:$12 sps:$4 sm:$0xff]  }
 0x1cd   :  { %2974 = vmatprep.subr.bf16.mxu0 %v8476_v43  ;;  %v8566_v43 = vld [vmem:[#allocation2 + $0x758] ss:$12 sps:$4 sm:$0xff]  }
 0x1ce   :  { %7862 = vmatpush3.bf16.msra.mxu1 %v8500_v52  ;;  %v8578_v52 = vld [vmem:[#allocation2 + $0x848] ss:$12 sps:$4 sm:$0xff]  }
 0x1cf   :  { %7863 = vmatprep.subr.bf16.mxu1 %v8504_v54  ;;  %v8565_v54 = vld [vmem:[#allocation2 + $0x40c] ss:$12 sps:$4 sm:$0xff]  }
 0x1d0   :  { %2975 = vmatpush1.bf16.msra.mxu0 %v8474_v46  ;;  %v8567_v46 = vld [vmem:[#allocation2 + $0x698] ss:$12 sps:$4 sm:$0xff]  }
 0x1d1   :  { %2976 = vmatprep.subr.bf16.mxu0 %v8481_v47  ;;  %v8571_v47 = vld [vmem:[#allocation2 + $0x770] ss:$12 sps:$4 sm:$0xff]  }
 0x1d2   :  { %7864 = vmatpush3.bf16.msra.mxu1 %v8505_v57  ;;  %v8583_v57 = vld [vmem:[#allocation2 + $0x860] ss:$12 sps:$4 sm:$0xff]  }
 0x1d3   :  { %7865 = vmatprep.subr.bf16.mxu1 %v8509_v58  ;;  %v8563_v58 = vld [vmem:[#allocation2 + $0x408] ss:$12 sps:$4 sm:$0xff]  }
 0x1d4   :  { %2977 = vmatpush1.bf16.msra.mxu0 %v8479_v51  ;;  %v8572_v51 = vld [vmem:[#allocation2 + $0x6b0] ss:$12 sps:$4 sm:$0xff]  }
 0x1d5   :  { %2978 = vmatprep.subr.bf16.mxu0 %v8486_v53  ;;  %v8558_v53 = vld [vmem:[#allocation2 + $0x3f0] ss:$12 sps:$4 sm:$0xff]  }
 0x1d6   :  { %7866 = vmatpush3.bf16.msra.mxu1 %v8510_v61 }
 0x1d7   :  { %7867 = vmatprep.subr.bf16.mxu1 %v8514_v63  ;;  %v8588_v63 = vld [vmem:[#allocation2 + $0x878] ss:$12 sps:$4 sm:$0xff]  }
 0x1d8   :  { %2979 = vmatpush1.bf16.msra.mxu0 %v8484_v55  ;;  %v10190_v55 = vcombine.low %v291_v28, %v291_v28 }
 0x1d9   :  { %2980 = vmatprep.subr.bf16.mxu0 %v8491_v56  ;;  %v8579_v56 = vld [vmem:[#allocation2 + $0x788] ss:$12 sps:$4 sm:$0xff]  }
 0x1da   :  { %7868 = vmatpush3.bf16.msra.mxu1 %v8515_v3  ;;  %v8575_v3 = vld [vmem:[#allocation2 + $0x43c] ss:$12 sps:$4 sm:$0xff]  }
 0x1db   :  { %7869 = vmatprep.subr.bf16.mxu1 %v8519_v4  ;;  %v8593_v4 = vld [vmem:[#allocation2 + $0x890] ss:$12 sps:$4 sm:$0xff]  }
 0x1dc   :  { %2981 = vmatpush1.bf16.msra.mxu0 %v8489_v59  ;;  %v292_v59 = vld [vmem:[%s11466_s28 + $0x28] sm:$0xff] }
 0x1dd   :  { %2982 = vmatprep.subr.bf16.mxu0 %v8498_v60  ;;  %v8570_v60 = vld [vmem:[#allocation2 + $0x424] ss:$12 sps:$4 sm:$0xff]   ;;  %v10196_v61 = vcombine.high %v292_v59, %v292_v59  ;;  %v10201_v28 = vcombine.low %v292_v59, %v292_v59  ;;  %v8644_v59 = vld [vmem:[#allocation2 + $0x574] ss:$12 sps:$4 sm:$0xff]  }
 0x1de   :  { %7870 = vmatpush3.bf16.msra.mxu1 %v8520_v7  ;;  %v8594_v7 = vld [vmem:[#allocation2 + $0x7d0] ss:$12 sps:$4 sm:$0xff]  }
 0x1df   :  { %7871 = vmatprep.subr.bf16.mxu1 %v8524_v8  ;;  %v8598_v8 = vld [vmem:[#allocation2 + $0x8a8] ss:$12 sps:$4 sm:$0xff]  }
 0x1e0   :  { %2983 = vmatpush1.bf16.msra.mxu0 %v8496_v1  ;;  %v8568_v1 = vld [vmem:[#allocation2 + $0x420] ss:$12 sps:$4 sm:$0xff]  }
 0x1e1   :  { %2984 = vmatprep.subr.bf16.mxu0 %v8503_v2  ;;  %v8589_v2 = vld [vmem:[#allocation2 + $0x7b8] ss:$12 sps:$4 sm:$0xff]  }
 0x1e2   :  { %7872 = vmatpush3.bf16.msra.mxu1 %v8525_v11  ;;  %v8599_v11 = vld [vmem:[#allocation2 + $0x7e8] ss:$12 sps:$4 sm:$0xff]  }
 0x1e3   :  { %7873 = vmatprep.subr.bf16.mxu1 %v8529_v13  ;;  %v8603_v13 = vld [vmem:[#allocation2 + $0x8c0] ss:$12 sps:$4 sm:$0xff]  }
 0x1e4   :  { %2985 = vmatpush1.bf16.msra.mxu0 %v8501_v5  ;;  %v8573_v5 = vld [vmem:[#allocation2 + $0x438] ss:$12 sps:$4 sm:$0xff]  }
 0x1e5   :  { %2995 = vmatprep.subr.bf16.mxu0 %v8508_v6  ;;  %v8582_v6 = vld [vmem:[#allocation2 + $0x454] ss:$12 sps:$4 sm:$0xff]  }
 0x1e6   :  { %7874 = vmatpush3.bf16.msra.mxu1 %v8530_v15  ;;  %v8592_v15 = vld [vmem:[#allocation2 + $0x484] ss:$12 sps:$4 sm:$0xff]  }
 0x1e7   :  { %2987 = vmatmul.mubr.bf16.vlgmr.msra.gmra.mrb[0].mxu0 %v10161_v12  ;;  %7881 = vmatprep.subr.bf16.mxu1 %v8536_v17  ;;  %v8541_v12 = vld [vmem:[#allocation2 + $0x6e0] ss:$12 sps:$4 sm:$0xff]   ;;  %v8608_v17 = vld [vmem:[#allocation2 + $0x8d8] ss:$12 sps:$4 sm:$0xff]  }
 0x1e8   :  { %2996 = vmatpush1.bf16.msra.mxu0 %v8506_v9  ;;  %3027 = vmatprep.mubr.bf16.mxu0 %v10167_v34  ;;  %v8552_v34 = vld [vmem:[#allocation2 + $0x650] ss:$12 sps:$4 sm:$0xff]  }
 0x1e9   :  { %2997 = vmatprep.subr.bf16.mxu0 %v8513_v10  ;;  %3394 = vmatmul.mubr.bf16.vlgmr.msra.gmra.mrb[12].mxu1 %v10181_v19  ;;  %v8580_v9 = vld [vmem:[#allocation2 + $0x450] ss:$12 sps:$4 sm:$0xff]   ;;  %v8587_v10 = vld [vmem:[#allocation2 + $0x46c] ss:$12 sps:$4 sm:$0xff]  }
 0x1ea   :  { %7882 = vmatpush3.bf16.msra.mxu1 %v8537_v21  ;;  %3433 = vmatprep.mubr.bf16.mxu1 %v10187_v30  ;;  %v8609_v21 = vld [vmem:[#allocation2 + $0x818] ss:$12 sps:$4 sm:$0xff]  }
 0x1eb   :  { %7883 = vmatprep.subr.bf16.mxu1 %v8541_v12  ;;  %v8613_v12 = vld [vmem:[#allocation2 + $0x8f0] ss:$12 sps:$4 sm:$0xff]  }
 0x1ec   :  { %2998 = vmatpush1.bf16.msra.mxu0 %v8511_v14  ;;  %v8585_v14 = vld [vmem:[#allocation2 + $0x468] ss:$12 sps:$4 sm:$0xff]  }
 0x1ed   :  { %2999 = vmatprep.subr.bf16.mxu0 %v8518_v16  ;;  %v8604_v16 = vld [vmem:[#allocation2 + $0x800] ss:$12 sps:$4 sm:$0xff]  }
 0x1ee   :  { %7884 = vmatpush3.bf16.msra.mxu1 %v8542_v24  ;;  %v8602_v24 = vld [vmem:[#allocation2 + $0x4b4] ss:$12 sps:$4 sm:$0xff]  }
 0x1ef   :  { %7885 = vmatprep.subr.bf16.mxu1 %v8546_v25  ;;  %v8620_v25 = vld [vmem:[#allocation2 + $0x9c8] ss:$12 sps:$4 sm:$0xff]  }
 0x1f0   :  { %3000 = vmatpush1.bf16.msra.mxu0 %v8516_v18  ;;  %v8590_v18 = vld [vmem:[#allocation2 + $0x480] ss:$12 sps:$4 sm:$0xff]  }
 0x1f1   :  { %3001 = vmatprep.subr.bf16.mxu0 %v8523_v20  ;;  %v8597_v20 = vld [vmem:[#allocation2 + $0x49c] ss:$12 sps:$4 sm:$0xff]  }
 0x1f2   :  { %7886 = vmatpush3.bf16.msra.mxu1 %v8547_v29  ;;  %v10206_v29 = vld [vmem:[%s11466_s28 + $0x30] sm:$0xff] }
 0x1f3   :  { %7887 = vmatprep.subr.bf16.mxu1 %v8551_v31  ;;  %v8625_v31 = vld [vmem:[#allocation2 + $0x9e0] ss:$12 sps:$4 sm:$0xff]  }
 0x1f4   :  { %3002 = vmatpush1.bf16.msra.mxu0 %v8521_v22  ;;  %v8595_v22 = vld [vmem:[#allocation2 + $0x498] ss:$12 sps:$4 sm:$0xff]  }
 0x1f5   :  { %3003 = vmatprep.subr.bf16.mxu0 %v8528_v23  ;;  %v8614_v23 = vld [vmem:[#allocation2 + $0x830] ss:$12 sps:$4 sm:$0xff]  }
 0x1f6   :  { %7888 = vmatpush3.bf16.msra.mxu1 %v8552_v34  ;;  %v8626_v34 = vld [vmem:[#allocation2 + $0x920] ss:$12 sps:$4 sm:$0xff]  }
 0x1f7   :  { %7889 = vmatprep.subr.bf16.mxu1 %v8556_v35  ;;  %v8630_v35 = vld [vmem:[#allocation2 + $0x9f8] ss:$12 sps:$4 sm:$0xff]  }
 0x1f8   :  { %3004 = vmatpush1.bf16.msra.mxu0 %v8526_v26  ;;  %v8600_v26 = vld [vmem:[#allocation2 + $0x4b0] ss:$12 sps:$4 sm:$0xff]  }
 0x1f9   :  { %3005 = vmatprep.subr.bf16.mxu0 %v8533_v27  ;;  %v8607_v27 = vld [vmem:[#allocation2 + $0x4cc] ss:$12 sps:$4 sm:$0xff]  }
 0x1fa   :  { %7890 = vmatpush3.bf16.msra.mxu1 %v8557_v37  ;;  %v8617_v37 = vld [vmem:[#allocation2 + $0x4fc] ss:$12 sps:$4 sm:$0xff]  }
 0x1fb   :  { %7891 = vmatprep.subr.bf16.mxu1 %v8561_v39  ;;  %v8635_v39 = vld [vmem:[#allocation2 + $0xa10] ss:$12 sps:$4 sm:$0xff]  }
 0x1fc   :  { %3006 = vmatpush1.bf16.msra.mxu0 %v8531_v32  ;;  %v10210_v32 = vcombine.high %v10206_v29, %v10206_v29 }
 0x1fd   :  { %3007 = vmatprep.subr.bf16.mxu0 %v8540_v33  ;;  %v8605_v33 = vld [vmem:[#allocation2 + $0x4c8] ss:$12 sps:$4 sm:$0xff]  }
 0x1fe   :  { %7892 = vmatpush3.bf16.msra.mxu1 %v8562_v42  ;;  %v8636_v42 = vld [vmem:[#allocation2 + $0x950] ss:$12 sps:$4 sm:$0xff]  }
 0x1ff   :  { %7893 = vmatprep.subr.bf16.mxu1 %v8566_v43  ;;  %v8640_v43 = vld [vmem:[#allocation2 + $0xa28] ss:$12 sps:$4 sm:$0xff]  }
 0x200   :  { %3008 = vmatpush1.bf16.msra.mxu0 %v8538_v36  ;;  %v8610_v36 = vld [vmem:[#allocation2 + $0x4e0] ss:$12 sps:$4 sm:$0xff]  }
 0x201   :  { %3009 = vmatprep.subr.bf16.mxu0 %v8545_v38  ;;  %v8631_v38 = vld [vmem:[#allocation2 + $0x938] ss:$12 sps:$4 sm:$0xff]  }
 0x202   :  { %7894 = vmatpush3.bf16.msra.mxu1 %v8567_v46  ;;  %v8629_v46 = vld [vmem:[#allocation2 + $0x52c] ss:$12 sps:$4 sm:$0xff]  }
 0x203   :  { %7895 = vmatprep.subr.bf16.mxu1 %v8571_v47  ;;  %v8645_v47 = vld [vmem:[#allocation2 + $0xa40] ss:$12 sps:$4 sm:$0xff]  }
 0x204   :  { %3010 = vmatpush1.bf16.msra.mxu0 %v8543_v40  ;;  %v8615_v40 = vld [vmem:[#allocation2 + $0x4f8] ss:$12 sps:$4 sm:$0xff]  }
 0x205   :  { %3011 = vmatprep.subr.bf16.mxu0 %v8550_v41  ;;  %v8624_v41 = vld [vmem:[#allocation2 + $0x514] ss:$12 sps:$4 sm:$0xff]  }
 0x206   :  { %7896 = vmatpush3.bf16.msra.mxu1 %v8572_v51  ;;  %v8646_v51 = vld [vmem:[#allocation2 + $0x980] ss:$12 sps:$4 sm:$0xff]  }
 0x207   :  { %7903 = vmatprep.subr.bf16.mxu1 %v8578_v52  ;;  %v8650_v52 = vld [vmem:[#allocation2 + $0xa58] ss:$12 sps:$4 sm:$0xff]  }
 0x208   :  { %3012 = vmatpush1.bf16.msra.mxu0 %v8548_v44  ;;  %v8622_v44 = vld [vmem:[#allocation2 + $0x510] ss:$12 sps:$4 sm:$0xff]  }
 0x209   :  { %3013 = vmatprep.subr.bf16.mxu0 %v8555_v45  ;;  %3434 = vmatmul.mubr.bf16.vlgmr.msra.gmra.mrb[16].mxu1 %v10190_v55  ;;  %v8641_v45 = vld [vmem:[#allocation2 + $0x968] ss:$12 sps:$4 sm:$0xff]  }
 0x20a   :  { %7904 = vmatpush3.bf16.msra.mxu1 %v8579_v56  ;;  %3473 = vmatprep.mubr.bf16.mxu1 %v10196_v61  ;;  %v8651_v56 = vld [vmem:[#allocation2 + $0x998] ss:$12 sps:$4 sm:$0xff]  }
 0x20b   :  { %7905 = vmatprep.subr.bf16.mxu1 %v8583_v57  ;;  %v8655_v57 = vld [vmem:[#allocation2 + $0xa70] ss:$12 sps:$4 sm:$0xff]  }
 0x20c   :  { %3014 = vmatpush1.bf16.msra.mxu0 %v8553_v49  ;;  %v8627_v49 = vld [vmem:[#allocation2 + $0x528] ss:$12 sps:$4 sm:$0xff]  }
 0x20d   :  { %3015 = vmatprep.subr.bf16.mxu0 %v8560_v50  ;;  %v8634_v50 = vld [vmem:[#allocation2 + $0x544] ss:$12 sps:$4 sm:$0xff]  }
 0x20e   :  { %7906 = vmatpush3.bf16.msra.mxu1 %v8584_v62  ;;  %v8662_v62 = vld [vmem:[#allocation2 + $0xb48] ss:$12 sps:$4 sm:$0xff]  }
 0x20f   :  { %7907 = vmatprep.subr.bf16.mxu1 %v8588_v63  ;;  %v8642_v63 = vld [vmem:[#allocation2 + $0x570] ss:$12 sps:$4 sm:$0xff]  }
 0x210   :  { %3016 = vmatpush1.bf16.msra.mxu0 %v8558_v53  ;;  %v8632_v53 = vld [vmem:[#allocation2 + $0x540] ss:$12 sps:$4 sm:$0xff]  }
 0x211   :  { %3017 = vmatprep.subr.bf16.mxu0 %v8565_v54  ;;  %v8639_v54 = vld [vmem:[#allocation2 + $0x55c] ss:$12 sps:$4 sm:$0xff]  }
 0x212   :  { %7908 = vmatpush3.bf16.msra.mxu1 %v8589_v2  ;;  %v10221_v2 = vld [vmem:[%s11466_s28 + $0x38] sm:$0xff] }
 0x213   :  { %7909 = vmatprep.subr.bf16.mxu1 %v8593_v4  ;;  %v8663_v4 = vld [vmem:[#allocation2 + $0xa88] ss:$12 sps:$4 sm:$0xff]  }
 0x214   :  { %3018 = vmatpush1.bf16.msra.mxu0 %v8563_v58  ;;  %v8637_v58 = vld [vmem:[#allocation2 + $0x558] ss:$12 sps:$4 sm:$0xff]  }
 0x215   :  { %3019 = vmatprep.subr.bf16.mxu0 %v8570_v60  ;;  %v8656_v60 = vld [vmem:[#allocation2 + $0x9b0] ss:$12 sps:$4 sm:$0xff]  }
 0x216   :  { %7910 = vmatpush3.bf16.msra.mxu1 %v8594_v7  ;;  %v8647_v7 = vld [vmem:[#allocation2 + $0x588] ss:$12 sps:$4 sm:$0xff]  }
 0x217   :  { %7911 = vmatprep.subr.bf16.mxu1 %v8598_v8  ;;  %v8654_v8 = vld [vmem:[#allocation2 + $0x5a4] ss:$12 sps:$4 sm:$0xff]  }
 0x218   :  { %3020 = vmatpush1.bf16.msra.mxu0 %v8568_v1  ;;  %v10216_v1 = vcombine.low %v10206_v29, %v10206_v29  ;;  %v8674_v29 = vld [vmem:[#allocation2 + $0x600] ss:$12 sps:$4 sm:$0xff]  }
 0x219   :  { %3021 = vmatprep.subr.bf16.mxu0 %v8575_v3  ;;  %v8649_v3 = vld [vmem:[#allocation2 + $0x58c] ss:$12 sps:$4 sm:$0xff]  }
 0x21a   :  { %7912 = vmatpush3.bf16.msra.mxu1 %v8599_v11  ;;  %v8652_v11 = vld [vmem:[#allocation2 + $0x5a0] ss:$12 sps:$4 sm:$0xff]  }
 0x21b   :  { %7913 = vmatprep.subr.bf16.mxu1 %v8603_v13  ;;  %v8659_v13 = vld [vmem:[#allocation2 + $0x5bc] ss:$12 sps:$4 sm:$0xff]  }
 0x21c   :  { %3022 = vmatpush1.bf16.msra.mxu0 %v8573_v5  ;;  %v8667_v5 = vld [vmem:[#allocation2 + $0xb60] ss:$12 sps:$4 sm:$0xff]  }
 0x21d   :  { %3023 = vmatprep.subr.bf16.mxu0 %v8582_v6  ;;  %v10225_v6 = vcombine.high %v10221_v2, %v10221_v2 }
 0x21e   :  { %7914 = vmatpush3.bf16.msra.mxu1 %v8604_v16  ;;  %v8657_v16 = vld [vmem:[#allocation2 + $0x5b8] ss:$12 sps:$4 sm:$0xff]  }
 0x21f   :  { %7915 = vmatprep.subr.bf16.mxu1 %v8608_v17  ;;  %v8666_v17 = vld [vmem:[#allocation2 + $0x5d4] ss:$12 sps:$4 sm:$0xff]  }
 0x220   :  { %3024 = vmatpush1.bf16.msra.mxu0 %v8580_v9  ;;  %v8668_v9 = vld [vmem:[#allocation2 + $0xaa0] ss:$12 sps:$4 sm:$0xff]  }
 0x221   :  { %3025 = vmatprep.subr.bf16.mxu0 %v8587_v10  ;;  %v8672_v10 = vld [vmem:[#allocation2 + $0xb78] ss:$12 sps:$4 sm:$0xff]  }
 0x222   :  { %7916 = vmatpush3.bf16.msra.mxu1 %v8609_v21  ;;  %v8664_v21 = vld [vmem:[#allocation2 + $0x5d0] ss:$12 sps:$4 sm:$0xff]  }
 0x223   :  { %7917 = vmatprep.subr.bf16.mxu1 %v8613_v12  ;;  %v8671_v12 = vld [vmem:[#allocation2 + $0x5ec] ss:$12 sps:$4 sm:$0xff]  }
 0x224   :  { %3026 = vmatpush1.bf16.msra.mxu0 %v8585_v14  ;;  %v8673_v14 = vld [vmem:[#allocation2 + $0xab8] ss:$12 sps:$4 sm:$0xff]  }
 0x225   :  { %3036 = vmatprep.subr.bf16.mxu0 %v8592_v15  ;;  %v8677_v15 = vld [vmem:[#allocation2 + $0xb90] ss:$12 sps:$4 sm:$0xff]  }
 0x226   :  { %7918 = vmatpush3.bf16.msra.mxu1 %v8614_v23  ;;  %v8687_v23 = vld [vmem:[#allocation2 + $0xbc0] ss:$12 sps:$4 sm:$0xff]  }
 0x227   :  { %3028 = vmatmul.mubr.bf16.vlgmr.msra.gmra.mrb[0].mxu0 %v10170_v48  ;;  %v8621_v48 = vld [vmem:[#allocation2 + $0x908] ss:$12 sps:$4 sm:$0xff]   ;;  %7925 = vmatprep.subr.bf16.mxu1 %v8620_v25  ;;  %v8676_v25 = vld [vmem:[#allocation2 + $0x604] ss:$12 sps:$4 sm:$0xff]  }
 0x228   :  { %3037 = vmatpush1.bf16.msra.mxu0 %v8590_v18  ;;  %3068 = vmatprep.mubr.bf16.mxu0 %v10176_v0  ;;  %v8612_v0 = vld [vmem:[#allocation2 + $0x4e4] ss:$12 sps:$4 sm:$0xff]  }
 0x229   :  { %3038 = vmatprep.subr.bf16.mxu0 %v8597_v20  ;;  %3474 = vmatmul.mubr.bf16.vlgmr.msra.gmra.mrb[20].mxu1 %v10201_v28  ;;  %v8678_v18 = vld [vmem:[#allocation2 + $0xad0] ss:$12 sps:$4 sm:$0xff]   ;;  %v8682_v20 = vld [vmem:[#allocation2 + $0xba8] ss:$12 sps:$4 sm:$0xff]  }
 0x22a   :  { %7926 = vmatpush3.bf16.msra.mxu1 %v8621_v48  ;;  %3513 = vmatprep.mubr.bf16.mxu1 %v10210_v32  ;;  %v8681_v48 = vld [vmem:[#allocation2 + $0x61c] ss:$12 sps:$4 sm:$0xff]  }
 0x22b   :  { %7927 = vmatprep.subr.bf16.mxu1 %v8625_v31  ;;  %v8693_v31 = vld [vmem:[#allocation2 + $0xb18] ss:$12 sps:$4 sm:$0xff]  }
 0x22c   :  { %3039 = vmatpush1.bf16.msra.mxu0 %v8595_v22  ;;  %v8683_v22 = vld [vmem:[#allocation2 + $0xae8] ss:$12 sps:$4 sm:$0xff]  }
 0x22d   :  { %3040 = vmatprep.subr.bf16.mxu0 %v8602_v24  ;;  %v8669_v24 = vld [vmem:[#allocation2 + $0x5e8] ss:$12 sps:$4 sm:$0xff]  }
 0x22e   :  { %7928 = vmatpush3.bf16.msra.mxu1 %v8626_v34  ;;  %v8698_v34 = vld [vmem:[#allocation2 + $0xb30] ss:$12 sps:$4 sm:$0xff]  }
 0x22f   :  { %7929 = vmatprep.subr.bf16.mxu1 %v8630_v35  ;;  %v8686_v35 = vld [vmem:[#allocation2 + $0x634] ss:$12 sps:$4 sm:$0xff]  }
 0x230   :  { %3041 = vmatpush1.bf16.msra.mxu0 %v8600_v26  ;;  %v8688_v26 = vld [vmem:[#allocation2 + $0xb00] ss:$12 sps:$4 sm:$0xff]  }
 0x231   :  { %3042 = vmatprep.subr.bf16.mxu0 %v8607_v27  ;;  %v8692_v27 = vld [vmem:[#allocation2 + $0xbd8] ss:$12 sps:$4 sm:$0xff]  }
 0x232   :  { %7930 = vmatpush3.bf16.msra.mxu1 %v8631_v38  ;;  %v8691_v38 = vld [vmem:[#allocation2 + $0x64c] ss:$12 sps:$4 sm:$0xff]  }
 0x233   :  { %7931 = vmatprep.subr.bf16.mxu1 %v8635_v39  ;;  %v8696_v39 = vld [vmem:[#allocation2 + $0x664] ss:$12 sps:$4 sm:$0xff]  }
 0x234   :  { %3043 = vmatpush1.bf16.msra.mxu0 %v8605_v33  ;;  %v8697_v33 = vld [vmem:[#allocation2 + $0xbf0] ss:$12 sps:$4 sm:$0xff]  }
 0x235   :  { %3044 = vmatprep.subr.bf16.mxu0 %v8612_v0  ;;  %v8679_v0 = vld [vmem:[#allocation2 + $0x618] ss:$12 sps:$4 sm:$0xff]  }
 0x236   :  { %7932 = vmatpush3.bf16.msra.mxu1 %v8636_v42  ;;  %v8706_v42 = vld [vmem:[#allocation2 + $0x694] ss:$12 sps:$4 sm:$0xff]  }
 0x237   :  { %7933 = vmatprep.subr.bf16.mxu1 %v8640_v43  ;;  %v8704_v43 = vld [vmem:[#allocation2 + $0x690] ss:$12 sps:$4 sm:$0xff]  }
 0x238   :  { %3045 = vmatpush1.bf16.msra.mxu0 %v8610_v36  ;;  %v10233_v36 = vcombine.low %v10221_v2, %v10221_v2  ;;  %v8731_v2 = vld [vmem:[#allocation2 + $0x768] ss:$12 sps:$4 sm:$0xff]  }
 0x239   :  { %3046 = vmatprep.subr.bf16.mxu0 %v8617_v37  ;;  %v8684_v37 = vld [vmem:[#allocation2 + $0x630] ss:$12 sps:$4 sm:$0xff]  }
 0x23a   :  { %7934 = vmatpush3.bf16.msra.mxu1 %v8641_v45  ;;  %v8707_v45 = vld [vmem:[#allocation2 + $0x6a8] ss:$12 sps:$4 sm:$0xff]  }
 0x23b   :  { %7935 = vmatprep.subr.bf16.mxu1 %v8645_v47  ;;  %v8710_v47 = vld [vmem:[#allocation2 + $0x6c0] ss:$12 sps:$4 sm:$0xff]  }
 0x23c   :  { %3047 = vmatpush1.bf16.msra.mxu0 %v8615_v40  ;;  %v8694_v40 = vld [vmem:[#allocation2 + $0x660] ss:$12 sps:$4 sm:$0xff]  }
 0x23d   :  { %3048 = vmatprep.subr.bf16.mxu0 %v8624_v41  ;;  %v8701_v41 = vld [vmem:[#allocation2 + $0x67c] ss:$12 sps:$4 sm:$0xff]  }
 0x23e   :  { %7936 = vmatpush3.bf16.msra.mxu1 %v8646_v51  ;;  %v8718_v51 = vld [vmem:[#allocation2 + $0x6f4] ss:$12 sps:$4 sm:$0xff]  }
 0x23f   :  { %7937 = vmatprep.subr.bf16.mxu1 %v8650_v52  ;;  %v8716_v52 = vld [vmem:[#allocation2 + $0x6f0] ss:$12 sps:$4 sm:$0xff]  }
 0x240   :  { %3049 = vmatpush1.bf16.msra.mxu0 %v8622_v44  ;;  %v8709_v44 = vld [vmem:[#allocation2 + $0x6ac] ss:$12 sps:$4 sm:$0xff]  }
 0x241   :  { %3050 = vmatprep.subr.bf16.mxu0 %v8629_v46  ;;  %v8712_v46 = vld [vmem:[#allocation2 + $0x6c4] ss:$12 sps:$4 sm:$0xff]  }
 0x242   :  { %7938 = vmatpush3.bf16.msra.mxu1 %v8651_v56  ;;  %v8724_v56 = vld [vmem:[#allocation2 + $0x724] ss:$12 sps:$4 sm:$0xff]  }
 0x243   :  { %7939 = vmatprep.subr.bf16.mxu1 %v8655_v57  ;;  %v8722_v57 = vld [vmem:[#allocation2 + $0x720] ss:$12 sps:$4 sm:$0xff]  }
 0x244   :  { %3051 = vmatpush1.bf16.msra.mxu0 %v8627_v49  ;;  %v8715_v49 = vld [vmem:[#allocation2 + $0x6dc] ss:$12 sps:$4 sm:$0xff]  }
 0x245   :  { %3052 = vmatprep.subr.bf16.mxu0 %v8634_v50  ;;  %v8713_v50 = vld [vmem:[#allocation2 + $0x6d8] ss:$12 sps:$4 sm:$0xff]  }
 0x246   :  { %7940 = vmatpush3.bf16.msra.mxu1 %v8656_v60  ;;  %v8730_v60 = vld [vmem:[#allocation2 + $0x754] ss:$12 sps:$4 sm:$0xff]  }
 0x247   :  { %7947 = vmatprep.subr.bf16.mxu1 %v8662_v62  ;;  %v8728_v62 = vld [vmem:[#allocation2 + $0x750] ss:$12 sps:$4 sm:$0xff]  }
 0x248   :  { %3053 = vmatpush1.bf16.msra.mxu0 %v8632_v53  ;;  %v8721_v53 = vld [vmem:[#allocation2 + $0x70c] ss:$12 sps:$4 sm:$0xff]  }
 0x249   :  { %3054 = vmatprep.subr.bf16.mxu0 %v8639_v54  ;;  %3514 = vmatmul.mubr.bf16.vlgmr.msra.gmra.mrb[24].mxu1 %v10216_v1  ;;  %v8719_v54 = vld [vmem:[#allocation2 + $0x708] ss:$12 sps:$4 sm:$0xff]  }
 0x24a   :  { %7948 = vmatpush3.bf16.msra.mxu1 %v8663_v4  ;;  %3553 = vmatprep.mubr.bf16.mxu1 %v10225_v6  ;;  %v8734_v4 = vld [vmem:[#allocation2 + $0x780] ss:$12 sps:$4 sm:$0xff]  }
 0x24b   :  { %7949 = vmatprep.subr.bf16.mxu1 %v8667_v5  ;;  %v8739_v5 = vld [vmem:[#allocation2 + $0x79c] ss:$12 sps:$4 sm:$0xff]  }
 0x24c   :  { %3055 = vmatpush1.bf16.msra.mxu0 %v8637_v58  ;;  %v8727_v58 = vld [vmem:[#allocation2 + $0x73c] ss:$12 sps:$4 sm:$0xff]  }
 0x24d   :  { %3056 = vmatprep.subr.bf16.mxu0 %v8644_v59  ;;  %v8725_v59 = vld [vmem:[#allocation2 + $0x738] ss:$12 sps:$4 sm:$0xff]  }
 0x24e   :  { %7950 = vmatpush3.bf16.msra.mxu1 %v8668_v9  ;;  %v8740_v9 = vld [vmem:[#allocation2 + $0x7b0] ss:$12 sps:$4 sm:$0xff]  }
 0x24f   :  { %7951 = vmatprep.subr.bf16.mxu1 %v8672_v10  ;;  %v8745_v10 = vld [vmem:[#allocation2 + $0x7cc] ss:$12 sps:$4 sm:$0xff]  }
 0x250   :  { %3057 = vmatpush1.bf16.msra.mxu0 %v8642_v63  ;;  %v8733_v63 = vld [vmem:[#allocation2 + $0x76c] ss:$12 sps:$4 sm:$0xff]  }
 0x251   :  { %3058 = vmatprep.subr.bf16.mxu0 %v8649_v3  ;;  %v8736_v3 = vld [vmem:[#allocation2 + $0x784] ss:$12 sps:$4 sm:$0xff]  }
 0x252   :  { %7952 = vmatpush3.bf16.msra.mxu1 %v8673_v14  ;;  %v8746_v14 = vld [vmem:[#allocation2 + $0x7e0] ss:$12 sps:$4 sm:$0xff]  }
 0x253   :  { %7953 = vmatprep.subr.bf16.mxu1 %v8677_v15  ;;  %v8751_v15 = vld [vmem:[#allocation2 + $0x7fc] ss:$12 sps:$4 sm:$0xff]  }
 0x254   :  { %3059 = vmatpush1.bf16.msra.mxu0 %v8647_v7  ;;  %v8737_v7 = vld [vmem:[#allocation2 + $0x798] ss:$12 sps:$4 sm:$0xff]  }
 0x255   :  { %3060 = vmatprep.subr.bf16.mxu0 %v8654_v8  ;;  %v8742_v8 = vld [vmem:[#allocation2 + $0x7b4] ss:$12 sps:$4 sm:$0xff]  }
 0x256   :  { %7954 = vmatpush3.bf16.msra.mxu1 %v8678_v18 }
 0x257   :  { %7955 = vmatprep.subr.bf16.mxu1 %v8682_v20 }
 0x258   :  { %3061 = vmatpush1.bf16.msra.mxu0 %v8652_v11  ;;  %v8743_v11 = vld [vmem:[#allocation2 + $0x7c8] ss:$12 sps:$4 sm:$0xff]  }
 0x259   :  { %3062 = vmatprep.subr.bf16.mxu0 %v8659_v13  ;;  %v8748_v13 = vld [vmem:[#allocation2 + $0x7e4] ss:$12 sps:$4 sm:$0xff]  }
 0x25a   :  { %7956 = vmatpush3.bf16.msra.mxu1 %v8683_v22 }
 0x25b   :  { %7957 = vmatprep.subr.bf16.mxu1 %v8687_v23 }
 0x25c   :  { %3063 = vmatpush1.bf16.msra.mxu0 %v8657_v16  ;;  %v7809_v16 = vpop.f32.mrb[0].mxu1 }
 0x25d   :  { %3064 = vmatprep.subr.bf16.mxu0 %v8666_v17 }
 0x25e   :  { %7958 = vmatpush3.bf16.msra.mxu1 %v8688_v26  ;;  %v8752_v26 = vld [vmem:[#allocation2 + $0x810] ss:$12 sps:$4 sm:$0xff]  }
 0x25f   :  { %7959 = vmatprep.subr.bf16.mxu1 %v8692_v27  ;;  %v8757_v27 = vld [vmem:[#allocation2 + $0x82c] ss:$12 sps:$4 sm:$0xff]  }
 0x260   :  { %3065 = vmatpush1.bf16.msra.mxu0 %v8664_v21  ;;  %v8754_v21 = vld [vmem:[#allocation2 + $0x814] ss:$12 sps:$4 sm:$0xff]  }
 0x261   :  { %3066 = vmatprep.subr.bf16.mxu0 %v8671_v12 }
 0x262   :  { %7960 = vmatpush3.bf16.msra.mxu1 %v8693_v31 }
 0x263   :  { %7961 = vmatprep.subr.bf16.mxu1 %v8697_v33 }
 0x264   :  { %3067 = vmatpush1.bf16.msra.mxu0 %v8669_v24 }
 0x265   :  { %3077 = vmatprep.subr.bf16.mxu0 %v8676_v25 }
 0x266   :  { %7962 = vmatpush3.bf16.msra.mxu1 %v8698_v34 }
 0x267   :  { %3069 = vmatmul.mubr.bf16.vlgmr.msra.gmra.mrb[0].mxu0 %v10181_v19  ;;  %v8689_v19 = vld [vmem:[#allocation2 + $0x648] ss:$12 sps:$4 sm:$0xff]  }
 0x268   :  { %3078 = vmatpush1.bf16.msra.mxu0 %v8674_v29  ;;  %3109 = vmatprep.mubr.bf16.mxu0 %v10187_v30  ;;  %v8699_v30 = vld [vmem:[#allocation2 + $0x678] ss:$12 sps:$4 sm:$0xff]  }
 0x269   :  { %3079 = vmatprep.subr.bf16.mxu0 %v8681_v48  ;;  %3554 = vmatmul.mubr.bf16.vlgmr.msra.gmra.mrb[28].mxu1 %v10233_v36 }
 0x26c   :  { %3080 = vmatpush1.bf16.msra.mxu0 %v8679_v0 }
 0x26d   :  { %3081 = vmatprep.subr.bf16.mxu0 %v8686_v35  ;;  %v8755_v35 = vld [vmem:[#allocation2 + $0x828] ss:$12 sps:$4 sm:$0xff]  }
 0x270   :  { %3082 = vmatpush1.bf16.msra.mxu0 %v8684_v37  ;;  %v8760_v37 = vld [vmem:[#allocation2 + $0x844] ss:$12 sps:$4 sm:$0xff]  }
 0x271   :  { %3083 = vmatprep.subr.bf16.mxu0 %v8691_v38 }
 0x274   :  { %3084 = vmatpush1.bf16.msra.mxu0 %v8689_v19 }
 0x275   :  { %3085 = vmatprep.subr.bf16.mxu0 %v8696_v39 }
 0x278   :  { %3086 = vmatpush1.bf16.msra.mxu0 %v8694_v40  ;;  %v8758_v40 = vld [vmem:[#allocation2 + $0x840] ss:$12 sps:$4 sm:$0xff]  }
 0x279   :  { %3087 = vmatprep.subr.bf16.mxu0 %v8701_v41  ;;  %v8763_v41 = vld [vmem:[#allocation2 + $0x85c] ss:$12 sps:$4 sm:$0xff]  }
 0x27c   :  { %3088 = vmatpush1.bf16.msra.mxu0 %v8699_v30 }
 0x27d   :  { %3089 = vmatprep.subr.bf16.mxu0 %v8706_v42 }
 0x280   :  { %3090 = vmatpush1.bf16.msra.mxu0 %v8704_v43 }
 0x281   :  { %3091 = vmatprep.subr.bf16.mxu0 %v8709_v44 }
 0x284   :  { %3092 = vmatpush1.bf16.msra.mxu0 %v8707_v45  ;;  %v8761_v45 = vld [vmem:[#allocation2 + $0x858] ss:$12 sps:$4 sm:$0xff]  }
 0x285   :  { %3093 = vmatprep.subr.bf16.mxu0 %v8712_v46  ;;  %v8766_v46 = vld [vmem:[#allocation2 + $0x874] ss:$12 sps:$4 sm:$0xff]  }
 0x288   :  { %3094 = vmatpush1.bf16.msra.mxu0 %v8710_v47  ;;  %v8764_v47 = vld [vmem:[#allocation2 + $0x870] ss:$12 sps:$4 sm:$0xff]  }
 0x289   :  { %3095 = vmatprep.subr.bf16.mxu0 %v8715_v49  ;;  %v8769_v49 = vld [vmem:[#allocation2 + $0x88c] ss:$12 sps:$4 sm:$0xff]  }
 0x28c   :  { %3096 = vmatpush1.bf16.msra.mxu0 %v8713_v50  ;;  %v8767_v50 = vld [vmem:[#allocation2 + $0x888] ss:$12 sps:$4 sm:$0xff]  }
 0x28d   :  { %3097 = vmatprep.subr.bf16.mxu0 %v8718_v51  ;;  %v8772_v51 = vld [vmem:[#allocation2 + $0x8a4] ss:$12 sps:$4 sm:$0xff]  }
 0x290   :  { %3098 = vmatpush1.bf16.msra.mxu0 %v8716_v52  ;;  %v8770_v52 = vld [vmem:[#allocation2 + $0x8a0] ss:$12 sps:$4 sm:$0xff]  }
 0x291   :  { %3099 = vmatprep.subr.bf16.mxu0 %v8721_v53  ;;  %v8775_v53 = vld [vmem:[#allocation2 + $0x8bc] ss:$12 sps:$4 sm:$0xff]  }
 0x294   :  { %3100 = vmatpush1.bf16.msra.mxu0 %v8719_v54  ;;  %v8773_v54 = vld [vmem:[#allocation2 + $0x8b8] ss:$12 sps:$4 sm:$0xff]  }
 0x295   :  { %3101 = vmatprep.subr.bf16.mxu0 %v8724_v56  ;;  %v8778_v56 = vld [vmem:[#allocation2 + $0x8d4] ss:$12 sps:$4 sm:$0xff]  }
 0x298   :  { %3102 = vmatpush1.bf16.msra.mxu0 %v8722_v57  ;;  %v8776_v57 = vld [vmem:[#allocation2 + $0x8d0] ss:$12 sps:$4 sm:$0xff]  }
 0x299   :  { %3103 = vmatprep.subr.bf16.mxu0 %v8727_v58  ;;  %v8781_v58 = vld [vmem:[#allocation2 + $0x8ec] ss:$12 sps:$4 sm:$0xff]  }
 0x29c   :  { %3104 = vmatpush1.bf16.msra.mxu0 %v8725_v59  ;;  %v8779_v59 = vld [vmem:[#allocation2 + $0x8e8] ss:$12 sps:$4 sm:$0xff]  }
 0x29d   :  { %3105 = vmatprep.subr.bf16.mxu0 %v8730_v60  ;;  %v8784_v60 = vld [vmem:[#allocation2 + $0x904] ss:$12 sps:$4 sm:$0xff]  }
 0x2a0   :  { %3106 = vmatpush1.bf16.msra.mxu0 %v8728_v62 }
 0x2a1   :  { %3107 = vmatprep.subr.bf16.mxu0 %v8733_v63 }
 0x2a4   :  { %3108 = vmatpush1.bf16.msra.mxu0 %v8731_v2  ;;  %v8782_v2 = vld [vmem:[#allocation2 + $0x900] ss:$12 sps:$4 sm:$0xff]  }
 0x2a5   :  { %3118 = vmatprep.subr.bf16.mxu0 %v8736_v3 }
 0x2a7   :  { %3110 = vmatmul.mubr.bf16.vlgmr.msra.gmra.mrb[0].mxu0 %v10190_v55  ;;  %v7810_v55 = vpop.f32.mrb[1].mxu1 }
 0x2a8   :  { %3119 = vmatpush1.bf16.msra.mxu0 %v8734_v4  ;;  %3150 = vmatprep.mubr.bf16.mxu0 %v10196_v61  ;;  %v7811_v17 = vadd.f32 %v7810_v55, %v7809_v16  ;;  %v7812_v18 = vpop.f32.mrb[2].mxu1  ;;  %v8749_v61 = vld [vmem:[#allocation2 + $0x7f8] ss:$12 sps:$4 sm:$0xff]   ;;  %v8794_v16 = vld [vmem:[#allocation2 + $0x960] ss:$12 sps:$4 sm:$0xff]  }
 0x2a9   :  { %3120 = vmatprep.subr.bf16.mxu0 %v8739_v5  ;;  %v7813_v20 = vpop.f32.mrb[3].mxu1  ;;  %v8787_v5 = vld [vmem:[#allocation2 + $0x91c] ss:$12 sps:$4 sm:$0xff]   ;;  %v8805_v18 = vld [vmem:[#allocation2 + $0x9ac] ss:$12 sps:$4 sm:$0xff]  }
 0x2aa   :  { %v7831_v12 = vpop.f32.mrb[4].mxu1  ;;  %v8799_v55 = vld [vmem:[#allocation2 + $0x97c] ss:$12 sps:$4 sm:$0xff]  }
 0x2ab   :  { %v7832_v22 = vpop.f32.mrb[5].mxu1  ;;  %v8803_v20 = vld [vmem:[#allocation2 + $0x9a8] ss:$12 sps:$4 sm:$0xff]  }
 0x2ac   :  { %3121 = vmatpush1.bf16.msra.mxu0 %v8737_v7  ;;  %v7833_v23 = vadd.f32 %v7832_v22, %v7831_v12  ;;  %v7834_v24 = vpop.f32.mrb[6].mxu1  ;;  %v8806_v22 = vld [vmem:[#allocation2 + $0x9c0] ss:$12 sps:$4 sm:$0xff]  }
 0x2ad   :  { %3122 = vmatprep.subr.bf16.mxu0 %v8742_v8  ;;  %v7835_v25 = vpop.f32.mrb[7].mxu1 }
 0x2ae   :  { %v3316_v29 = vadd.f32 %v7833_v23, %v7811_v17  ;;  %v7853_v48 = vpop.f32.mrb[8].mxu1  ;;  %v8802_v17 = vld [vmem:[#allocation2 + $0x994] ss:$12 sps:$4 sm:$0xff]   ;;  %v8811_v25 = vld [vmem:[#allocation2 + $0x9dc] ss:$12 sps:$4 sm:$0xff]  }
 0x2af   :  { %v7854_v31 = vpop.f32.mrb[9].mxu1 }
 0x2b0   :  { %3123 = vmatpush1.bf16.msra.mxu0 %v8740_v9  ;;  %v7855_v33 = vadd.f32 %v7854_v31, %v7853_v48  ;;  %v7856_v0 = vpop.f32.mrb[10].mxu1  ;;  %v8785_v9 = vld [vmem:[#allocation2 + $0x918] ss:$12 sps:$4 sm:$0xff]   ;;  %v8814_v48 = vld [vmem:[#allocation2 + $0x9f4] ss:$12 sps:$4 sm:$0xff]  }
 0x2b1   :  { %3124 = vmatprep.subr.bf16.mxu0 %v8745_v10  ;;  %v7857_v34 = vpop.f32.mrb[11].mxu1  ;;  %v8790_v10 = vld [vmem:[#allocation2 + $0x934] ss:$12 sps:$4 sm:$0xff]   ;;  %v8812_v31 = vld [vmem:[#allocation2 + $0x9f0] ss:$12 sps:$4 sm:$0xff]  }
 0x2b2   :  { %v3356_v38 = vadd.f32 %v7855_v33, %v3316_v29  ;;  %v8809_v29 = vld [vmem:[#allocation2 + $0x9d8] ss:$12 sps:$4 sm:$0xff]   ;;  %v8815_v0 = vld [vmem:[#allocation2 + $0xa08] ss:$12 sps:$4 sm:$0xff]  }
 0x2b3   :  { %v8817_v33 = vld [vmem:[#allocation2 + $0xa0c] ss:$12 sps:$4 sm:$0xff]   ;;  %v8820_v34 = vld [vmem:[#allocation2 + $0xa24] ss:$12 sps:$4 sm:$0xff]  }
 0x2b4   :  { %3125 = vmatpush1.bf16.msra.mxu0 %v8743_v11  ;;  %v8788_v11 = vld [vmem:[#allocation2 + $0x930] ss:$12 sps:$4 sm:$0xff]  }
 0x2b5   :  { %3126 = vmatprep.subr.bf16.mxu0 %v8748_v13  ;;  %v8793_v13 = vld [vmem:[#allocation2 + $0x94c] ss:$12 sps:$4 sm:$0xff]  }
 0x2b8   :  { %3127 = vmatpush1.bf16.msra.mxu0 %v8746_v14  ;;  %v8791_v14 = vld [vmem:[#allocation2 + $0x948] ss:$12 sps:$4 sm:$0xff]  }
 0x2b9   :  { %3128 = vmatprep.subr.bf16.mxu0 %v8751_v15  ;;  %v8796_v15 = vld [vmem:[#allocation2 + $0x964] ss:$12 sps:$4 sm:$0xff]  }
 0x2bc   :  { %3129 = vmatpush1.bf16.msra.mxu0 %v8749_v61  ;;  %v7875_v19 = vpop.f32.mrb[12].mxu1  ;;  %v8808_v61 = vld [vmem:[#allocation2 + $0x9c4] ss:$12 sps:$4 sm:$0xff]  }
 0x2bd   :  { %3130 = vmatprep.subr.bf16.mxu0 %v8754_v21  ;;  %v7876_v39 = vpop.f32.mrb[13].mxu1 }
 0x2be   :  { %v7877_v30 = vadd.f32 %v7876_v39, %v7875_v19  ;;  %v7878_v42 = vpop.f32.mrb[14].mxu1  ;;  %v8826_v19 = vld [vmem:[#allocation2 + $0xa54] ss:$12 sps:$4 sm:$0xff]   ;;  %v8824_v39 = vld [vmem:[#allocation2 + $0xa50] ss:$12 sps:$4 sm:$0xff]  }
 0x2bf   :  { %v7879_v43 = vpop.f32.mrb[15].mxu1 }
 0x2c0   :  { %3131 = vmatpush1.bf16.msra.mxu0 %v8752_v26  ;;  %v3396_v44 = vadd.f32 %v7877_v30, %v3356_v38  ;;  %v8821_v38 = vld [vmem:[#allocation2 + $0xa38] ss:$12 sps:$4 sm:$0xff]  }
 0x2c1   :  { %3132 = vmatprep.subr.bf16.mxu0 %v8757_v27  ;;  %v8832_v30 = vld [vmem:[#allocation2 + $0xa84] ss:$12 sps:$4 sm:$0xff]  }
 0x2c4   :  { %3133 = vmatpush1.bf16.msra.mxu0 %v8755_v35  ;;  %v8818_v35 = vld [vmem:[#allocation2 + $0xa20] ss:$12 sps:$4 sm:$0xff]  }
 0x2c5   :  { %3134 = vmatprep.subr.bf16.mxu0 %v8760_v37  ;;  %v8823_v37 = vld [vmem:[#allocation2 + $0xa3c] ss:$12 sps:$4 sm:$0xff]  }
 0x2c8   :  { %3135 = vmatpush1.bf16.msra.mxu0 %v8758_v40  ;;  %v8829_v40 = vld [vmem:[#allocation2 + $0xa6c] ss:$12 sps:$4 sm:$0xff]  }
 0x2c9   :  { %3136 = vmatprep.subr.bf16.mxu0 %v8763_v41  ;;  %v8827_v41 = vld [vmem:[#allocation2 + $0xa68] ss:$12 sps:$4 sm:$0xff]  }
 0x2cc   :  { %3137 = vmatpush1.bf16.msra.mxu0 %v8761_v45 }
 0x2cd   :  { %3138 = vmatprep.subr.bf16.mxu0 %v8766_v46 }
 0x2d0   :  { %3139 = vmatpush1.bf16.msra.mxu0 %v8764_v47  ;;  %v8835_v47 = vld [vmem:[#allocation2 + $0xa9c] ss:$12 sps:$4 sm:$0xff]  }
 0x2d1   :  { %3140 = vmatprep.subr.bf16.mxu0 %v8769_v49 }
 0x2d4   :  { %3141 = vmatpush1.bf16.msra.mxu0 %v8767_v50 }
 0x2d5   :  { %3142 = vmatprep.subr.bf16.mxu0 %v8772_v51  ;;  %v8833_v51 = vld [vmem:[#allocation2 + $0xa98] ss:$12 sps:$4 sm:$0xff]  }
 0x2d8   :  { %3143 = vmatpush1.bf16.msra.mxu0 %v8770_v52  ;;  %v8838_v52 = vld [vmem:[#allocation2 + $0xab4] ss:$12 sps:$4 sm:$0xff]  }
 0x2d9   :  { %3144 = vmatprep.subr.bf16.mxu0 %v8775_v53  ;;  %v8836_v53 = vld [vmem:[#allocation2 + $0xab0] ss:$12 sps:$4 sm:$0xff]  }
 0x2dc   :  { %3145 = vmatpush1.bf16.msra.mxu0 %v8773_v54  ;;  %v7897_v62 = vpop.f32.mrb[16].mxu1  ;;  %v8841_v54 = vld [vmem:[#allocation2 + $0xacc] ss:$12 sps:$4 sm:$0xff]  }
 0x2dd   :  { %3146 = vmatprep.subr.bf16.mxu0 %v8778_v56  ;;  %v7898_v63 = vpop.f32.mrb[17].mxu1  ;;  %v8839_v56 = vld [vmem:[#allocation2 + $0xac8] ss:$12 sps:$4 sm:$0xff]  }
 0x2de   :  { %v7899_v3 = vadd.f32 %v7898_v63, %v7897_v62  ;;  %v7900_v4 = vpop.f32.mrb[18].mxu1  ;;  %v8853_v62 = vld [vmem:[#allocation2 + $0xb2c] ss:$12 sps:$4 sm:$0xff]   ;;  %v8851_v63 = vld [vmem:[#allocation2 + $0xb28] ss:$12 sps:$4 sm:$0xff]  }
 0x2df   :  { %v7901_v7 = vpop.f32.mrb[19].mxu1 }
 0x2e0   :  { %3147 = vmatpush1.bf16.msra.mxu0 %v8776_v57  ;;  %v3436_v8 = vadd.f32 %v7899_v3, %v3396_v44  ;;  %v8830_v44 = vld [vmem:[#allocation2 + $0xa80] ss:$12 sps:$4 sm:$0xff]   ;;  %v8844_v57 = vld [vmem:[#allocation2 + $0xae4] ss:$12 sps:$4 sm:$0xff]  }
 0x2e1   :  { %3148 = vmatprep.subr.bf16.mxu0 %v8781_v58  ;;  %v8842_v58 = vld [vmem:[#allocation2 + $0xae0] ss:$12 sps:$4 sm:$0xff]  }
 0x2e4   :  { %3149 = vmatpush1.bf16.msra.mxu0 %v8779_v59  ;;  %v8847_v59 = vld [vmem:[#allocation2 + $0xafc] ss:$12 sps:$4 sm:$0xff]  }
 0x2e5   :  { %3159 = vmatprep.subr.bf16.mxu0 %v8784_v60  ;;  %v8850_v60 = vld [vmem:[#allocation2 + $0xb14] ss:$12 sps:$4 sm:$0xff]  }
 0x2e7   :  { %3151 = vmatmul.mubr.bf16.vlgmr.msra.gmra.mrb[0].mxu0 %v10201_v28  ;;  %v8797_v28 = vld [vmem:[#allocation2 + $0x978] ss:$12 sps:$4 sm:$0xff]  }
 0x2e8   :  { %3160 = vmatpush1.bf16.msra.mxu0 %v8782_v2  ;;  %3191 = vmatprep.mubr.bf16.mxu0 %v10210_v32  ;;  %v8800_v32 = vld [vmem:[#allocation2 + $0x990] ss:$12 sps:$4 sm:$0xff]  }
 0x2e9   :  { %3161 = vmatprep.subr.bf16.mxu0 %v8787_v5  ;;  %v8856_v2 = vld [vmem:[#allocation2 + $0xb44] ss:$12 sps:$4 sm:$0xff]   ;;  %v8854_v5 = vld [vmem:[#allocation2 + $0xb40] ss:$12 sps:$4 sm:$0xff]  }
 0x2ec   :  { %3162 = vmatpush1.bf16.msra.mxu0 %v8785_v9  ;;  %v8859_v9 = vld [vmem:[#allocation2 + $0xb5c] ss:$12 sps:$4 sm:$0xff]  }
 0x2ed   :  { %3163 = vmatprep.subr.bf16.mxu0 %v8790_v10 }
 0x2f0   :  { %3164 = vmatpush1.bf16.msra.mxu0 %v8788_v11 }
 0x2f1   :  { %3165 = vmatprep.subr.bf16.mxu0 %v8793_v13  ;;  %v8857_v13 = vld [vmem:[#allocation2 + $0xb58] ss:$12 sps:$4 sm:$0xff]  }
 0x2f4   :  { %3166 = vmatpush1.bf16.msra.mxu0 %v8791_v14  ;;  %v8862_v14 = vld [vmem:[#allocation2 + $0xb74] ss:$12 sps:$4 sm:$0xff]  }
 0x2f5   :  { %3167 = vmatprep.subr.bf16.mxu0 %v8796_v15  ;;  %v8860_v15 = vld [vmem:[#allocation2 + $0xb70] ss:$12 sps:$4 sm:$0xff]  }
 0x2f8   :  { %3168 = vmatpush1.bf16.msra.mxu0 %v8794_v16  ;;  %v8865_v16 = vld [vmem:[#allocation2 + $0xb8c] ss:$12 sps:$4 sm:$0xff]  }
 0x2f9   :  { %3169 = vmatprep.subr.bf16.mxu0 %v8799_v55  ;;  %v8863_v55 = vld [vmem:[#allocation2 + $0xb88] ss:$12 sps:$4 sm:$0xff]  }
 0x2fc   :  { %3170 = vmatpush1.bf16.msra.mxu0 %v8797_v28  ;;  %v7919_v21 = vpop.f32.mrb[20].mxu1  ;;  %v8868_v28 = vld [vmem:[#allocation2 + $0xba4] ss:$12 sps:$4 sm:$0xff]  }
 0x2fd   :  { %3171 = vmatprep.subr.bf16.mxu0 %v8802_v17  ;;  %v7920_v12 = vpop.f32.mrb[21].mxu1  ;;  %v8866_v17 = vld [vmem:[#allocation2 + $0xba0] ss:$12 sps:$4 sm:$0xff]  }
 0x2fe   :  { %v7921_v23 = vadd.f32 %v7920_v12, %v7919_v21  ;;  %v7922_v24 = vpop.f32.mrb[22].mxu1  ;;  %v8877_v21 = vld [vmem:[#allocation2 + $0xbec] ss:$12 sps:$4 sm:$0xff]   ;;  %v8875_v12 = vld [vmem:[#allocation2 + $0xbe8] ss:$12 sps:$4 sm:$0xff]  }
 0x2ff   :  { %v7923_v26 = vpop.f32.mrb[23].mxu1  ;;  %v8883_v24 = vld [vmem:[%s11467_s11 + $0x14] ss:$8 sps:$4 sm:$0xff]  }
 0x300   :  { %3172 = vmatpush1.bf16.msra.mxu0 %v8800_v32  ;;  %v3476_v27 = vadd.f32 %v7921_v23, %v3436_v8  ;;  %v8871_v32 = vld [vmem:[#allocation2 + $0xbbc] ss:$12 sps:$4 sm:$0xff]  }
 0x301   :  { %3173 = vmatprep.subr.bf16.mxu0 %v8805_v18  ;;  %v8869_v18 = vld [vmem:[#allocation2 + $0xbb8] ss:$12 sps:$4 sm:$0xff]   ;;  %v8878_v23 = vld [vmem:[%s11467_s11] ss:$8 sps:$4 sm:$0xff]  }
 0x302   :  { %v8884_v26 = vld [vmem:[%s11467_s11 + $0x20] ss:$8 sps:$4 sm:$0xff]  }
 0x304   :  { %3174 = vmatpush1.bf16.msra.mxu0 %v8803_v20  ;;  %v8874_v20 = vld [vmem:[#allocation2 + $0xbd4] ss:$12 sps:$4 sm:$0xff]  }
 0x305   :  { %3175 = vmatprep.subr.bf16.mxu0 %v8808_v61  ;;  %v8872_v61 = vld [vmem:[#allocation2 + $0xbd0] ss:$12 sps:$4 sm:$0xff]  }
 0x308   :  { %3176 = vmatpush1.bf16.msra.mxu0 %v8806_v22  ;;  %v8880_v22 = vld [vmem:[%s11467_s11 + $0x4] ss:$8 sps:$4 sm:$0xff]  }
 0x309   :  { %3177 = vmatprep.subr.bf16.mxu0 %v8811_v25  ;;  %3977 = vmatprep.subr.bf16.mxu1 %v8880_v22  ;;  %v8881_v25 = vld [vmem:[%s11467_s11 + $0x10] ss:$8 sps:$4 sm:$0xff]  }
 0x30a   :  { %3978 = vmatpush1.bf16.msra.mxu1 %v8878_v23 }
 0x30b   :  { %3979 = vmatprep.subr.bf16.mxu1 %v8883_v24 }
 0x30c   :  { %3178 = vmatpush1.bf16.msra.mxu0 %v8809_v29  ;;  %v8887_v29 = vld [vmem:[%s11467_s11 + $0x30] ss:$8 sps:$4 sm:$0xff]  }
 0x30d   :  { %3179 = vmatprep.subr.bf16.mxu0 %v8814_v48  ;;  %v8892_v48 = vld [vmem:[%s11467_s11 + $0x44] ss:$8 sps:$4 sm:$0xff]  }
 0x30e   :  { %3980 = vmatpush1.bf16.msra.mxu1 %v8881_v25 }
 0x310   :  { %3180 = vmatpush1.bf16.msra.mxu0 %v8812_v31  ;;  %v8890_v31 = vld [vmem:[%s11467_s11 + $0x40] ss:$8 sps:$4 sm:$0xff]  }
 0x311   :  { %3181 = vmatprep.subr.bf16.mxu0 %v8817_v33  ;;  %v8895_v33 = vld [vmem:[%s11467_s11 + $0x54] ss:$8 sps:$4 sm:$0xff]  }
 0x314   :  { %3182 = vmatpush1.bf16.msra.mxu0 %v8815_v0  ;;  %v8893_v0 = vld [vmem:[%s11467_s11 + $0x50] ss:$8 sps:$4 sm:$0xff]  }
 0x315   :  { %3183 = vmatprep.subr.bf16.mxu0 %v8820_v34  ;;  %v8898_v34 = vld [vmem:[%s11467_s11 + $0x64] ss:$8 sps:$4 sm:$0xff]  }
 0x318   :  { %3184 = vmatpush1.bf16.msra.mxu0 %v8818_v35  ;;  %v8896_v35 = vld [vmem:[%s11467_s11 + $0x60] ss:$8 sps:$4 sm:$0xff]  }
 0x319   :  { %3185 = vmatprep.subr.bf16.mxu0 %v8823_v37  ;;  %v8901_v37 = vld [vmem:[%s11467_s11 + $0x74] ss:$8 sps:$4 sm:$0xff]  }
 0x31c   :  { %3186 = vmatpush1.bf16.msra.mxu0 %v8821_v38  ;;  %v7941_v42 = vpop.f32.mrb[24].mxu1  ;;  %v8899_v38 = vld [vmem:[%s11467_s11 + $0x70] ss:$8 sps:$4 sm:$0xff]  }
 0x31d   :  { %3187 = vmatprep.subr.bf16.mxu0 %v8826_v19  ;;  %v7942_v43 = vpop.f32.mrb[25].mxu1  ;;  %v8904_v19 = vld [vmem:[%s11467_s11 + $0x84] ss:$8 sps:$4 sm:$0xff]  }
 0x31e   :  { %v7943_v45 = vadd.f32 %v7942_v43, %v7941_v42  ;;  %v7944_v46 = vpop.f32.mrb[26].mxu1  ;;  %v8908_v42 = vld [vmem:[%s11467_s11 + $0xa0] ss:$8 sps:$4 sm:$0xff]   ;;  %v8913_v43 = vld [vmem:[%s11467_s11 + $0xb4] ss:$8 sps:$4 sm:$0xff]  }
 0x31f   :  { %v7945_v49 = vpop.f32.mrb[27].mxu1  ;;  %v8914_v46 = vld [vmem:[%s11467_s11 + $0xc0] ss:$8 sps:$4 sm:$0xff]  }
 0x320   :  { %3188 = vmatpush1.bf16.msra.mxu0 %v8824_v39  ;;  %v3516_v50 = vadd.f32 %v7943_v45, %v3476_v27  ;;  %v8889_v27 = vld [vmem:[%s11467_s11 + $0x34] ss:$8 sps:$4 sm:$0xff]   ;;  %v8902_v39 = vld [vmem:[%s11467_s11 + $0x80] ss:$8 sps:$4 sm:$0xff]   ;;  %v8916_v45 = vld [vmem:[%s11467_s11 + $0xc4] ss:$8 sps:$4 sm:$0xff]  }
 0x321   :  { %3189 = vmatprep.subr.bf16.mxu0 %v8829_v40  ;;  %v8907_v40 = vld [vmem:[%s11467_s11 + $0x94] ss:$8 sps:$4 sm:$0xff]   ;;  %v8917_v49 = vld [vmem:[%s11467_s11 + $0xd0] ss:$8 sps:$4 sm:$0xff]  }
 0x324   :  { %3190 = vmatpush1.bf16.msra.mxu0 %v8827_v41  ;;  %v8905_v41 = vld [vmem:[%s11467_s11 + $0x90] ss:$8 sps:$4 sm:$0xff]  }
 0x325   :  { %3200 = vmatprep.subr.bf16.mxu0 %v8832_v30  ;;  %v8910_v30 = vld [vmem:[%s11467_s11 + $0xa4] ss:$8 sps:$4 sm:$0xff]  }
 0x327   :  { %3192 = vmatmul.mubr.bf16.vlgmr.msra.gmra.mrb[0].mxu0 %v10216_v1  ;;  %v8845_v1 = vld [vmem:[#allocation2 + $0xaf8] ss:$12 sps:$4 sm:$0xff]  }
 0x328   :  { %3201 = vmatpush1.bf16.msra.mxu0 %v8830_v44  ;;  %3232 = vmatprep.mubr.bf16.mxu0 %v10225_v6  ;;  %v8848_v6 = vld [vmem:[#allocation2 + $0xb10] ss:$12 sps:$4 sm:$0xff]  }
 0x329   :  { %3202 = vmatprep.subr.bf16.mxu0 %v8835_v47  ;;  %v8911_v44 = vld [vmem:[%s11467_s11 + $0xb0] ss:$8 sps:$4 sm:$0xff]   ;;  %v8919_v47 = vld [vmem:[%s11467_s11 + $0xd4] ss:$8 sps:$4 sm:$0xff]  }
 0x32c   :  { %3203 = vmatpush1.bf16.msra.mxu0 %v8833_v51  ;;  %v8920_v51 = vld [vmem:[%s11467_s11 + $0xe0] ss:$8 sps:$4 sm:$0xff]  }
 0x32d   :  { %3204 = vmatprep.subr.bf16.mxu0 %v8838_v52  ;;  %v8925_v52 = vld [vmem:[%s11467_s11 + $0xf4] ss:$8 sps:$4 sm:$0xff]  }
 0x330   :  { %3205 = vmatpush1.bf16.msra.mxu0 %v8836_v53  ;;  %v8923_v53 = vld [vmem:[%s11467_s11 + $0xf0] ss:$8 sps:$4 sm:$0xff]  }
 0x331   :  { %3206 = vmatprep.subr.bf16.mxu0 %v8841_v54  ;;  %v8928_v54 = vld [vmem:[%s11467_s11 + $0x104] ss:$8 sps:$4 sm:$0xff]  }
 0x334   :  { %3207 = vmatpush1.bf16.msra.mxu0 %v8839_v56 }
 0x335   :  { %3208 = vmatprep.subr.bf16.mxu0 %v8844_v57 }
 0x338   :  { %3209 = vmatpush1.bf16.msra.mxu0 %v8842_v58  ;;  %v9801_v58 = vmov 0  }
 0x339   :  { %3210 = vmatprep.subr.bf16.mxu0 %v8847_v59 }
 0x33c   :  { %3211 = vmatpush1.bf16.msra.mxu0 %v8845_v1  ;;  %v7963_v3 = vpop.f32.mrb[28].mxu1 }
 0x33d   :  { %3212 = vmatprep.subr.bf16.mxu0 %v8850_v60  ;;  %v7964_v4 = vpop.f32.mrb[29].mxu1 }
 0x33e   :  { %v7965_v7 = vadd.f32 %v7964_v4, %v7963_v3  ;;  %v7966_v8 = vpop.f32.mrb[30].mxu1 }
 0x33f   :  { %v7967_v10 = vpop.f32.mrb[31].mxu1 }
 0x340   :  { %3213 = vmatpush1.bf16.msra.mxu0 %v8848_v6  ;;  %v10242_v11 = vadd.f32 %v7965_v7, %v3516_v50  ;;  %v8922_v50 = vld [vmem:[%s11467_s11 + $0xe4] ss:$8 sps:$4 sm:$0xff]  }
 0x341   :  { %3214 = vmatprep.subr.bf16.mxu0 %v8853_v62 }
 0x342   :  { %v3573_v56 = vrot.slane %v10242_v11, 4 }
 0x344   :  { %3215 = vmatpush1.bf16.msra.mxu0 %v8851_v63  ;;  %v3574_v57 = vadd.f32 %v3573_v56, %v10242_v11 }
 0x345   :  { %3216 = vmatprep.subr.bf16.mxu0 %v8856_v2 }
 0x346   :  { %v3575_v59 = vrot.slane %v3574_v57, 2 }
 0x348   :  { %3217 = vmatpush1.bf16.msra.mxu0 %v8854_v5  ;;  %v3576_v1 = vadd.f32 %v3575_v59, %v3574_v57 }
 0x349   :  { %3218 = vmatprep.subr.bf16.mxu0 %v8859_v9 }
 0x34a   :  { %v3577_v60 = vrot.slane %v3576_v1, 1 }
 0x34c   :  { %3219 = vmatpush1.bf16.msra.mxu0 %v8857_v13  ;;  %v3578_v6 = vadd.f32 %v3577_v60, %v3576_v1 }
 0x34d   :  { %3220 = vmatprep.subr.bf16.mxu0 %v8862_v14 }
 0x34e   :  { %v3581_v62 = vmul.f32 0.125, %v3578_v6  ;;  %v807_v6 = vld [vmem:[#allocation4] sm:$0x7] }
 0x350   :  { %3221 = vmatpush1.bf16.msra.mxu0 %v8860_v15  ;;  %v10348_v63 = vsub.f32 %v10242_v11, %v3581_v62 }
 0x351   :  { %3222 = vmatprep.subr.bf16.mxu0 %v8865_v16 }
 0x352   :  { %v3587_v2 = vmul.f32 %v10348_v63, %v10348_v63 }
 0x354   :  { %3223 = vmatpush1.bf16.msra.mxu0 %v8863_v55  ;;  %v3600_v7 = vrot.slane %v3587_v2, 4 }
 0x355   :  { %3224 = vmatprep.subr.bf16.mxu0 %v8868_v28 }
 0x356   :  { %v3601_v16 = vadd.f32 %v3600_v7, %v3587_v2 }
 0x358   :  { %3225 = vmatpush1.bf16.msra.mxu0 %v8866_v17  ;;  %v3602_v11 = vrot.slane %v3601_v16, 2 }
 0x359   :  { %3226 = vmatprep.subr.bf16.mxu0 %v8871_v32 }
 0x35c   :  { %3227 = vmatpush1.bf16.msra.mxu0 %v8869_v18 }
 0x35d   :  { %3228 = vmatprep.subr.bf16.mxu0 %v8874_v20 }
 0x360   :  { %3229 = vmatpush1.bf16.msra.mxu0 %v8872_v61 }
 0x361   :  { %3230 = vmatprep.subr.bf16.mxu0 %v8877_v21 }
 0x364   :  { %3231 = vmatpush1.bf16.msra.mxu0 %v8875_v12  ;;  %v3603_v12 = vadd.f32 %v3602_v11, %v3601_v16 }
 0x365   :  { %5200 = vmatprep.subr.bf16.mxu0 %v9801_v58 }
 0x367   :  { %3233 = vmatmul.mubr.bf16.vlgmr.msra.gmra.mrb[0].mxu0 %v10233_v36  ;;  %v8886_v36 = vld [vmem:[%s11467_s11 + $0x24] ss:$8 sps:$4 sm:$0xff]  }
 0x368   :  { %3981 = vmatprep.subr.bf16.mxu1 %v8886_v36  ;;  %v3604_v36 = vrot.slane %v3603_v12, 1 }
 0x369   :  { %3982 = vmatpush1.bf16.msra.mxu1 %v8884_v26 }
 0x36a   :  { %3983 = vmatprep.subr.bf16.mxu1 %v8889_v27 }
 0x36d   :  { %3984 = vmatpush1.bf16.msra.mxu1 %v8887_v29 }
 0x36e   :  { %3985 = vmatprep.subr.bf16.mxu1 %v8892_v48 }
 0x371   :  { %3986 = vmatpush1.bf16.msra.mxu1 %v8890_v31  ;;  %v3605_v31 = vadd.f32 %v3604_v36, %v3603_v12  ;;  %v8937_v12 = vld [vmem:[%s11467_s11 + $0x134] ss:$8 sps:$4 sm:$0xff]  }
 0x372   :  { %3987 = vmatprep.subr.bf16.mxu1 %v8895_v33  ;;  %v8943_v36 = vld [vmem:[%s11467_s11 + $0x154] ss:$8 sps:$4 sm:$0xff]  }
 0x375   :  { %3988 = vmatpush1.bf16.msra.mxu1 %v8893_v0 }
 0x376   :  { %3989 = vmatprep.subr.bf16.mxu1 %v8898_v34 }
 0x379   :  { %3990 = vmatpush1.bf16.msra.mxu1 %v8896_v35 }
 0x37a   :  { %3991 = vmatprep.subr.bf16.mxu1 %v8901_v37  ;;  %v3608_v37 = vmul.f32 0.125, %v3605_v31 }
 0x37d   :  { %3992 = vmatpush1.bf16.msra.mxu1 %v8899_v38 }
 0x37e   :  { %3993 = vmatprep.subr.bf16.mxu1 %v8904_v19 }
 0x381   :  { %3994 = vmatpush1.bf16.msra.mxu1 %v8902_v39 }
 0x382   :  { %3995 = vmatprep.subr.bf16.mxu1 %v8907_v40 }
 0x385   :  { %3996 = vmatpush1.bf16.msra.mxu1 %v8905_v41  ;;  %v3611_v41 = vadd.f32 1e-05, %v3608_v37 }
 0x386   :  { %3997 = vmatprep.subr.bf16.mxu1 %v8910_v30 }
 0x387   :  { %9085 = vrsqrt.f32 %v3611_v41  ;;  %v8958_v41 = vld [vmem:[%s11435_s7 + $0x54] ss:$20 sps:$4 sm:$0xff]  }
 0x389   :  { %3998 = vmatpush1.bf16.msra.mxu1 %v8908_v42 }
 0x38a   :  { %3999 = vmatprep.subr.bf16.mxu1 %v8913_v43 }
 0x38d   :  { %4000 = vmatpush1.bf16.msra.mxu1 %v8911_v44 }
 0x38e   :  { %4001 = vmatprep.subr.bf16.mxu1 %v8916_v45 }
 0x391   :  { %4002 = vmatpush1.bf16.msra.mxu1 %v8914_v46  ;;  %v9802_v46 = vmov 1966171168  }
 0x392   :  { %4003 = vmatprep.subr.bf16.mxu1 %v8919_v47  ;;  %v3620_v47 = vunpack.c.l.s4 %v9802_v46  ;;  %v8967_v46 = vld [vmem:[%s11435_s7 + $0xcc] ss:$20 sps:$4 sm:$0xff]  }
 0x395   :  { %4004 = vmatpush1.bf16.msra.mxu1 %v8917_v49  ;;  %v3622_v49 = vlaneseq }
 0x396   :  { %4005 = vmatprep.subr.bf16.mxu1 %v8922_v50  ;;  %v3621_v50 = vunpack.c.0.s8 %v3620_v47  ;;  %v8965_v47 = vld [vmem:[%s11435_s7 + $0xc8] ss:$20 sps:$4 sm:$0xff]  }
 0x399   :  { %4006 = vmatpush1.bf16.msra.mxu1 %v8920_v51  ;;  %v3623_v51 = vshrl.u32 %v3622_v49, 7  ;;  %v8970_v49 = vld [vmem:[%s11435_s7 + $0xf4] ss:$20 sps:$4 sm:$0xff]  }
 0x39a   :  { %4007 = vmatprep.subr.bf16.mxu1 %v8925_v52  ;;  %v9086_v52 = vpop.eup %9085 }
 0x39b   :  { %v10357_v2 = vsub.s32 0, %v3623_v51 }
 0x39d   :  { %4008 = vmatpush1.bf16.msra.mxu1 %v8923_v53 }
 0x39e   :  { %4018 = vmatprep.subr.bf16.mxu1 %v8928_v54  ;;  %v10352_v54 = vsub.s32 %v3621_v50, %v3623_v51  ;;  %v8968_v50 = vld [vmem:[%s11435_s7 + $0xf0] ss:$20 sps:$4 sm:$0xff]  }
 0x3a0   :  { %v3632_v1 = vrot.slane %v9086_v52, %v10352_v54  ;;  %v8971_v52 = vld [vmem:[%s11435_s7 + $0x118] ss:$20 sps:$4 sm:$0xff]  }
 0x43a   :  { %v3234_v3 = vpop.f32.mrb[0].mxu0 }
 0x43b   :  { %v3561_v4 = vrot.slane %v3234_v3, 4  ;;  %v3236_v5 = vpop.f32.mrb[1].mxu0 }
 0x43c   :  { %v3567_v8 = vrot.slane %v3236_v5, 4  ;;  %v3238_v9 = vpop.f32.mrb[2].mxu0 }
 0x43d   :  { %v3562_v10 = vadd.f32 %v3561_v4, %v3234_v3  ;;  %v3239_v13 = vpop.f32.mrb[3].mxu0  ;;  %v808_v4 = vld [vmem:[#allocation6] sm:$0x7] }
 0x43e   :  { %v3568_v14 = vadd.f32 %v3567_v8, %v3236_v5 }
 0x43f   :  { %v3563_v15 = vrot.slane %v3562_v10, 2 }
 0x440   :  { %v3569_v55 = vrot.slane %v3568_v14, 2 }
 0x441   :  { %v3564_v28 = vadd.f32 %v3563_v15, %v3562_v10  ;;  %v3666_v10 = vrot.slane %v808_v4, %v10357_v2 }
 0x442   :  { %v3570_v17 = vadd.f32 %v3569_v55, %v3568_v14 }
 0x443   :  { %v3565_v32 = vrot.slane %v3564_v28, 1 }
 0x444   :  { %v3571_v18 = vrot.slane %v3570_v17, 1 }
 0x445   :  { %v3566_v20 = vadd.f32 %v3565_v32, %v3564_v28  ;;  %v8926_v32 = vld [vmem:[%s11467_s11 + $0x100] ss:$8 sps:$4 sm:$0xff]  }
 0x446   :  { %v3572_v61 = vadd.f32 %v3571_v18, %v3570_v17  ;;  %v8931_v18 = vld [vmem:[%s11467_s11 + $0x114] ss:$8 sps:$4 sm:$0xff]  }
 0x447   :  { %v3579_v21 = vmul.f32 0.125, %v3566_v20  ;;  %v8929_v20 = vld [vmem:[%s11467_s11 + $0x110] ss:$8 sps:$4 sm:$0xff]  }
 0x448   :  { %v3580_v22 = vmul.f32 0.125, %v3572_v61  ;;  %v8934_v61 = vld [vmem:[%s11467_s11 + $0x124] ss:$8 sps:$4 sm:$0xff]  }
 0x449   :  { %v3582_v23 = vsub.f32 %v3234_v3, %v3579_v21  ;;  %v10359_v3 = vsub.s32 1, %v3623_v51  ;;  %v8932_v21 = vld [vmem:[%s11467_s11 + $0x120] ss:$8 sps:$4 sm:$0xff]  }
 0x44a   :  { %v3583_v24 = vsub.f32 %v3236_v5, %v3580_v22  ;;  %v8935_v22 = vld [vmem:[%s11467_s11 + $0x130] ss:$8 sps:$4 sm:$0xff]  }
 0x44b   :  { %v3585_v25 = vmul.f32 %v3582_v23, %v3582_v23  ;;  %v3670_v8 = vrot.slane %v808_v4, %v10359_v3 }
 0x44c   :  { %v3586_v26 = vmul.f32 %v3583_v24, %v3583_v24 }
 0x44d   :  { %v3588_v27 = vrot.slane %v3585_v25, 4 }
 0x44e   :  { %v3594_v29 = vrot.slane %v3586_v26, 4 }
 0x44f   :  { %v3589_v48 = vadd.f32 %v3588_v27, %v3585_v25  ;;  %v8938_v25 = vld [vmem:[%s11467_s11 + $0x140] ss:$8 sps:$4 sm:$0xff]   ;;  %v8941_v27 = vld [vmem:[%s11467_s11 + $0x150] ss:$8 sps:$4 sm:$0xff]  }
 0x450   :  { %v3595_v33 = vadd.f32 %v3594_v29, %v3586_v26  ;;  %v8946_v29 = vld [vmem:[%s11467_s11 + $0x164] ss:$8 sps:$4 sm:$0xff]  }
 0x451   :  { %v3590_v0 = vrot.slane %v3589_v48, 2 }
 0x452   :  { %v3596_v34 = vrot.slane %v3595_v33, 2 }
 0x453   :  { %v3591_v35 = vadd.f32 %v3590_v0, %v3589_v48  ;;  %v8949_v0 = vld [vmem:[%s11467_s11 + $0x174] ss:$8 sps:$4 sm:$0xff]  }
 0x454   :  { %v3597_v38 = vadd.f32 %v3596_v34, %v3595_v33  ;;  %v8944_v33 = vld [vmem:[%s11467_s11 + $0x160] ss:$8 sps:$4 sm:$0xff]  }
 0x455   :  { %v3592_v19 = vrot.slane %v3591_v35, 1 }
 0x456   :  { %v3598_v39 = vrot.slane %v3597_v38, 1 }
 0x457   :  { %v3593_v40 = vadd.f32 %v3592_v19, %v3591_v35  ;;  %v8947_v35 = vld [vmem:[%s11467_s11 + $0x170] ss:$8 sps:$4 sm:$0xff]   ;;  %v8950_v19 = vld [vmem:[%s11435_s7] ss:$20 sps:$4 sm:$0xff]  }
 0x458   :  { %v3599_v30 = vadd.f32 %v3598_v39, %v3597_v38  ;;  %v8952_v38 = vld [vmem:[%s11435_s7 + $0x4] ss:$20 sps:$4 sm:$0xff]   ;;  %v8955_v39 = vld [vmem:[%s11435_s7 + $0x2c] ss:$20 sps:$4 sm:$0xff]  }
 0x459   :  { %v3606_v42 = vmul.f32 0.125, %v3593_v40  ;;  %v8953_v40 = vld [vmem:[%s11435_s7 + $0x28] ss:$20 sps:$4 sm:$0xff]  }
 0x45a   :  { %v3607_v43 = vmul.f32 0.125, %v3599_v30  ;;  %v8956_v30 = vld [vmem:[%s11435_s7 + $0x50] ss:$20 sps:$4 sm:$0xff]  }
 0x45b   :  { %v3609_v44 = vadd.f32 1e-05, %v3606_v42  ;;  %v8961_v42 = vld [vmem:[%s11435_s7 + $0x7c] ss:$20 sps:$4 sm:$0xff]  }
 0x45c   :  { %v3610_v45 = vadd.f32 1e-05, %v3607_v43  ;;  %v8959_v43 = vld [vmem:[%s11435_s7 + $0x78] ss:$20 sps:$4 sm:$0xff]  }
 0x45d   :  { %9087 = vrsqrt.f32 %v3609_v44  ;;  %v8964_v44 = vld [vmem:[%s11435_s7 + $0xa4] ss:$20 sps:$4 sm:$0xff]  }
 0x45e   :  { %9089 = vrsqrt.f32 %v3610_v45  ;;  %v8962_v45 = vld [vmem:[%s11435_s7 + $0xa0] ss:$20 sps:$4 sm:$0xff]  }
 0x467   :  { %v9088_v53 = vpop.eup %9087 }
 0x468   :  { %v9090_v56 = vpop.eup %9089 }
 0x469   :  { %v3618_v57 = vcombine.low %v9088_v53, %v9090_v56  ;;  %v8976_v53 = vld [vmem:[%s11435_s7 + $0x144] ss:$20 sps:$4 sm:$0xff]   ;;  %v8974_v56 = vld [vmem:[%s11435_s7 + $0x140] ss:$20 sps:$4 sm:$0xff]  }
 0x46b   :  { %v3625_v59 = vrot.slane %v3618_v57, %v10352_v54  ;;  %v8979_v57 = vld [vmem:[%s11435_s7 + $0x16c] ss:$20 sps:$4 sm:$0xff]  }
 0x46d   :  { %v3633_v60 = vcombine.low %v3625_v59, %v3632_v1  ;;  %v8977_v59 = vld [vmem:[%s11435_s7 + $0x168] ss:$20 sps:$4 sm:$0xff]  }
 0x46e   :  { %v8982_v1 = vld [vmem:[%s11435_s7 + $0x194] ss:$20 sps:$4 sm:$0xff]  }
 0x46f   :  { %v3640_v62 = vrot.slane %v3633_v60, %v10352_v54  ;;  %v8980_v60 = vld [vmem:[%s11435_s7 + $0x190] ss:$20 sps:$4 sm:$0xff]  }
 0x471   :  { %v3642_v5 = vmul.f32 %v3640_v62, %v807_v6  ;;  %v8985_v6 = vld [vmem:[%s11435_s7 + $0x1bc] ss:$20 sps:$4 sm:$0xff]   ;;  %v8983_v62 = vld [vmem:[%s11435_s7 + $0x1b8] ss:$20 sps:$4 sm:$0xff]  }
 0x473   :  { %v3651_v7 = vrot.slane %v3642_v5, %v10359_v3  ;;  %v3647_v9 = vrot.slane %v3642_v5, %v10357_v2 }
 0x475   :  { %v3660_v13 = vmul.f32 %v3651_v7, %v3583_v24  ;;  %v3659_v14 = vmul.f32 %v3647_v9, %v3582_v23  ;;  %v8940_v23 = vld [vmem:[%s11467_s11 + $0x144] ss:$8 sps:$4 sm:$0xff]   ;;  %v3654_v24 = vsub.s32 2, %v3623_v51  ;;  %v8973_v51 = vld [vmem:[%s11435_s7 + $0x11c] ss:$20 sps:$4 sm:$0xff]  }
 0x476   :  { %v8991_v7 = vld [vmem:[%s11435_s7 + $0x20c] ss:$20 sps:$4 sm:$0xff]   ;;  %v4231_v9 = vld [vmem:[%s11435_s7 + $0x230] sm:$0xff] }
 0x477   :  { %v3679_v15 = vadd.f32 %v3670_v8, %v3660_v13  ;;  %v3678_v16 = vadd.f32 %v3666_v10, %v3659_v14  ;;  %v3655_v26 = vrot.slane %v3642_v5, %v3654_v24  ;;  %v3674_v31 = vrot.slane %v808_v4, %v3654_v24  ;;  %v8988_v4 = vld [vmem:[%s11435_s7 + $0x1e4] ss:$20 sps:$4 sm:$0xff]   ;;  %v8986_v5 = vld [vmem:[%s11435_s7 + $0x1e0] ss:$20 sps:$4 sm:$0xff]   ;;  %v8989_v8 = vld [vmem:[%s11435_s7 + $0x208] ss:$20 sps:$4 sm:$0xff]  }
 0x478   :  { %v7648_v10 = vcombine.high %v4231_v9, %v4231_v9  ;;  %v7647_v13 = vcombine.low %v4231_v9, %v4231_v9 }
 0x479   :  { %v3682_v55 = vmax.f32 %v3679_v15, 0.0  ;;  %v3681_v28 = vmax.f32 %v3678_v16, 0.0  ;;  %v3661_v48 = vmul.f32 %v3655_v26, %v10348_v63  ;;  %v8996_v15 = vld [vmem:[%s11435_s7 + $0xc] ss:$20 sps:$4 sm:$0xff]  }
 0x47a   :  { %v4618_v14 = vsel %vm4616_vm0, %v7647_v13, 0 }
 0x47b   :  { %v3685_v17 = vpack.c.bf16 %v3682_v55, %v3682_v55  ;;  %v3684_v11 = vpack.c.bf16 %v3681_v28, %v3681_v28  ;;  %v3680_v34 = vadd.f32 %v3674_v31, %v3661_v48 }
 0x47d   :  { %4009 = vmatprep.mubr.bf16.mxu1 %v3685_v17  ;;  %v3683_v37 = vmax.f32 %v3680_v34, 0.0 }
 0x47e   :  { %4010 = vmatmul.mubr.bf16.vlgmr.msra.gmra.mrb[32].mxu1 %v3684_v11 }
 0x47f   :  { %4019 = vmatpush1.bf16.msra.mxu1 %v8926_v32  ;;  %4050 = vmatprep.mubr.bf16.mxu1 %v9801_v58  ;;  %v3686_v63 = vpack.c.bf16 %v3683_v37, %v3683_v37 }
 0x480   :  { %4020 = vmatprep.subr.bf16.mxu1 %v8931_v18 }
 0x483   :  { %4021 = vmatpush1.bf16.msra.mxu1 %v8929_v20 }
 0x484   :  { %4022 = vmatprep.subr.bf16.mxu1 %v8934_v61 }
 0x487   :  { %4023 = vmatpush1.bf16.msra.mxu1 %v8932_v21 }
 0x488   :  { %4024 = vmatprep.subr.bf16.mxu1 %v8937_v12 }
 0x48b   :  { %4025 = vmatpush1.bf16.msra.mxu1 %v8935_v22 }
 0x48c   :  { %4026 = vmatprep.subr.bf16.mxu1 %v8940_v23 }
 0x48f   :  { %4027 = vmatpush1.bf16.msra.mxu1 %v8938_v25 }
 0x490   :  { %4028 = vmatprep.subr.bf16.mxu1 %v8943_v36 }
 0x493   :  { %4029 = vmatpush1.bf16.msra.mxu1 %v8941_v27 }
 0x494   :  { %4030 = vmatprep.subr.bf16.mxu1 %v8946_v29 }
 0x497   :  { %4031 = vmatpush1.bf16.msra.mxu1 %v8944_v33 }
 0x498   :  { %4032 = vmatprep.subr.bf16.mxu1 %v8949_v0 }
 0x49b   :  { %4033 = vmatpush1.bf16.msra.mxu1 %v8947_v35 }
 0x49c   :  { %4632 = vmatprep.subr.bf16.mxu1 %v8952_v38 }
 0x49e   :  { %4051 = vmatmul.mubr.bf16.vlgmr.msra.gmra.mrb[32].mxu1 %v3686_v63 }
 0x49f   :  { %4633 = vmatpush1.bf16.msra.mxu1 %v8950_v19 }
 0x4a0   :  { %4634 = vmatprep.subr.bf16.mxu1 %v8955_v39 }
 0x4a3   :  { %4635 = vmatpush1.bf16.msra.mxu1 %v8953_v40 }
 0x4a4   :  { %4636 = vmatprep.subr.bf16.mxu1 %v8958_v41 }
 0x4a7   :  { %4637 = vmatpush1.bf16.msra.mxu1 %v8956_v30 }
 0x4a8   :  { %4638 = vmatprep.subr.bf16.mxu1 %v8961_v42 }
 0x4ab   :  { %4639 = vmatpush1.bf16.msra.mxu1 %v8959_v43 }
 0x4ac   :  { %4640 = vmatprep.subr.bf16.mxu1 %v8964_v44 }
 0x4af   :  { %4641 = vmatpush1.bf16.msra.mxu1 %v8962_v45 }
 0x4b0   :  { %4642 = vmatprep.subr.bf16.mxu1 %v8967_v46 }
 0x4b3   :  { %4643 = vmatpush1.bf16.msra.mxu1 %v8965_v47 }
 0x4b4   :  { %4644 = vmatprep.subr.bf16.mxu1 %v8970_v49 }
 0x4b7   :  { %4645 = vmatpush1.bf16.msra.mxu1 %v8968_v50 }
 0x4b8   :  { %4646 = vmatprep.subr.bf16.mxu1 %v8973_v51 }
 0x4bb   :  { %4647 = vmatpush1.bf16.msra.mxu1 %v8971_v52 }
 0x4bc   :  { %4648 = vmatprep.subr.bf16.mxu1 %v8976_v53 }
 0x4bf   :  { %4649 = vmatpush1.bf16.msra.mxu1 %v8974_v56  ;;  %v3735_v56 = vld [vmem:[#allocation7] sm:$0x3] }
 0x4c0   :  { %4650 = vmatprep.subr.bf16.mxu1 %v8979_v57 }
 0x4c3   :  { %4651 = vmatpush1.bf16.msra.mxu1 %v8977_v59  ;;  %v3736_v59 = vld [vmem:[#allocation9] sm:$0x3] }
 0x4c4   :  { %4652 = vmatprep.subr.bf16.mxu1 %v8982_v1 }
 0x4c7   :  { %4653 = vmatpush1.bf16.msra.mxu1 %v8980_v60 }
 0x4c8   :  { %4654 = vmatprep.subr.bf16.mxu1 %v8985_v6 }
 0x4cb   :  { %4655 = vmatpush1.bf16.msra.mxu1 %v8983_v62  ;;  %v4134_v62 = vrot.slane %v3736_v59, %v10357_v2 }
 0x4cc   :  { %4656 = vmatprep.subr.bf16.mxu1 %v8988_v4  ;;  %v4138_v4 = vrot.slane %v3736_v59, %v10359_v3 }
 0x4cf   :  { %4657 = vmatpush1.bf16.msra.mxu1 %v8986_v5 }
 0x4d0   :  { %4658 = vmatprep.subr.bf16.mxu1 %v8991_v7 }
 0x4d3   :  { %4659 = vmatpush1.bf16.msra.mxu1 %v8989_v8 }
 0x4d4   :  { %7652 = vmatprep.subr.msk.bf16.mxu1 %vm4616_vm0, %v7648_v10 }
 0x4d7   :  { %4661 = vmatpush1.bf16.msra.mxu1 %v4618_v14 }
 0x4d8   :  { %4673 = vmatprep.subr.bf16.mxu1 %v8996_v15  ;;  %v8994_v15 = vld [vmem:[%s11435_s7 + $0x8] ss:$20 sps:$4 sm:$0xff]  }
 0x571   :  { %v4052_v16 = vpop.f32.mrb[32].mxu1 }
 0x572   :  { %v4059_v55 = vrot.slane %v4052_v16, 4  ;;  %v4054_v28 = vpop.f32.mrb[33].mxu1 }
 0x573   :  { %v4066_v17 = vsel %vm4065_vm1, %v4054_v28, 0.0  ;;  %v4056_v32 = vpop.f32.mrb[34].mxu1 }
 0x574   :  { %v4060_v11 = vadd.f32 %v4059_v55, %v4052_v16  ;;  %v4067_v18 = vrot.slane %v4066_v17, 4  ;;  %v4057_v20 = vpop.f32.mrb[35].mxu1  ;;  %v8999_v55 = vld [vmem:[%s11435_s7 + $0x34] ss:$20 sps:$4 sm:$0xff]   ;;  %v9000_v32 = vld [vmem:[%s11435_s7 + $0x58] ss:$20 sps:$4 sm:$0xff]  }
 0x575   :  { %v9008_v20 = vld [vmem:[%s11435_s7 + $0xac] ss:$20 sps:$4 sm:$0xff]  }
 0x576   :  { %v4061_v61 = vrot.slane %v4060_v11, 2  ;;  %v4068_v21 = vadd.f32 %v4067_v18, %v4066_v17  ;;  %v9002_v17 = vld [vmem:[%s11435_s7 + $0x5c] ss:$20 sps:$4 sm:$0xff]   ;;  %v9003_v18 = vld [vmem:[%s11435_s7 + $0x80] ss:$20 sps:$4 sm:$0xff]  }
 0x578   :  { %v4062_v12 = vadd.f32 %v4061_v61, %v4060_v11  ;;  %v4069_v22 = vrot.slane %v4068_v21, 2  ;;  %v9005_v11 = vld [vmem:[%s11435_s7 + $0x84] ss:$20 sps:$4 sm:$0xff]   ;;  %v9006_v61 = vld [vmem:[%s11435_s7 + $0xa8] ss:$20 sps:$4 sm:$0xff]  }
 0x57a   :  { %v4063_v23 = vrot.slane %v4062_v12, 1  ;;  %v4070_v24 = vadd.f32 %v4069_v22, %v4068_v21  ;;  %v9011_v21 = vld [vmem:[%s11435_s7 + $0xd4] ss:$20 sps:$4 sm:$0xff]   ;;  %v9014_v22 = vld [vmem:[%s11435_s7 + $0xfc] ss:$20 sps:$4 sm:$0xff]  }
 0x57c   :  { %v4064_v25 = vadd.f32 %v4063_v23, %v4062_v12  ;;  %v4071_v36 = vrot.slane %v4070_v24, 1  ;;  %v9009_v12 = vld [vmem:[%s11435_s7 + $0xd0] ss:$20 sps:$4 sm:$0xff]   ;;  %v9012_v23 = vld [vmem:[%s11435_s7 + $0xf8] ss:$20 sps:$4 sm:$0xff]  }
 0x57e   :  { %v4073_v26 = vmul.f32 0.125, %v4064_v25  ;;  %v4072_v27 = vadd.f32 %v4071_v36, %v4070_v24  ;;  %v9017_v24 = vld [vmem:[%s11435_s7 + $0x124] ss:$20 sps:$4 sm:$0xff]   ;;  %v9015_v25 = vld [vmem:[%s11435_s7 + $0x120] ss:$20 sps:$4 sm:$0xff]  }
 0x57f   :  { %v9020_v36 = vld [vmem:[%s11435_s7 + $0x14c] ss:$20 sps:$4 sm:$0xff]  }
 0x580   :  { %v4075_v29 = vsub.f32 %v4052_v16, %v4073_v26  ;;  %v4074_v48 = vmul.f32 0.125, %v4072_v27  ;;  %v9018_v26 = vld [vmem:[%s11435_s7 + $0x148] ss:$20 sps:$4 sm:$0xff]  }
 0x581   :  { %v9023_v27 = vld [vmem:[%s11435_s7 + $0x174] ss:$20 sps:$4 sm:$0xff]  }
 0x582   :  { %v4077_v31 = vmul.f32 %v4075_v29, %v4075_v29  ;;  %v4076_v33 = vsub.f32 %v4054_v28, %v4074_v48  ;;  %v8997_v28 = vld [vmem:[%s11435_s7 + $0x30] ss:$20 sps:$4 sm:$0xff]  }
 0x583   :  { %v9026_v48 = vld [vmem:[%s11435_s7 + $0x19c] ss:$20 sps:$4 sm:$0xff]  }
 0x584   :  { %v4079_v0 = vrot.slane %v4077_v31, 4  ;;  %v4078_v34 = vmul.f32 %v4076_v33, %v4076_v33 }
 0x586   :  { %v4080_v35 = vadd.f32 %v4079_v0, %v4077_v31  ;;  %v4085_v37 = vsel %vm4065_vm1, %v4078_v34, 0.0  ;;  %v9024_v31 = vld [vmem:[%s11435_s7 + $0x198] ss:$20 sps:$4 sm:$0xff]   ;;  %v9027_v0 = vld [vmem:[%s11435_s7 + $0x1c0] ss:$20 sps:$4 sm:$0xff]  }
 0x587   :  { %v4086_v63 = vrot.slane %v4085_v37, 4  ;;  %v9032_v34 = vld [vmem:[%s11435_s7 + $0x1ec] ss:$20 sps:$4 sm:$0xff]  }
 0x588   :  { %v4081_v38 = vrot.slane %v4080_v35, 2 }
 0x589   :  { %v4087_v19 = vadd.f32 %v4086_v63, %v4085_v37  ;;  %v9035_v37 = vld [vmem:[%s11435_s7 + $0x214] ss:$20 sps:$4 sm:$0xff]   ;;  %v4232_v63 = vld [vmem:[%s11435_s7 + $0x238] sm:$0xff] }
 0x58a   :  { %v4082_v39 = vadd.f32 %v4081_v38, %v4080_v35  ;;  %v9030_v35 = vld [vmem:[%s11435_s7 + $0x1e8] ss:$20 sps:$4 sm:$0xff]   ;;  %v9033_v38 = vld [vmem:[%s11435_s7 + $0x210] ss:$20 sps:$4 sm:$0xff]  }
 0x58b   :  { %v4088_v40 = vrot.slane %v4087_v19, 2 }
 0x58c   :  { %v4083_v41 = vrot.slane %v4082_v39, 1 }
 0x58d   :  { %v4089_v30 = vadd.f32 %v4088_v40, %v4087_v19  ;;  %v7650_v19 = vcombine.high %v4232_v63, %v4232_v63 }
 0x58e   :  { %v4084_v42 = vadd.f32 %v4083_v41, %v4082_v39  ;;  %v7649_v39 = vcombine.low %v4232_v63, %v4232_v63  ;;  %v9038_v41 = vld [vmem:[%s11435_s7 + $0x10] ss:$20 sps:$4 sm:$0xff]  }
 0x58f   :  { %v4090_v43 = vrot.slane %v4089_v30, 1 }
 0x590   :  { %v4092_v44 = vmul.f32 0.125, %v4084_v42  ;;  %v4624_v40 = vsel %vm4616_vm0, %v7649_v39, 0  ;;  %v9040_v42 = vld [vmem:[%s11435_s7 + $0x60] ss:$20 sps:$4 sm:$0xff]  }
 0x591   :  { %v4091_v45 = vadd.f32 %v4090_v43, %v4089_v30  ;;  %v9039_v30 = vld [vmem:[%s11435_s7 + $0x38] ss:$20 sps:$4 sm:$0xff]   ;;  %v9041_v43 = vld [vmem:[%s11435_s7 + $0x88] ss:$20 sps:$4 sm:$0xff]  }
 0x592   :  { %v4094_v46 = vadd.f32 1e-05, %v4092_v44  ;;  %v9042_v44 = vld [vmem:[%s11435_s7 + $0xb0] ss:$20 sps:$4 sm:$0xff]  }
 0x593   :  { %v4093_v47 = vmul.f32 0.125, %v4091_v45  ;;  %v9043_v45 = vld [vmem:[%s11435_s7 + $0xd8] ss:$20 sps:$4 sm:$0xff]  }
 0x594   :  { %9091 = vrsqrt.f32 %v4094_v46  ;;  %v9044_v46 = vld [vmem:[%s11435_s7 + $0x100] ss:$20 sps:$4 sm:$0xff]  }
 0x595   :  { %v4095_v49 = vadd.f32 1e-05, %v4093_v47  ;;  %v9045_v47 = vld [vmem:[%s11435_s7 + $0x128] ss:$20 sps:$4 sm:$0xff]  }
 0x597   :  { %9093 = vrsqrt.f32 %v4095_v49  ;;  %v9046_v49 = vld [vmem:[%s11435_s7 + $0x150] ss:$20 sps:$4 sm:$0xff]  }
 0x59e   :  { %v9092_v50 = vpop.eup %9091 }
 0x5a1   :  { %v9094_v51 = vpop.eup %9093 }
 0x5a2   :  { %v4100_v52 = vcombine.low %v9092_v50, %v9094_v51  ;;  %v9047_v50 = vld [vmem:[%s11435_s7 + $0x178] ss:$20 sps:$4 sm:$0xff]   ;;  %v9048_v51 = vld [vmem:[%s11435_s7 + $0x1a0] ss:$20 sps:$4 sm:$0xff]  }
 0x5a4   :  { %v4107_v53 = vrot.slane %v4100_v52, %v10352_v54  ;;  %v9049_v52 = vld [vmem:[%s11435_s7 + $0x1c8] ss:$20 sps:$4 sm:$0xff]  }
 0x5a6   :  { %v4114_v57 = vrot.slane %v4107_v53, %v10352_v54  ;;  %v9050_v53 = vld [vmem:[%s11435_s7 + $0x1f0] ss:$20 sps:$4 sm:$0xff]  }
 0x5a8   :  { %v4116_v1 = vmul.f32 %v4114_v57, %v3735_v56  ;;  %v9051_v56 = vld [vmem:[%s11435_s7 + $0x218] ss:$20 sps:$4 sm:$0xff]   ;;  %v9052_v57 = vld [vmem:[%s11435_s7 + $0x240] ss:$0 sps:$4 sm:$0xff]  }
 0x5a9   :  { %v4630_v59 = vsel %vm4616_vm0, %v9052_v57, 0 }
 0x5aa   :  { %v4121_v60 = vrot.slane %v4116_v1, %v10357_v2  ;;  %v4125_v6 = vrot.slane %v4116_v1, %v10359_v3 }
 0x5ac   :  { %v4129_v5 = vmul.f32 %v4125_v6, %v4076_v33  ;;  %v4128_v7 = vmul.f32 %v4121_v60, %v4075_v29  ;;  %v9021_v29 = vld [vmem:[%s11435_s7 + $0x170] ss:$20 sps:$4 sm:$0xff]  }
 0x5ad   :  { %v9029_v33 = vld [vmem:[%s11435_s7 + $0x1c4] ss:$20 sps:$4 sm:$0xff]   ;;  %s9803_s7 = smov 120  }
 0x5ae   :  { %v4142_v8 = vadd.f32 %v4138_v4, %v4129_v5  ;;  %v4141_v9 = vadd.f32 %v4134_v62, %v4128_v7 }
 0x5b0   :  { %v4144_v10 = vmax.f32 %v4142_v8, 0.0  ;;  %v4143_v13 = vmax.f32 %v4141_v9, 0.0 }
 0x5b2   :  { %v10512_v14 = vpack.c.bf16 %v4144_v10, %v4144_v10  ;;  %v10517_v16 = vpack.c.bf16 %v4143_v13, %v4143_v13 }
 0x5b4   :  { %7653 = vmatprep.mubr.msk.bf16.mxu1 %vm4065_vm1, %v10512_v14 }
 0x5b5   :  { %4665 = vmatmul.mubr.bf16.vlgmr.msra.gmra.mrb[36].mxu1 %v10517_v16 }
 0x5b6   :  { %4674 = vmatpush1.bf16.msra.mxu1 %v8994_v15  ;;  %7655 = vmatprep.mubr.msk.bf16.mxu1 %vm4065_vm1, %v10512_v14 }
 0x5b7   :  { %4675 = vmatprep.subr.bf16.mxu1 %v8999_v55 }
 0x5ba   :  { %4676 = vmatpush1.bf16.msra.mxu1 %v8997_v28 }
 0x5bb   :  { %4677 = vmatprep.subr.bf16.mxu1 %v9002_v17 }
 0x5be   :  { %4678 = vmatpush1.bf16.msra.mxu1 %v9000_v32 }
 0x5bf   :  { %4679 = vmatprep.subr.bf16.mxu1 %v9005_v11 }
 0x5c2   :  { %4680 = vmatpush1.bf16.msra.mxu1 %v9003_v18 }
 0x5c3   :  { %4681 = vmatprep.subr.bf16.mxu1 %v9008_v20 }
 0x5c6   :  { %4682 = vmatpush1.bf16.msra.mxu1 %v9006_v61 }
 0x5c7   :  { %4683 = vmatprep.subr.bf16.mxu1 %v9011_v21 }
 0x5ca   :  { %4684 = vmatpush1.bf16.msra.mxu1 %v9009_v12 }
 0x5cb   :  { %4685 = vmatprep.subr.bf16.mxu1 %v9014_v22 }
 0x5ce   :  { %4686 = vmatpush1.bf16.msra.mxu1 %v9012_v23 }
 0x5cf   :  { %4687 = vmatprep.subr.bf16.mxu1 %v9017_v24 }
 0x5d2   :  { %4688 = vmatpush1.bf16.msra.mxu1 %v9015_v25 }
 0x5d3   :  { %4689 = vmatprep.subr.bf16.mxu1 %v9020_v36 }
 0x5d6   :  { %4690 = vmatpush1.bf16.msra.mxu1 %v9018_v26 }
 0x5d7   :  { %4691 = vmatprep.subr.bf16.mxu1 %v9023_v27 }
 0x5da   :  { %4692 = vmatpush1.bf16.msra.mxu1 %v9021_v29 }
 0x5db   :  { %4693 = vmatprep.subr.bf16.mxu1 %v9026_v48 }
 0x5de   :  { %4694 = vmatpush1.bf16.msra.mxu1 %v9024_v31 }
 0x5df   :  { %4695 = vmatprep.subr.bf16.mxu1 %v9029_v33 }
 0x5e2   :  { %4696 = vmatpush1.bf16.msra.mxu1 %v9027_v0 }
 0x5e3   :  { %4697 = vmatprep.subr.bf16.mxu1 %v9032_v34 }
 0x5e6   :  { %4698 = vmatpush1.bf16.msra.mxu1 %v9030_v35 }
 0x5e7   :  { %4699 = vmatprep.subr.bf16.mxu1 %v9035_v37 }
 0x5ea   :  { %4700 = vmatpush1.bf16.msra.mxu1 %v9033_v38 }
 0x5eb   :  { %7654 = vmatprep.subr.msk.bf16.mxu1 %vm4616_vm0, %v7650_v19 }
 0x5ee   :  { %4702 = vmatpush1.bf16.msra.mxu1 %v4624_v40 }
 0x5ef   :  { %4714 = vmatprep.subr.bf16.mxu1 %v9801_v58 }
 0x5f1   :  { %4706 = vmatmul.mubr.bf16.vlgmr.msra.gmra.mrb[40].mxu1 %v10517_v16 }
 0x5f2   :  { %4715 = vmatpush1.bf16.msra.mxu1 %v9038_v41  ;;  %7656 = vmatprep.mubr.msk.bf16.mxu1 %vm4065_vm1, %v10512_v14 }
 0x5f3   :  { %4716 = vmatprep.subr.bf16.mxu1 %v9801_v58 }
 0x5f6   :  { %4717 = vmatpush1.bf16.msra.mxu1 %v9039_v30 }
 0x5f7   :  { %4718 = vmatprep.subr.bf16.mxu1 %v9801_v58 }
 0x5fa   :  { %4719 = vmatpush1.bf16.msra.mxu1 %v9040_v42 }
 0x5fb   :  { %4720 = vmatprep.subr.bf16.mxu1 %v9801_v58 }
 0x5fe   :  { %4721 = vmatpush1.bf16.msra.mxu1 %v9041_v43 }
 0x5ff   :  { %4722 = vmatprep.subr.bf16.mxu1 %v9801_v58 }
 0x602   :  { %4723 = vmatpush1.bf16.msra.mxu1 %v9042_v44 }
 0x603   :  { %4724 = vmatprep.subr.bf16.mxu1 %v9801_v58 }
 0x606   :  { %4725 = vmatpush1.bf16.msra.mxu1 %v9043_v45 }
 0x607   :  { %4726 = vmatprep.subr.bf16.mxu1 %v9801_v58 }
 0x60a   :  { %4727 = vmatpush1.bf16.msra.mxu1 %v9044_v46 }
 0x60b   :  { %4728 = vmatprep.subr.bf16.mxu1 %v9801_v58 }
 0x60e   :  { %4729 = vmatpush1.bf16.msra.mxu1 %v9045_v47 }
 0x60f   :  { %4730 = vmatprep.subr.bf16.mxu1 %v9801_v58 }
 0x612   :  { %4731 = vmatpush1.bf16.msra.mxu1 %v9046_v49 }
 0x613   :  { %4732 = vmatprep.subr.bf16.mxu1 %v9801_v58 }
 0x616   :  { %4733 = vmatpush1.bf16.msra.mxu1 %v9047_v50 }
 0x617   :  { %4734 = vmatprep.subr.bf16.mxu1 %v9801_v58 }
 0x61a   :  { %4735 = vmatpush1.bf16.msra.mxu1 %v9048_v51 }
 0x61b   :  { %4736 = vmatprep.subr.bf16.mxu1 %v9801_v58 }
 0x61e   :  { %4737 = vmatpush1.bf16.msra.mxu1 %v9049_v52 }
 0x61f   :  { %4738 = vmatprep.subr.bf16.mxu1 %v9801_v58 }
 0x622   :  { %4739 = vmatpush1.bf16.msra.mxu1 %v9050_v53 }
 0x623   :  { %4740 = vmatprep.subr.bf16.mxu1 %v9801_v58 }
 0x626   :  { %4741 = vmatpush1.bf16.msra.mxu1 %v9051_v56 }
 0x627   :  { %4742 = vmatprep.subr.bf16.mxu1 %v9801_v58 }
 0x62a   :  { %4743 = vmatpush1.bf16.msra.mxu1 %v4630_v59 }
 0x62d   :  { %4747 = vmatmul.mubr.bf16.vlgmr.msra.gmra.mrb[44].mxu1 %v10517_v16 }
 0x62e   :  { %5427 = vmatprep.mubr.bf16.mxu1 %v9801_v58 }
 0x688   :  { %v10673_v1 = vpop.f32.mrb[36].mxu1 }
 0x689   :  { %v10675_v60 = vpop.f32.mrb[37].mxu1  ;;  %v4754_v35 = vrot.slane %v10673_v1, 4 }
 0x68a   :  { %v4760_v6 = vrot.slane %v10675_v60, 4  ;;  %v4670_v62 = vpop.f32.mrb[38].mxu1 }
 0x68b   :  { %v4671_v4 = vpop.f32.mrb[39].mxu1  ;;  %v4755_v37 = vadd.f32 %v4754_v35, %v10673_v1 }
 0x68c   :  { %v4761_v5 = vadd.f32 %v4760_v6, %v10675_v60 }
 0x68d   :  { %v4756_v63 = vrot.slane %v4755_v37, 2 }
 0x68e   :  { %v4762_v7 = vrot.slane %v4761_v5, 2 }
 0x68f   :  { %v4757_v38 = vadd.f32 %v4756_v63, %v4755_v37 }
 0x690   :  { %v4763_v8 = vadd.f32 %v4762_v7, %v4761_v5 }
 0x691   :  { %v4758_v40 = vrot.slane %v4757_v38, 1 }
 0x692   :  { %v4764_v9 = vrot.slane %v4763_v8, 1 }
 0x693   :  { %v4759_v43 = vadd.f32 %v4758_v40, %v4757_v38 }
 0x694   :  { %v4765_v10 = vadd.f32 %v4764_v9, %v4763_v8 }
 0x696   :  { %4788 = vrot.lane.b32.xlu0 %v4765_v10, %s9803_s7 }
 0x6c4   :  { %v10680_v13 = vpop.f32.mrb[40].mxu1 }
 0x6c5   :  { %v4766_v14 = vrot.slane %v10680_v13, 4  ;;  %v10683_v15 = vpop.f32.mrb[41].mxu1 }
 0x6c6   :  { %v4772_v16 = vrot.slane %v10683_v15, 4  ;;  %v4711_v55 = vpop.f32.mrb[42].mxu1 }
 0x6c7   :  { %v4767_v28 = vadd.f32 %v4766_v14, %v10680_v13  ;;  %v4712_v17 = vpop.f32.mrb[43].mxu1 }
 0x6c8   :  { %v4773_v32 = vadd.f32 %v4772_v16, %v10683_v15 }
 0x6c9   :  { %v4768_v11 = vrot.slane %v4767_v28, 2 }
 0x6ca   :  { %v4774_v18 = vrot.slane %v4773_v32, 2 }
 0x6cb   :  { %v4769_v20 = vadd.f32 %v4768_v11, %v4767_v28 }
 0x6cc   :  { %v4775_v61 = vadd.f32 %v4774_v18, %v4773_v32 }
 0x6cd   :  { %v4770_v21 = vrot.slane %v4769_v20, 1 }
 0x6ce   :  { %v4776_v22 = vrot.slane %v4775_v61, 1 }
 0x6cf   :  { %v4771_v12 = vadd.f32 %v4770_v21, %v4769_v20 }
 0x6d0   :  { %v4777_v23 = vadd.f32 %v4776_v22, %v4775_v61 }
 0x6d1   :  { %4799 = vrot.lane.b32.xlu1 %v4771_v12, %s9804_s3  ;;  %4790 = vrot.lane.b32.xlu0 %v4771_v12, %s9803_s7 }
 0x6d5   :  { %4810 = vrot.lane.b32.xlu0 %v4777_v23, %s9805_s30  ;;  %4801 = vrot.lane.b32.xlu1 %v4777_v23, %s9804_s3 }
 0x700   :  { %v10692_v24 = vpop.f32.mrb[44].mxu1 }
 0x701   :  { %v4779_v25 = vsel %vm4778_vm2, %v10692_v24, 0.0  ;;  %v4750_v36 = vpop.f32.mrb[45].mxu1 }
 0x702   :  { %v4780_v26 = vrot.slane %v4779_v25, 4  ;;  %v4751_v27 = vpop.f32.mrb[46].mxu1 }
 0x703   :  { %v4752_v29 = vpop.f32.mrb[47].mxu1 }
 0x704   :  { %v4781_v48 = vadd.f32 %v4780_v26, %v4779_v25 }
 0x706   :  { %v4782_v31 = vrot.slane %v4781_v48, 2 }
 0x708   :  { %v4783_v33 = vadd.f32 %v4782_v31, %v4781_v48  ;;  %v4789_v19 = vpop.permute.xlu0 %4788 }
 0x70a   :  { %v4784_v0 = vrot.slane %v4783_v33, 1 }
 0x70c   :  { %v4785_v34 = vadd.f32 %v4784_v0, %v4783_v33 }
 0x70e   :  { %4812 = vrot.lane.b32.xlu1 %v4785_v34, %s9805_s30 }
 0x743   :  { %v4800_v39 = vpop.permute.xlu1 %4799  ;;  %v4791_v41 = vpop.permute.xlu0 %4790 }
 0x744   :  { %v4793_v42 = vsel %vm4792_vm3, %v4789_v19, %v4791_v41  ;;  %v4797_v44 = vadd.f32 %v4791_v41, %v4765_v10 }
 0x745   :  { %v4796_v46 = vadd.f32 %v4793_v42, %v4759_v43 }
 0x747   :  { %v4802_v30 = vpop.permute.xlu1 %4801  ;;  %v4811_v49 = vpop.permute.xlu0 %4810 }
 0x748   :  { %v4804_v45 = vsel %vm4803_vm4, %v4800_v39, %v4802_v30  ;;  %v4808_v47 = vadd.f32 %v4802_v30, %v4797_v44 }
 0x749   :  { %v4807_v50 = vadd.f32 %v4804_v45, %v4796_v46 }
 0x780   :  { %v4813_v51 = vpop.permute.xlu1 %4812 }
 0x781   :  { %v4814_v52 = vsel %vm4065_vm1, %v4811_v49, %v4813_v51  ;;  %v4818_v53 = vadd.f32 %v4813_v51, %v4808_v47  ;;  %v4235_v47 = vld [vmem:[#allocation12] sm:$0x3] }
 0x782   :  { %v4817_v56 = vadd.f32 %v4814_v52, %v4807_v50  ;;  %v10750_v49 = vrot.slane %v4235_v47, %v10357_v2  ;;  %v10753_v50 = vrot.slane %v4235_v47, %v10359_v3 }
 0x783   :  { %v4820_v57 = vmul.f32 0.03125, %v4818_v53 }
 0x784   :  { %v4819_v59 = vmul.f32 0.03125, %v4817_v56 }
 0x785   :  { %4825 = vrot.lane.b32.xlu1 %v4820_v57, %s9796_s10 }
 0x786   :  { %v4853_v6 = vrot.slane %v4819_v59, %v10357_v2  ;;  %4823 = vrot.lane.b32.xlu0 %v4819_v59, %s9796_s10 }
 0x788   :  { %v10706_v62 = vsub.f32 %v10673_v1, %v4853_v6 }
 0x789   :  { %4833 = vrot.lane.b32.xlu1 %v4820_v57, %s9806_s0 }
 0x78a   :  { %4831 = vrot.lane.b32.xlu0 %v4819_v59, %s9806_s0  ;;  %v4875_v51 = vmul.f32 %v10706_v62, %v10706_v62 }
 0x78c   :  { %v4880_v52 = vrot.slane %v4875_v51, 4 }
 0x78d   :  { %4841 = vrot.lane.b32.xlu1 %v4820_v57, %s9807_s14 }
 0x78e   :  { %4839 = vrot.lane.b32.xlu0 %v4819_v59, %s9807_s14  ;;  %v4881_v53 = vadd.f32 %v4880_v52, %v4875_v51 }
 0x790   :  { %v4882_v56 = vrot.slane %v4881_v53, 2 }
 0x792   :  { %v4883_v59 = vadd.f32 %v4882_v56, %v4881_v53 }
 0x7f7   :  { %v4826_v4 = vpop.permute.xlu1 %4825 }
 0x7f8   :  { %v4824_v5 = vpop.permute.xlu0 %4823 }
 0x7f9   :  { %v4847_v7 = vsel %vm4827_vm5, %v4820_v57, %v4824_v5  ;;  %v4828_v9 = vsel %vm4827_vm5, %v4824_v5, %v4826_v4  ;;  %v4884_v4 = vrot.slane %v4883_v59, 1 }
 0x7fa   :  { %v4857_v8 = vrot.slane %v4847_v7, %v10357_v2 }
 0x7fb   :  { %v4834_v1 = vpop.permute.xlu1 %4833 }
 0x7fc   :  { %v10716_v10 = vsub.f32 %v10675_v60, %v4857_v8  ;;  %v4832_v14 = vpop.permute.xlu0 %4831  ;;  %v4885_v8 = vadd.f32 %v4884_v4, %v4883_v59 }
 0x7fd   :  { %v4848_v16 = vsel %vm4835_vm6, %v4828_v9, %v4832_v14  ;;  %v4836_v11 = vsel %vm4835_vm6, %v4832_v14, %v4834_v1 }
 0x7fe   :  { %v4876_v55 = vmul.f32 %v10716_v10, %v10716_v10  ;;  %v4861_v28 = vrot.slane %v4848_v16, %v10357_v2 }
 0x7ff   :  { %v4842_v17 = vpop.permute.xlu1 %4841 }
 0x800   :  { %v4886_v32 = vrot.slane %v4876_v55, 4  ;;  %v10724_v18 = vsub.f32 %v10680_v13, %v4861_v28  ;;  %v4840_v20 = vpop.permute.xlu0 %4839 }
 0x801   :  { %v4844_v60 = vsel %vm4843_vm7, %v4840_v20, %v4842_v17  ;;  %v4849_v61 = vsel %vm4843_vm7, %v4836_v11, %v4840_v20 }
 0x802   :  { %v4877_v21 = vmul.f32 %v10724_v18, %v10724_v18  ;;  %v4865_v12 = vrot.slane %v4849_v61, %v10357_v2  ;;  %v4869_v22 = vrot.slane %v4844_v60, %v10357_v2  ;;  %v4887_v23 = vadd.f32 %v4886_v32, %v4876_v55 }
 0x804   :  { %v4892_v25 = vrot.slane %v4877_v21, 4  ;;  %v10733_v36 = vsub.f32 %v10683_v15, %v4865_v12  ;;  %v10736_v13 = vsub.f32 %v10692_v24, %v4869_v22  ;;  %v4888_v26 = vrot.slane %v4887_v23, 2 }
 0x806   :  { %v4878_v27 = vmul.f32 %v10733_v36, %v10733_v36  ;;  %v4879_v29 = vmul.f32 %v10736_v13, %v10736_v13  ;;  %v4889_v48 = vadd.f32 %v4888_v26, %v4887_v23  ;;  %v4893_v31 = vadd.f32 %v4892_v25, %v4877_v21 }
 0x808   :  { %v4898_v33 = vrot.slane %v4878_v27, 4  ;;  %v4904_v0 = vsel %vm4778_vm2, %v4879_v29, 0.0  ;;  %v4890_v34 = vrot.slane %v4889_v48, 1  ;;  %v4894_v35 = vrot.slane %v4893_v31, 2  ;;  %v4234_v29 = vld [vmem:[#allocation10] sm:$0x3] }
 0x809   :  { %v4905_v37 = vrot.slane %v4904_v0, 4 }
 0x80a   :  { %v4891_v15 = vadd.f32 %v4890_v34, %v4889_v48  ;;  %v4895_v63 = vadd.f32 %v4894_v35, %v4893_v31  ;;  %v4899_v38 = vadd.f32 %v4898_v33, %v4878_v27  ;;  %v9055_v34 = vld [vmem:[#allocation13 + $0x10] sm:$0xff]   ;;  %v9056_v35 = vld [vmem:[#allocation13 + $0x18] sm:$0xff]  }
 0x80b   :  { %v4906_v24 = vadd.f32 %v4905_v37, %v4904_v0  ;;  %v9057_v37 = vld [vmem:[#allocation13 + $0x20] sm:$0xff]  }
 0x80c   :  { %4913 = vrot.lane.b32.xlu0 %v4891_v15, %s9803_s7  ;;  %v4896_v19 = vrot.slane %v4895_v63, 1  ;;  %v4900_v39 = vrot.slane %v4899_v38, 2 }
 0x80d   :  { %v4907_v40 = vrot.slane %v4906_v24, 2 }
 0x80e   :  { %v4897_v41 = vadd.f32 %v4896_v19, %v4895_v63  ;;  %v4901_v30 = vadd.f32 %v4900_v39, %v4899_v38  ;;  %v9059_v63 = vld [vmem:[#allocation13 + $0x30] sm:$0xff]   ;;  %v9060_v38 = vld [vmem:[#allocation13 + $0x38] sm:$0xff]  }
 0x80f   :  { %v4908_v42 = vadd.f32 %v4907_v40, %v4906_v24 }
 0x810   :  { %4923 = vrot.lane.b32.xlu0 %v4897_v41, %s9804_s3  ;;  %4915 = vrot.lane.b32.xlu1 %v4897_v41, %s9803_s7  ;;  %v4902_v43 = vrot.slane %v4901_v30, 1 }
 0x811   :  { %v4909_v45 = vrot.slane %v4908_v42, 1 }
 0x812   :  { %v4903_v44 = vadd.f32 %v4902_v43, %v4901_v30 }
 0x813   :  { %v4910_v46 = vadd.f32 %v4909_v45, %v4908_v42 }
 0x814   :  { %4933 = vrot.lane.b32.xlu0 %v4903_v44, %s9805_s30  ;;  %4925 = vrot.lane.b32.xlu1 %v4903_v44, %s9804_s3  ;;  %v9061_v44 = vld [vmem:[#allocation13 + $0x40] ss:$0 sps:$4 sm:$0xff]  }
 0x815   :  { %v5198_v53 = vsel %vm4616_vm0, %v9061_v44, 0  ;;  %v9064_v44 = vld [vmem:[#allocation18 + $0x4] ss:$8 sps:$4 sm:$0xff]  }
 0x816   :  { %5395 = vmatprep.subr.bf16.mxu1 %v9064_v44 }
 0x818   :  { %4935 = vrot.lane.b32.xlu1 %v4910_v46, %s9805_s30  ;;  %5015 = vrot.lane.b32.xlu0 %v10753_v50, %s9796_s10 }
 0x81c   :  { %5013 = vrot.lane.b32.xlu1 %v10750_v49, %s9796_s10 }
 0x820   :  { %5020 = vrot.lane.b32.xlu1 %v10750_v49, %s9806_s0 }
 0x87e   :  { %v4914_v57 = vpop.permute.xlu0 %4913 }
 0x882   :  { %v4916_v6 = vpop.permute.xlu1 %4915  ;;  %v4924_v5 = vpop.permute.xlu0 %4923 }
 0x883   :  { %v4917_v7 = vsel %vm4792_vm3, %v4914_v57, %v4916_v6  ;;  %v4921_v9 = vadd.f32 %v4916_v6, %v4891_v15  ;;  %v9058_v15 = vld [vmem:[#allocation13 + $0x28] sm:$0xff]  }
 0x884   :  { %v4920_v16 = vadd.f32 %v4917_v7, %v4885_v8 }
 0x886   :  { %v4926_v1 = vpop.permute.xlu1 %4925  ;;  %v4934_v17 = vpop.permute.xlu0 %4933 }
 0x887   :  { %v4927_v14 = vsel %vm4803_vm4, %v4924_v5, %v4926_v1  ;;  %v4931_v55 = vadd.f32 %v4926_v1, %v4921_v9 }
 0x888   :  { %v4930_v28 = vadd.f32 %v4927_v14, %v4920_v16 }
 0x88a   :  { %v4936_v32 = vpop.permute.xlu1 %4935  ;;  %v5016_v39 = vpop.permute.xlu0 %5015 }
 0x88b   :  { %v4937_v11 = vsel %vm4065_vm1, %v4934_v17, %v4936_v32  ;;  %v4941_v20 = vadd.f32 %v4936_v32, %v4931_v55 }
 0x88c   :  { %v4940_v60 = vadd.f32 %v4937_v11, %v4930_v28 }
 0x88d   :  { %v4943_v61 = vmul.f32 0.03125, %v4941_v20 }
 0x88e   :  { %v4942_v21 = vmul.f32 0.03125, %v4940_v60  ;;  %v5014_v24 = vpop.permute.xlu1 %5013 }
 0x88f   :  { %v4945_v12 = vadd.f32 1e-05, %v4943_v61  ;;  %v5017_v42 = vsel %vm4827_vm5, %v5014_v24, %v5016_v39  ;;  %v5034_v45 = vsel %vm4827_vm5, %v10753_v50, %v5014_v24 }
 0x890   :  { %v4944_v22 = vadd.f32 1e-05, %v4942_v21  ;;  %v5069_v59 = vrot.slane %v5034_v45, %v10357_v2  ;;  %v9062_v45 = vld [vmem:[#allocation18] ss:$8 sps:$4 sm:$0xff]  }
 0x891   :  { %9095 = vrsqrt.f32 %v4945_v12  ;;  %5396 = vmatpush1.bf16.msra.mxu1 %v9062_v45 }
 0x892   :  { %9097 = vrsqrt.f32 %v4944_v22  ;;  %v5021_v19 = vpop.permute.xlu1 %5020 }
 0x893   :  { %v5035_v56 = vsel %vm4835_vm6, %v5017_v42, %v5021_v19 }
 0x894   :  { %v5073_v4 = vrot.slane %v5035_v56, %v10357_v2  ;;  %v9071_v56 = vld [vmem:[#allocation18 + $0x30] ss:$8 sps:$4 sm:$0xff]  }
 0x89b   :  { %v9096_v23 = vpop.eup %9095 }
 0x89c   :  { %v9098_v25 = vpop.eup %9097 }
 0x89d   :  { %v4950_v26 = vcombine.low %v9098_v25, %v9096_v23 }
 0x89f   :  { %v4957_v27 = vrot.slane %v4950_v26, %v10352_v54 }
 0x8a1   :  { %v4964_v48 = vrot.slane %v4957_v27, %v10352_v54  ;;  %v9053_v54 = vld [vmem:[#allocation13] sm:$0xff]  }
 0x8a2   :  { %5201 = vmatpush1.bf16.msra.mxu0 %v9053_v54 }
 0x8a3   :  { %v4966_v31 = vmul.f32 %v4964_v48, %v4234_v29  ;;  %5202 = vmatprep.subr.bf16.mxu0 %v9801_v58 }
 0x8a5   :  { %v4975_v33 = vrot.slane %v4966_v31, %v10359_v3  ;;  %v10770_v0 = vrot.slane %v4966_v31, %v10357_v2  ;;  %v9054_v3 = vld [vmem:[#allocation13 + $0x8] sm:$0xff]  }
 0x8a6   :  { %5203 = vmatpush1.bf16.msra.mxu0 %v9054_v3 }
 0x8a7   :  { %4980 = vrot.lane.b32.xlu1 %v4975_v33, %s9796_s10  ;;  %4978 = vrot.lane.b32.xlu0 %v10770_v0, %s9796_s10  ;;  %v5040_v54 = vrot.slane %v10770_v0, %v10357_v2  ;;  %s9808_s10 = smov 32  }
 0x8a8   :  { %5204 = vmatprep.subr.bf16.mxu0 %v9801_v58 }
 0x8aa   :  { %5205 = vmatpush1.bf16.msra.mxu0 %v9055_v34 }
 0x8ab   :  { %5022 = vrot.lane.b32.xlu1 %v10753_v50, %s9806_s0  ;;  %4985 = vrot.lane.b32.xlu0 %v10770_v0, %s9806_s0 }
 0x8ac   :  { %5206 = vmatprep.subr.bf16.mxu0 %v9801_v58 }
 0x8ae   :  { %5207 = vmatpush1.bf16.msra.mxu0 %v9056_v35 }
 0x8af   :  { %4992 = vrot.lane.b32.xlu1 %v10770_v0, %s9807_s14  ;;  %4987 = vrot.lane.b32.xlu0 %v4975_v33, %s9806_s0 }
 0x8b0   :  { %5208 = vmatprep.subr.bf16.mxu0 %v9801_v58 }
 0x8b2   :  { %5209 = vmatpush1.bf16.msra.mxu0 %v9057_v37 }
 0x8b3   :  { %4994 = vrot.lane.b32.xlu0 %v4975_v33, %s9807_s14  ;;  %5029 = vrot.lane.b32.xlu1 %v10753_v50, %s9807_s14 }
 0x8b4   :  { %5210 = vmatprep.subr.bf16.mxu0 %v9801_v58 }
 0x8b6   :  { %5211 = vmatpush1.bf16.msra.mxu0 %v9058_v15 }
 0x8b7   :  { %5027 = vrot.lane.b32.xlu0 %v10750_v49, %s9807_s14  ;;  %5212 = vmatprep.subr.bf16.mxu0 %v9801_v58 }
 0x8ba   :  { %5213 = vmatpush1.bf16.msra.mxu0 %v9059_v63 }
 0x8bb   :  { %5214 = vmatprep.subr.bf16.mxu0 %v9801_v58 }
 0x8be   :  { %5215 = vmatpush1.bf16.msra.mxu0 %v9060_v38 }
 0x8bf   :  { %5216 = vmatprep.subr.bf16.mxu0 %v9801_v58 }
 0x8c2   :  { %5217 = vmatpush1.bf16.msra.mxu0 %v5198_v53  ;;  %v9073_v53 = vld [vmem:[#allocation18 + $0x34] ss:$8 sps:$4 sm:$0xff]  }
 0x919   :  { %v4981_v40 = vpop.permute.xlu1 %4980  ;;  %v4979_v41 = vpop.permute.xlu0 %4978 }
 0x91a   :  { %v4999_v30 = vsel %vm4827_vm5, %v4975_v33, %v4979_v41  ;;  %v4982_v46 = vsel %vm4827_vm5, %v4979_v41, %v4981_v40 }
 0x91b   :  { %v5044_v43 = vrot.slane %v4999_v30, %v10357_v2 }
 0x91d   :  { %v5058_v47 = vmul.f32 %v5044_v43, %v10716_v10  ;;  %v5023_v51 = vpop.permute.xlu1 %5022  ;;  %v4986_v52 = vpop.permute.xlu0 %4985 }
 0x91e   :  { %v5000_v57 = vsel %vm4835_vm6, %v4982_v46, %v4986_v52  ;;  %v9067_v46 = vld [vmem:[#allocation18 + $0x14] ss:$8 sps:$4 sm:$0xff]  }
 0x91f   :  { %v5048_v6 = vrot.slane %v5000_v57, %v10357_v2  ;;  %v5083_v10 = vadd.f32 %v5069_v59, %v5058_v47  ;;  %v9065_v47 = vld [vmem:[#allocation18 + $0x10] ss:$8 sps:$4 sm:$0xff]   ;;  %5397 = vmatprep.subr.bf16.mxu1 %v9067_v46  ;;  %v9076_v57 = vld [vmem:[#allocation18 + $0x44] ss:$8 sps:$4 sm:$0xff]   ;;  %v9074_v59 = vld [vmem:[#allocation18 + $0x40] ss:$8 sps:$4 sm:$0xff]  }
 0x920   :  { %5398 = vmatpush1.bf16.msra.mxu1 %v9065_v47 }
 0x921   :  { %v5059_v50 = vmul.f32 %v5048_v6, %v10724_v18  ;;  %v4993_v5 = vpop.permute.xlu1 %4992  ;;  %v4988_v7 = vpop.permute.xlu0 %4987  ;;  %v5088_v16 = vmax.f32 %v5083_v10, 0.0  ;;  %v5024_v18 = vsel %vm4835_vm6, %v5021_v19, %v5023_v51  ;;  %v9070_v51 = vld [vmem:[#allocation18 + $0x24] ss:$8 sps:$4 sm:$0xff]   ;;  %v9079_v6 = vld [vmem:[#allocation18 + $0x54] ss:$8 sps:$4 sm:$0xff]  }
 0x922   :  { %v4989_v8 = vsel %vm4835_vm6, %v4986_v52, %v4988_v7  ;;  %v9068_v52 = vld [vmem:[#allocation18 + $0x20] ss:$8 sps:$4 sm:$0xff]   ;;  %5399 = vmatprep.subr.bf16.mxu1 %v9070_v51 }
 0x923   :  { %v5084_v1 = vadd.f32 %v5073_v4, %v5059_v50  ;;  %v5001_v9 = vsel %vm4843_vm7, %v4989_v8, %v4993_v5  ;;  %v9077_v4 = vld [vmem:[#allocation18 + $0x50] ss:$8 sps:$4 sm:$0xff]  }
 0x924   :  { %v5052_v17 = vrot.slane %v5001_v9, %v10357_v2  ;;  %5400 = vmatpush1.bf16.msra.mxu1 %v9068_v52 }
 0x925   :  { %v4995_v14 = vpop.permute.xlu0 %4994  ;;  %v5089_v55 = vmax.f32 %v5084_v1, 0.0  ;;  %v5030_v11 = vpop.permute.xlu1 %5029  ;;  %5401 = vmatprep.subr.bf16.mxu1 %v9073_v53 }
 0x926   :  { %v4996_v28 = vsel %vm4843_vm7, %v4993_v5, %v4995_v14  ;;  %v5060_v22 = vmul.f32 %v5052_v17, %v10733_v36  ;;  %v5065_v36 = vrot.slane %v10750_v49, %v10357_v2 }
 0x927   :  { %v5056_v32 = vrot.slane %v4996_v28, %v10357_v2  ;;  %v8175_v20 = vpack.i.bf16 %v5089_v55, %v5088_v16 }
 0x928   :  { %5402 = vmatpush1.bf16.msra.mxu1 %v9071_v56 }
 0x929   :  { %8176 = vrot.lane.b32.xlu0 %v8175_v20, %s9803_s7  ;;  %v5028_v60 = vpop.permute.xlu0 %5027  ;;  %v5061_v12 = vmul.f32 %v5056_v32, %v10736_v13  ;;  %v5057_v13 = vmul.f32 %v5040_v54, %v10706_v62  ;;  %5403 = vmatprep.subr.bf16.mxu1 %v9076_v57 }
 0x92a   :  { %v5031_v61 = vsel %vm4843_vm7, %v5028_v60, %v5030_v11  ;;  %v5036_v21 = vsel %vm4843_vm7, %v5024_v18, %v5028_v60 }
 0x92b   :  { %v5077_v23 = vrot.slane %v5036_v21, %v10357_v2  ;;  %v5081_v25 = vrot.slane %v5031_v61, %v10357_v2  ;;  %v5082_v3 = vadd.f32 %v5065_v36, %v5057_v13 }
 0x92c   :  { %5404 = vmatpush1.bf16.msra.mxu1 %v9074_v59 }
 0x92d   :  { %v5085_v26 = vadd.f32 %v5077_v23, %v5060_v22  ;;  %v5086_v27 = vadd.f32 %v5081_v25, %v5061_v12  ;;  %v5087_v15 = vmax.f32 %v5082_v3, 0.0  ;;  %5405 = vmatprep.subr.bf16.mxu1 %v9079_v6 }
 0x92f   :  { %v5090_v29 = vmax.f32 %v5085_v26, 0.0  ;;  %v5091_v48 = vmax.f32 %v5086_v27, 0.0 }
 0x930   :  { %5406 = vmatpush1.bf16.msra.mxu1 %v9077_v4 }
 0x931   :  { %v8180_v31 = vpack.i.bf16 %v5090_v29, %v5089_v55  ;;  %v8185_v33 = vpack.i.bf16 %v5091_v48, %v5090_v29 }
 0x933   :  { %8181 = vrot.lane.b32.xlu1 %v8180_v31, %s9804_s3  ;;  %8186 = vrot.lane.b32.xlu0 %v8185_v33, %s9805_s30 }
 0x99b   :  { %v8177_v34 = vpop.permute.xlu0 %8176 }
 0x99c   :  { %v8179_v35 = vunpack.i.h.bf16 %v8177_v34  ;;  %v8178_v37 = vunpack.i.l.bf16 %v8177_v34 }
 0x99e   :  { %v5118_v63 = vpack.c.bf16 %v8179_v35, %v5088_v16  ;;  %v5098_v38 = vsel %vm4792_vm3, %v8178_v37, %v8179_v35 }
 0x99f   :  { %v5117_v24 = vpack.c.bf16 %v5098_v38, %v5087_v15 }
 0x9a0   :  { %7666 = vmatprep.mubr.msk.bf16.mxu0 %vm4827_vm5, %v5118_v63 }
 0x9a1   :  { %5233 = vmatmul.mubr.bf16.vlgmr.msra.gmra.mrb[4].mxu0 %v5117_v24 }
 0x9a5   :  { %v8182_v19 = vpop.permute.xlu1 %8181  ;;  %v8187_v39 = vpop.permute.xlu0 %8186 }
 0x9a6   :  { %v8184_v0 = vunpack.i.h.bf16 %v8182_v19  ;;  %v8183_v40 = vunpack.i.l.bf16 %v8182_v19  ;;  %v8189_v41 = vunpack.i.h.bf16 %v8187_v39  ;;  %v8188_v49 = vunpack.i.l.bf16 %v8187_v39 }
 0x9a8   :  { %v5120_v30 = vpack.c.bf16 %v8189_v41, %v8184_v0  ;;  %v5106_v62 = vsel %vm4803_vm4, %v8183_v40, %v8184_v0  ;;  %v5114_v42 = vsel %vm4065_vm1, %v8188_v49, %v8189_v41  ;;  %v5138_v49 = vld [vmem:[#allocation15] sm:$0x1] }
 0x9a9   :  { %v5119_v43 = vpack.c.bf16 %v5114_v42, %v5106_v62 }
 0x9aa   :  { %7667 = vmatprep.mubr.msk.bf16.mxu0 %vm4827_vm5, %v5120_v30 }
 0x9ab   :  { %5241 = vmatmul.mubr.bf16.gmra.mrb[8].mxu0 %v5119_v43  ;;  %v7668_v43 = vld [vmem:[#allocation16] ss:$0 sm:$0xff] }
 0xa74   :  { %v5234_v50 = vpop.f32.mrb[4].mxu0 }
 0xa75   :  { %v5236_v5 = vpop.f32.mrb[5].mxu0  ;;  %v5250_v10 = vsel %vm5249_vm8, %v5234_v50, 0.0 }
 0xa76   :  { %v5237_v7 = vpop.f32.mrb[6].mxu0 }
 0xa77   :  { %v5251_v8 = vsel %vm5249_vm8, %v5237_v7, 0.0  ;;  %v5239_v1 = vpop.f32.mrb[7].mxu0 }
 0xa78   :  { %v5252_v9 = vadd.f32 %v5251_v8, %v5250_v10 }
 0xa7e   :  { %v5242_v14 = vpop.f32.mrb[8].mxu0 }
 0xa7f   :  { %v5253_v16 = vsel %vm5249_vm8, %v5242_v14, 0.0  ;;  %v5244_v55 = vpop.f32.mrb[9].mxu0 }
 0xa80   :  { %v5254_v28 = vadd.f32 %v5253_v16, %v5252_v9  ;;  %v5245_v17 = vpop.f32.mrb[10].mxu0 }
 0xa81   :  { %v5255_v32 = vsel %vm5249_vm8, %v5245_v17, 0.0  ;;  %v5247_v11 = vpop.f32.mrb[11].mxu0 }
 0xa82   :  { %v5256_v20 = vadd.f32 %v5255_v32, %v5254_v28 }
 0xa84   :  { %v5257_v18 = vrot.slane %v5256_v20, 4 }
 0xa86   :  { %v5258_v60 = vadd.f32 %v5257_v18, %v5256_v20 }
 0xa88   :  { %v5259_v61 = vrot.slane %v5258_v60, 2 }
 0xa8a   :  { %v5260_v21 = vadd.f32 %v5259_v61, %v5258_v60 }
 0xa8c   :  { %v5261_v12 = vrot.slane %v5260_v21, 1 }
 0xa8e   :  { %v5262_v22 = vadd.f32 %v5261_v12, %v5260_v21 }
 0xa90   :  { %v5263_v23 = vmul.f32 0.03125, %v5262_v22 }
 0xa92   :  { %v5264_v25 = vsub.f32 %v5234_v50, %v5263_v23  ;;  %v5265_v26 = vsub.f32 %v5237_v7, %v5263_v23  ;;  %v5266_v27 = vsub.f32 %v5242_v14, %v5263_v23  ;;  %v5267_v29 = vsub.f32 %v5245_v17, %v5263_v23 }
 0xa94   :  { %v5268_v48 = vmul.f32 %v5264_v25, %v5264_v25  ;;  %v5269_v31 = vmul.f32 %v5265_v26, %v5265_v26  ;;  %v5270_v33 = vmul.f32 %v5266_v27, %v5266_v27  ;;  %v5271_v54 = vmul.f32 %v5267_v29, %v5267_v29 }
 0xa96   :  { %v5272_v36 = vsel %vm5249_vm8, %v5268_v48, 0.0  ;;  %v5273_v13 = vsel %vm5249_vm8, %v5269_v31, 0.0  ;;  %v5275_v34 = vsel %vm5249_vm8, %v5270_v33, 0.0  ;;  %v5277_v37 = vsel %vm5249_vm8, %v5271_v54, 0.0 }
 0xa97   :  { %v5274_v3 = vadd.f32 %v5273_v13, %v5272_v36 }
 0xa99   :  { %v5276_v35 = vadd.f32 %v5275_v34, %v5274_v3 }
 0xa9b   :  { %v5278_v15 = vadd.f32 %v5277_v37, %v5276_v35 }
 0xa9d   :  { %v5279_v63 = vrot.slane %v5278_v15, 4 }
 0xa9f   :  { %v5280_v38 = vadd.f32 %v5279_v63, %v5278_v15 }
 0xaa1   :  { %v5281_v24 = vrot.slane %v5280_v38, 2 }
 0xaa3   :  { %v5282_v19 = vadd.f32 %v5281_v24, %v5280_v38 }
 0xaa5   :  { %v5283_v39 = vrot.slane %v5282_v19, 1 }
 0xaa7   :  { %v5284_v0 = vadd.f32 %v5283_v39, %v5282_v19 }
 0xaa9   :  { %v5285_v40 = vmul.f32 0.03125, %v5284_v0 }
 0xaab   :  { %v5286_v41 = vadd.f32 1e-05, %v5285_v40 }
 0xaad   :  { %9099 = vrsqrt.f32 %v5286_v41 }
 0xab7   :  { %v9100_v30 = vpop.eup %9099 }
 0xab8   :  { %v5288_v62 = vmul.f32 %v9100_v30, %v5138_v49 }
 0xaba   :  { %v5293_v42 = vrot.slane %v5288_v62, %v10357_v2 }
 0xabc   :  { %v5295_v44 = vmul.f32 %v5293_v42, %v5264_v25  ;;  %v5296_v45 = vmul.f32 %v5293_v42, %v5265_v26  ;;  %v5298_v46 = vmul.f32 %v5293_v42, %v5267_v29  ;;  %v5297_v47 = vmul.f32 %v5293_v42, %v5266_v27 }
 0xabe   :  { %v5305_v51 = vadd.f32 %v7668_v43, %v5295_v44  ;;  %v5306_v52 = vadd.f32 %v7668_v43, %v5296_v45  ;;  %v5308_v53 = vadd.f32 %v7668_v43, %v5298_v46  ;;  %v5307_v56 = vadd.f32 %v7668_v43, %v5297_v47 }
 0xac0   :  { %v5312_v57 = vmax.f32 %v5308_v53, 0.0  ;;  %v5309_v59 = vmax.f32 %v5305_v51, 0.0  ;;  %v5310_v6 = vmax.f32 %v5306_v52, 0.0  ;;  %v5311_v4 = vmax.f32 %v5307_v56, 0.0 }
 0xac2   :  { %v5313_v50 = vpack.c.bf16 %v5310_v6, %v5309_v59  ;;  %v5314_v5 = vpack.c.bf16 %v5312_v57, %v5311_v4 }
 0xac4   :  { %7681 = vmatmul.mubr.msk.bf16.vlgmr.msra.gmra.mrb[48].mxu1 %vm5249_vm8, %v5313_v50 }
 0xac5   :  { %5437 = vmatprep.mubr.bf16.mxu1 %v9801_v58 }
 0xacc   :  { %7682 = vmatmul.mubr.msk.bf16.gmra.mrb[52].mxu1 %vm5249_vm8, %v5314_v5 }
 0xb97   :  { %v5429_v7 = vpop.f32.mrb[48].mxu1 }
 0xb98   :  { %v10846_v10 = vpop.f32.mrb[49].mxu1 }
 0xb99   :  { %v5433_v8 = vpop.f32.mrb[50].mxu1  ;;  %v5458_v14 = vsel %vm5457_vm9, %v10846_v10, 0.0 }
 0xb9a   :  { %v5448_v1 = vadd.f32 %v5433_v8, %v5429_v7  ;;  %v5435_v9 = vpop.f32.mrb[51].mxu1 }
 0xb9b   :  { %v5459_v16 = vsel %vm5457_vm9, %v5435_v9, 0.0 }
 0xb9c   :  { %v5460_v55 = vadd.f32 %v5459_v16, %v5458_v14 }
 0xb9f   :  { %v5439_v28 = vpop.f32.mrb[52].mxu1 }
 0xba0   :  { %v5449_v17 = vadd.f32 %v5448_v1, %v5439_v28  ;;  %v5441_v32 = vpop.f32.mrb[53].mxu1 }
 0xba1   :  { %v5461_v58 = vsel %vm5457_vm9, %v5441_v32, 0.0  ;;  %v5443_v11 = vpop.f32.mrb[54].mxu1 }
 0xba2   :  { %v5462_v20 = vadd.f32 %v5461_v58, %v5460_v55  ;;  %v5450_v18 = vadd.f32 %v5449_v17, %v5443_v11  ;;  %v5445_v60 = vpop.f32.mrb[55].mxu1 }
 0xba3   :  { %v5463_v61 = vsel %vm5457_vm9, %v5445_v60, 0.0 }
 0xba4   :  { %v5451_v21 = vrot.slane %v5450_v18, 4  ;;  %v5464_v12 = vadd.f32 %v5463_v61, %v5462_v20 }
 0xba6   :  { %v5452_v22 = vadd.f32 %v5451_v21, %v5450_v18  ;;  %v5465_v23 = vrot.slane %v5464_v12, 4 }
 0xba8   :  { %v5453_v25 = vrot.slane %v5452_v22, 2  ;;  %v5466_v26 = vadd.f32 %v5465_v23, %v5464_v12 }
 0xbaa   :  { %v5454_v27 = vadd.f32 %v5453_v25, %v5452_v22  ;;  %v5467_v29 = vrot.slane %v5466_v26, 2 }
 0xbac   :  { %v5455_v48 = vrot.slane %v5454_v27, 1  ;;  %v5468_v31 = vadd.f32 %v5467_v29, %v5466_v26 }
 0xbae   :  { %v5456_v33 = vadd.f32 %v5455_v48, %v5454_v27  ;;  %v5469_v54 = vrot.slane %v5468_v31, 1 }
 0xbb0   :  { %5477 = vrot.lane.b32.xlu0 %v5456_v33, %s9808_s10  ;;  %5472 = vrot.lane.b32.xlu1 %v5456_v33, %s9809_s15  ;;  %v5470_v36 = vadd.f32 %v5469_v54, %v5468_v31 }
 0xbb4   :  { %5484 = vrot.lane.b32.xlu0 %v5470_v36, %s9804_s3  ;;  %5479 = vrot.lane.b32.xlu1 %v5470_v36, %s9808_s10 }
 0xc22   :  { %v5473_v13 = vpop.permute.xlu1 %5472  ;;  %v5478_v3 = vpop.permute.xlu0 %5477 }
 0xc23   :  { %v5475_v34 = vadd.f32 %v5473_v13, %v5456_v33 }
 0xc26   :  { %v5480_v35 = vpop.permute.xlu1 %5479  ;;  %v5485_v63 = vpop.permute.xlu0 %5484 }
 0xc27   :  { %v5481_v37 = vsel %vm4778_vm2, %v5478_v3, %v5480_v35  ;;  %v9081_v35 = vld [vmem:[#allocation22 + $0x8] sm:$0xff]  }
 0xc28   :  { %v5483_v15 = vadd.f32 %v5481_v37, %v5475_v34  ;;  %v9080_v34 = vld [vmem:[#allocation22] sm:$0xff]   ;;  %v5327_v37 = vld [vmem:[#allocation19] sm:$0x1] }
 0xc29   :  { %8014 = vmatprep.subr.bf16.mxu0 %v9080_v34 }
 0xc2a   :  { %v5487_v38 = vadd.f32 %v5485_v63, %v5483_v15  ;;  %8015 = vmatpush3.bf16.msra.mxu0 %v9080_v34 }
 0xc2b   :  { %8016 = vmatprep.subr.bf16.mxu0 %v9081_v35 }
 0xc2c   :  { %v5488_v24 = vmul.f32 0.0078125, %v5487_v38  ;;  %v9082_v38 = vld [vmem:[#allocation22 + $0x10] sm:$0xff]  }
 0xc2e   :  { %5493 = vrot.lane.b32.xlu0 %v5488_v24, %s9810_s19  ;;  %5490 = vrot.lane.b32.xlu1 %v5488_v24, %s9811_s24 }
 0xc2f   :  { %8017 = vmatpush3.bf16.msra.mxu0 %v9081_v35 }
 0xc30   :  { %8018 = vmatprep.subr.bf16.mxu0 %v9082_v38 }
 0xc32   :  { %5496 = vrot.lane.b32.xlu1 %v5488_v24, %s9806_s0 }
 0xc33   :  { %8019 = vmatpush3.bf16.msra.mxu0 %v9082_v38 }
 0xca0   :  { %v5494_v19 = vpop.permute.xlu0 %5493  ;;  %v5491_v39 = vpop.permute.xlu1 %5490 }
 0xca1   :  { %v5500_v0 = vsel %vm5499_vm10, %v5488_v24, %v5491_v39  ;;  %v5328_v24 = vld [vmem:[#allocation21] sm:$0x1] }
 0xca2   :  { %v5501_v40 = vsel %vm5249_vm8, %v5500_v0, %v5494_v19  ;;  %v5591_v39 = vrot.slane %v5328_v24, %v10357_v2 }
 0xca3   :  { %v5506_v41 = vrot.slane %v5501_v40, %v10357_v2 }
 0xca4   :  { %v5497_v49 = vpop.permute.xlu1 %5496 }
 0xca5   :  { %v10864_v30 = vsub.f32 %v5429_v7, %v5506_v41  ;;  %v10866_v62 = vsub.f32 %v5433_v8, %v5506_v41  ;;  %v10868_v42 = vsub.f32 %v5439_v28, %v5506_v41  ;;  %v5502_v43 = vsel %vm4835_vm6, %v5494_v19, %v5497_v49 }
 0xca6   :  { %v5510_v46 = vrot.slane %v5502_v43, %v10357_v2  ;;  %v10876_v47 = vsub.f32 %v5443_v11, %v5506_v41 }
 0xca7   :  { %v5519_v44 = vmul.f32 %v10864_v30, %v10864_v30  ;;  %v5521_v45 = vmul.f32 %v10866_v62, %v10866_v62  ;;  %v5523_v57 = vmul.f32 %v10868_v42, %v10868_v42 }
 0xca8   :  { %v10879_v51 = vsub.f32 %v10846_v10, %v5510_v46  ;;  %v10881_v52 = vsub.f32 %v5435_v9, %v5510_v46  ;;  %v10883_v53 = vsub.f32 %v5441_v32, %v5510_v46  ;;  %v10885_v56 = vsub.f32 %v5445_v60, %v5510_v46 }
 0xca9   :  { %v5527_v59 = vadd.f32 %v5521_v45, %v5519_v44  ;;  %v5525_v5 = vmul.f32 %v10876_v47, %v10876_v47 }
 0xcaa   :  { %v5520_v6 = vmul.f32 %v10879_v51, %v10879_v51  ;;  %v5522_v4 = vmul.f32 %v10881_v52, %v10881_v52  ;;  %v5524_v50 = vmul.f32 %v10883_v53, %v10883_v53  ;;  %v5526_v10 = vmul.f32 %v10885_v56, %v10885_v56 }
 0xcab   :  { %v5528_v7 = vadd.f32 %v5527_v59, %v5523_v57 }
 0xcac   :  { %v5536_v8 = vsel %vm5457_vm9, %v5520_v6, 0.0  ;;  %v5537_v1 = vsel %vm5457_vm9, %v5522_v4, 0.0  ;;  %v5539_v16 = vsel %vm5457_vm9, %v5524_v50, 0.0  ;;  %v5541_v17 = vsel %vm5457_vm9, %v5526_v10, 0.0 }
 0xcad   :  { %v5529_v9 = vadd.f32 %v5528_v7, %v5525_v5  ;;  %v5538_v14 = vadd.f32 %v5537_v1, %v5536_v8 }
 0xcaf   :  { %v5530_v55 = vrot.slane %v5529_v9, 4  ;;  %v5540_v28 = vadd.f32 %v5539_v16, %v5538_v14 }
 0xcb1   :  { %v5531_v32 = vadd.f32 %v5530_v55, %v5529_v9  ;;  %v5542_v58 = vadd.f32 %v5541_v17, %v5540_v28 }
 0xcb3   :  { %v5532_v11 = vrot.slane %v5531_v32, 2  ;;  %v5543_v20 = vrot.slane %v5542_v58, 4 }
 0xcb5   :  { %v5533_v18 = vadd.f32 %v5532_v11, %v5531_v32  ;;  %v5544_v60 = vadd.f32 %v5543_v20, %v5542_v58 }
 0xcb7   :  { %v5534_v61 = vrot.slane %v5533_v18, 1  ;;  %v5545_v21 = vrot.slane %v5544_v60, 2 }
 0xcb9   :  { %v5535_v12 = vadd.f32 %v5534_v61, %v5533_v18  ;;  %v5546_v22 = vadd.f32 %v5545_v21, %v5544_v60 }
 0xcbb   :  { %5555 = vrot.lane.b32.xlu1 %v5535_v12, %s9808_s10  ;;  %5550 = vrot.lane.b32.xlu0 %v5535_v12, %s9809_s15  ;;  %v5547_v23 = vrot.slane %v5546_v22, 1 }
 0xcbd   :  { %v5548_v25 = vadd.f32 %v5547_v23, %v5546_v22 }
 0xcbf   :  { %5562 = vrot.lane.b32.xlu1 %v5548_v25, %s9804_s3  ;;  %5557 = vrot.lane.b32.xlu0 %v5548_v25, %s9808_s10 }
 0xd2d   :  { %v5551_v26 = vpop.permute.xlu0 %5550  ;;  %v5556_v27 = vpop.permute.xlu1 %5555 }
 0xd2e   :  { %v5553_v29 = vadd.f32 %v5551_v26, %v5535_v12 }
 0xd31   :  { %v5558_v48 = vpop.permute.xlu0 %5557  ;;  %v5563_v54 = vpop.permute.xlu1 %5562 }
 0xd32   :  { %v5559_v31 = vsel %vm4778_vm2, %v5556_v27, %v5558_v48 }
 0xd33   :  { %v5561_v33 = vadd.f32 %v5559_v31, %v5553_v29 }
 0xd35   :  { %v5565_v36 = vadd.f32 %v5563_v54, %v5561_v33 }
 0xd37   :  { %v5566_v13 = vmul.f32 0.0078125, %v5565_v36 }
 0xd39   :  { %v5567_v3 = vadd.f32 1e-05, %v5566_v13 }
 0xd3b   :  { %9101 = vrsqrt.f32 %v5567_v3 }
 0xd45   :  { %v9102_v15 = vpop.eup %9101 }
 0xd46   :  { %v5569_v63 = vmul.f32 %v9102_v15, %v5327_v37 }
 0xd48   :  { %v5574_v19 = vrot.slane %v5569_v63, %v10357_v2 }
 0xd4a   :  { %5578 = vrot.lane.b32.xlu1 %v5574_v19, %s9810_s19  ;;  %5575 = vrot.lane.b32.xlu0 %v5574_v19, %s9811_s24 }
 0xd4e   :  { %5595 = vrot.lane.b32.xlu1 %v5591_v39, %s9810_s19  ;;  %5592 = vrot.lane.b32.xlu0 %v5591_v39, %s9811_s24 }
 0xd52   :  { %5598 = vrot.lane.b32.xlu1 %v5591_v39, %s9806_s0  ;;  %5581 = vrot.lane.b32.xlu0 %v5574_v19, %s9806_s0 }
 0xdbc   :  { %v5579_v0 = vpop.permute.xlu1 %5578  ;;  %v5576_v40 = vpop.permute.xlu0 %5575 }
 0xdbd   :  { %v5584_v41 = vsel %vm5499_vm10, %v5569_v63, %v5576_v40 }
 0xdbe   :  { %v5585_v49 = vsel %vm5249_vm8, %v5584_v41, %v5579_v0 }
 0xdbf   :  { %v5607_v43 = vrot.slane %v5585_v49, %v10357_v2 }
 0xdc0   :  { %v5596_v44 = vpop.permute.xlu1 %5595  ;;  %v5593_v45 = vpop.permute.xlu0 %5592 }
 0xdc1   :  { %v5601_v46 = vsel %vm5499_vm10, %v5328_v24, %v5593_v45  ;;  %v5616_v6 = vmul.f32 %v5607_v43, %v10868_v42  ;;  %v5618_v4 = vmul.f32 %v5607_v43, %v10876_v47  ;;  %v5612_v7 = vmul.f32 %v5607_v43, %v10864_v30 }
 0xdc2   :  { %v5602_v57 = vsel %vm5249_vm8, %v5601_v46, %v5596_v44  ;;  %v5614_v10 = vmul.f32 %v5607_v43, %v10866_v62 }
 0xdc3   :  { %v5623_v59 = vrot.slane %v5602_v57, %v10357_v2 }
 0xdc4   :  { %v5599_v50 = vpop.permute.xlu1 %5598  ;;  %v5582_v5 = vpop.permute.xlu0 %5581 }
 0xdc5   :  { %v5603_v8 = vsel %vm4835_vm6, %v5596_v44, %v5599_v50  ;;  %v5586_v1 = vsel %vm4835_vm6, %v5579_v0, %v5582_v5  ;;  %v5632_v9 = vadd.f32 %v5623_v59, %v5616_v6  ;;  %v5634_v14 = vadd.f32 %v5623_v59, %v5618_v4 }
 0xdc6   :  { %v5611_v16 = vrot.slane %v5586_v1, %v10357_v2  ;;  %v5628_v55 = vadd.f32 %v5623_v59, %v5612_v7  ;;  %v5630_v28 = vadd.f32 %v5623_v59, %v5614_v10  ;;  %v5627_v42 = vrot.slane %v5603_v8, %v10357_v2 }
 0xdc7   :  { %v5640_v17 = vmax.f32 %v5632_v9, 0.0  ;;  %v5642_v47 = vmax.f32 %v5634_v14, 0.0 }
 0xdc8   :  { %v5636_v32 = vmax.f32 %v5628_v55, 0.0  ;;  %v5638_v58 = vmax.f32 %v5630_v28, 0.0  ;;  %v5615_v30 = vmul.f32 %v5611_v16, %v10881_v52  ;;  %v5613_v62 = vmul.f32 %v5611_v16, %v10879_v51 }
 0xdc9   :  { %v8195_v11 = vpack.i.bf16 %v5642_v47, %v5640_v17  ;;  %v5701_v20 = vpack.c.bf16 %v5642_v47, %v5640_v17  ;;  %v5619_v18 = vmul.f32 %v5611_v16, %v10885_v56  ;;  %v5617_v60 = vmul.f32 %v5611_v16, %v10883_v53 }
 0xdca   :  { %v8190_v61 = vpack.i.bf16 %v5638_v58, %v5636_v32  ;;  %v5700_v21 = vpack.c.bf16 %v5638_v58, %v5636_v32  ;;  %v5631_v12 = vadd.f32 %v5627_v42, %v5615_v30  ;;  %v5629_v22 = vadd.f32 %v5627_v42, %v5613_v62 }
 0xdcb   :  { %8196 = vrot.lane.b32.xlu1 %v8195_v11, %s9809_s15  ;;  %v5635_v23 = vadd.f32 %v5627_v42, %v5619_v18  ;;  %v5633_v25 = vadd.f32 %v5627_v42, %v5617_v60 }
 0xdcc   :  { %8191 = vrot.lane.b32.xlu0 %v8190_v61, %s9809_s15  ;;  %8020 = vmatprep.mubr.msk.bf16.mxu0 %vm5499_vm10, %v5700_v21  ;;  %v5639_v52 = vmax.f32 %v5631_v12, 0.0  ;;  %v5637_v51 = vmax.f32 %v5629_v22, 0.0 }
 0xdcd   :  { %8021 = vmatmul.mubr.msk.bf16.vlgmr.msra.gmra.mrb[12].mxu0 %vm5499_vm10, %v5701_v20  ;;  %v5643_v27 = vmax.f32 %v5635_v23, 0.0  ;;  %v5641_v53 = vmax.f32 %v5633_v25, 0.0 }
 0xdce   :  { %v8205_v26 = vpack.i.bf16 %v5639_v52, %v5638_v58  ;;  %v8200_v56 = vpack.i.bf16 %v5637_v51, %v5636_v32  ;;  %v8220_v33 = vpack.i.bf16 %v5639_v52, %v5637_v51 }
 0xdcf   :  { %v8215_v29 = vpack.i.bf16 %v5643_v27, %v5642_v47  ;;  %v8210_v48 = vpack.i.bf16 %v5641_v53, %v5640_v17  ;;  %v8225_v31 = vpack.i.bf16 %v5643_v27, %v5641_v53 }
 0xdd0   :  { %8206 = vrot.lane.b32.xlu1 %v8205_v26, %s9808_s10  ;;  %8201 = vrot.lane.b32.xlu0 %v8200_v56, %s9808_s10 }
 0xdd4   :  { %8216 = vrot.lane.b32.xlu1 %v8215_v29, %s9808_s10  ;;  %8211 = vrot.lane.b32.xlu0 %v8210_v48, %s9808_s10 }
 0xdd8   :  { %8226 = vrot.lane.b32.xlu1 %v8225_v31, %s9804_s3  ;;  %8221 = vrot.lane.b32.xlu0 %v8220_v33, %s9804_s3 }
 0xe3d   :  { %v8197_v54 = vpop.permute.xlu1 %8196 }
 0xe3e   :  { %v8199_v36 = vunpack.i.h.bf16 %v8197_v54  ;;  %v8198_v13 = vunpack.i.l.bf16 %v8197_v54  ;;  %v8192_v3 = vpop.permute.xlu0 %8191 }
 0xe3f   :  { %v8194_v34 = vunpack.i.h.bf16 %v8192_v3  ;;  %v8193_v35 = vunpack.i.l.bf16 %v8192_v3 }
 0xe40   :  { %v5703_v37 = vpack.c.bf16 %v8199_v36, %v8198_v13 }
 0xe41   :  { %v5702_v15 = vpack.c.bf16 %v8194_v34, %v8193_v35 }
 0xe42   :  { %v8207_v63 = vpop.permute.xlu1 %8206  ;;  %v8202_v38 = vpop.permute.xlu0 %8201 }
 0xe43   :  { %v8209_v24 = vunpack.i.h.bf16 %v8207_v63  ;;  %v8208_v19 = vunpack.i.l.bf16 %v8207_v63  ;;  %v8204_v39 = vunpack.i.h.bf16 %v8202_v38  ;;  %v8203_v0 = vunpack.i.l.bf16 %v8202_v38  ;;  %8024 = vmatprep.mubr.msk.bf16.mxu0 %vm5499_vm10, %v5702_v15 }
 0xe44   :  { %8025 = vmatmul.mubr.msk.bf16.gmra.mrb[16].mxu0 %vm5499_vm10, %v5703_v37 }
 0xe45   :  { %v5681_v40 = vsel %vm4778_vm2, %v8208_v19, %v8209_v24  ;;  %v5680_v41 = vsel %vm4778_vm2, %v8203_v0, %v8204_v39 }
 0xe46   :  { %v5704_v49 = vpack.c.bf16 %v5681_v40, %v5680_v41  ;;  %v8217_v43 = vpop.permute.xlu1 %8216  ;;  %v8212_v44 = vpop.permute.xlu0 %8211 }
 0xe47   :  { %v8219_v45 = vunpack.i.h.bf16 %v8217_v43  ;;  %v8218_v46 = vunpack.i.l.bf16 %v8217_v43  ;;  %v8214_v57 = vunpack.i.h.bf16 %v8212_v44  ;;  %v8213_v59 = vunpack.i.l.bf16 %v8212_v44 }
 0xe48   :  { %8028 = vmatprep.mubr.msk.bf16.mxu0 %vm5499_vm10, %v5704_v49 }
 0xe49   :  { %v5683_v6 = vsel %vm4778_vm2, %v8218_v46, %v8219_v45  ;;  %v5682_v4 = vsel %vm4778_vm2, %v8213_v59, %v8214_v57 }
 0xe4a   :  { %v5705_v50 = vpack.c.bf16 %v5683_v6, %v5682_v4  ;;  %v8222_v5 = vpop.permute.xlu0 %8221  ;;  %v8227_v7 = vpop.permute.xlu1 %8226 }
 0xe4b   :  { %v8224_v10 = vunpack.i.h.bf16 %v8222_v5  ;;  %v8223_v8 = vunpack.i.l.bf16 %v8222_v5  ;;  %v8229_v9 = vunpack.i.h.bf16 %v8227_v7  ;;  %v8228_v14 = vunpack.i.l.bf16 %v8227_v7 }
 0xe4c   :  { %8029 = vmatmul.mubr.msk.bf16.gmra.mrb[20].mxu0 %vm5499_vm10, %v5705_v50 }
 0xe4d   :  { %v5706_v1 = vpack.c.bf16 %v8224_v10, %v8223_v8  ;;  %v5707_v16 = vpack.c.bf16 %v8229_v9, %v8228_v14 }
 0xe4f   :  { %8032 = vmatprep.mubr.msk.bf16.mxu0 %vm5499_vm10, %v5706_v1 }
 0xe54   :  { %8033 = vmatmul.mubr.msk.bf16.gmra.mrb[24].mxu0 %vm5499_vm10, %v5707_v16 }
 0xea0   :  { %v8022_v55 = vpop.f32.mrb[12].mxu0 }
 0xea1   :  { %v5792_v28 = vpop.f32.mrb[13].mxu0 }
 0xea2   :  { %v8023_v42 = vpop.f32.mrb[14].mxu0 }
 0xea3   :  { %v5795_v17 = vpop.f32.mrb[15].mxu0 }
 0xea4   :  { %v5855_v47 = vadd.f32 %v5795_v17, %v5792_v28 }
 0xea6   :  { %v5856_v32 = vadd.f32 %v8022_v55, %v5855_v47 }
 0xea8   :  { %v5857_v58 = vadd.f32 %v8023_v42, %v5856_v32 }
 0xf17   :  { %v8026_v30 = vpop.f32.mrb[16].mxu0 }
 0xf18   :  { %v5808_v62 = vpop.f32.mrb[17].mxu0 }
 0xf19   :  { %v5858_v11 = vadd.f32 %v5857_v58, %v5808_v62  ;;  %v8027_v20 = vpop.f32.mrb[18].mxu0 }
 0xf1a   :  { %v5811_v18 = vpop.f32.mrb[19].mxu0 }
 0xf1b   :  { %v5859_v60 = vadd.f32 %v5858_v11, %v5811_v18 }
 0xf1d   :  { %v5860_v61 = vadd.f32 %v8026_v30, %v5859_v60 }
 0xf1f   :  { %v10954_v21 = vpop.f32.mrb[20].mxu0  ;;  %v5861_v12 = vadd.f32 %v8027_v20, %v5860_v61 }
 0xf20   :  { %v5824_v22 = vpop.f32.mrb[21].mxu0 }
 0xf21   :  { %v5862_v23 = vadd.f32 %v5861_v12, %v5824_v22  ;;  %v10956_v25 = vpop.f32.mrb[22].mxu0 }
 0xf22   :  { %v5827_v52 = vpop.f32.mrb[23].mxu0 }
 0xf23   :  { %v5863_v51 = vadd.f32 %v5862_v23, %v5827_v52 }
 0xf25   :  { %v5864_v26 = vadd.f32 %v10954_v21, %v5863_v51 }
 0xf27   :  { %v10959_v56 = vpop.f32.mrb[24].mxu0  ;;  %v5865_v27 = vadd.f32 %v10956_v25, %v5864_v26 }
 0xf28   :  { %v10962_v53 = vpop.f32.mrb[25].mxu0 }
 0xf29   :  { %v5866_v29 = vadd.f32 %v5865_v27, %v10962_v53  ;;  %v10965_v48 = vpop.f32.mrb[26].mxu0 }
 0xf2a   :  { %v10967_v31 = vpop.f32.mrb[27].mxu0 }
 0xf2b   :  { %v5867_v33 = vadd.f32 %v5866_v29, %v10967_v31 }
 0xf2d   :  { %v5868_v54 = vadd.f32 %v10959_v56, %v5867_v33 }
 0xf2f   :  { %v5869_v36 = vadd.f32 %v10965_v48, %v5868_v54 }
 0xf31   :  { %v5870_v13 = vrot.slane %v5869_v36, 4 }
 0xf33   :  { %v5871_v3 = vadd.f32 %v5870_v13, %v5869_v36 }
 0xf35   :  { %v5872_v34 = vrot.slane %v5871_v3, 2 }
 0xf37   :  { %v5873_v35 = vadd.f32 %v5872_v34, %v5871_v3 }
 0xf39   :  { %v5874_v37 = vrot.slane %v5873_v35, 1 }
 0xf3b   :  { %v5875_v15 = vadd.f32 %v5874_v37, %v5873_v35 }
 0xf3d   :  { %5881 = vrot.lane.b32.xlu1 %v5875_v15, %s9781_s8  ;;  %5877 = vrot.lane.b32.xlu0 %v5875_v15, %s9810_s19 }
 0xf41   :  { %5885 = vrot.lane.b32.xlu0 %v5875_v15, %s9808_s10 }
 0xfaf   :  { %v5878_v63 = vpop.permute.xlu0 %5877  ;;  %v5882_v24 = vpop.permute.xlu1 %5881 }
 0xfb0   :  { %v5880_v38 = vadd.f32 %v5878_v63, %v5875_v15 }
 0xfb2   :  { %v5884_v19 = vadd.f32 %v5882_v24, %v5880_v38 }
 0xfb3   :  { %v5886_v39 = vpop.permute.xlu0 %5885 }
 0xfb4   :  { %v5888_v0 = vadd.f32 %v5886_v39, %v5884_v19  ;;  %v5715_v39 = vld [vmem:[#allocation25] sm:$0x1] }
 0xfb6   :  { %v5889_v40 = vmul.f32 0.001953125, %v5888_v0  ;;  %v5998_v0 = vrot.slane %v5715_v39, %v10357_v2 }
 0xfb8   :  { %5894 = vrot.lane.b32.xlu0 %v5889_v40, %s9781_s8  ;;  %5891 = vrot.lane.b32.xlu1 %v5889_v40, %s9808_s10 }
 0xfbc   :  { %5897 = vrot.lane.b32.xlu1 %v5889_v40, %s9810_s19 }
0x102a   :  { %v5892_v41 = vpop.permute.xlu1 %5891  ;;  %v5895_v49 = vpop.permute.xlu0 %5894 }
0x102b   :  { %v5900_v43 = vsel %vm4778_vm2, %v5889_v40, %v5892_v41 }
0x102c   :  { %v5901_v44 = vsel %vm5457_vm9, %v5900_v43, %v5895_v49 }
0x102e   :  { %v5898_v45 = vpop.permute.xlu1 %5897 }
0x102f   :  { %v5902_v46 = vsel %vm5249_vm8, %v5901_v44, %v5898_v45 }
0x1030   :  { %v5906_v57 = vrot.slane %v5902_v46, %v10357_v2 }
0x1032   :  { %v10982_v59 = vsub.f32 %v5792_v28, %v5906_v57  ;;  %v10984_v6 = vsub.f32 %v5795_v17, %v5906_v57  ;;  %v10986_v4 = vsub.f32 %v8022_v55, %v5906_v57  ;;  %v10992_v7 = vsub.f32 %v8023_v42, %v5906_v57 }
0x1033   :  { %v10994_v10 = vsub.f32 %v5808_v62, %v5906_v57  ;;  %v10998_v9 = vsub.f32 %v5811_v18, %v5906_v57  ;;  %v11002_v55 = vsub.f32 %v8026_v30, %v5906_v57  ;;  %v11006_v42 = vsub.f32 %v8027_v20, %v5906_v57 }
0x1034   :  { %v5923_v50 = vmul.f32 %v10982_v59, %v10982_v59  ;;  %v5924_v5 = vmul.f32 %v10984_v6, %v10984_v6  ;;  %v5925_v8 = vmul.f32 %v10986_v4, %v10986_v4  ;;  %v5926_v14 = vmul.f32 %v10992_v7, %v10992_v7 }
0x1035   :  { %v5927_v28 = vmul.f32 %v10994_v10, %v10994_v10  ;;  %v5928_v47 = vmul.f32 %v10998_v9, %v10998_v9  ;;  %v11010_v58 = vsub.f32 %v5824_v22, %v5906_v57  ;;  %v5929_v62 = vmul.f32 %v11002_v55, %v11002_v55 }
0x1036   :  { %v5939_v1 = vadd.f32 %v5924_v5, %v5923_v50  ;;  %v11014_v18 = vsub.f32 %v5827_v52, %v5906_v57  ;;  %v5930_v30 = vmul.f32 %v11006_v42, %v11006_v42  ;;  %v11019_v61 = vsub.f32 %v10954_v21, %v5906_v57  ;;  %v5714_v50 = vld [vmem:[#allocation24] sm:$0x1] }
0x1037   :  { %v5931_v20 = vmul.f32 %v11010_v58, %v11010_v58  ;;  %v11024_v22 = vsub.f32 %v10956_v25, %v5906_v57  ;;  %v11029_v52 = vsub.f32 %v10962_v53, %v5906_v57  ;;  %v11034_v21 = vsub.f32 %v10967_v31, %v5906_v57 }
0x1038   :  { %v5940_v16 = vadd.f32 %v5939_v1, %v5925_v8  ;;  %v5932_v23 = vmul.f32 %v11014_v18, %v11014_v18  ;;  %v5933_v26 = vmul.f32 %v11019_v61, %v11019_v61  ;;  %v11039_v25 = vsub.f32 %v10959_v56, %v5906_v57  ;;  %v9083_v1 = vld [vmem:[#allocation27] sm:$0xff]  }
0x1039   :  { %v5934_v29 = vmul.f32 %v11024_v22, %v11024_v22  ;;  %v5935_v54 = vmul.f32 %v11029_v52, %v11029_v52  ;;  %v11044_v53 = vsub.f32 %v10965_v48, %v5906_v57  ;;  %v5936_v13 = vmul.f32 %v11034_v21, %v11034_v21  ;;  %8036 = vmatprep.subr.bf16.mxu0 %v9083_v1 }
0x103a   :  { %v5941_v17 = vadd.f32 %v5940_v16, %v5926_v14  ;;  %v5937_v31 = vmul.f32 %v11039_v25, %v11039_v25  ;;  %v9084_v16 = vld [vmem:[#allocation27 + $0x8] sm:$0xff]   ;;  %8104 = vmatprep.subr.bf16.mxu1 %v9083_v1  ;;  %8037 = vmatpush3.bf16.msra.mxu0 %v9083_v1 }
0x103b   :  { %v5938_v35 = vmul.f32 %v11044_v53, %v11044_v53  ;;  %8106 = vmatpush3.bf16.msra.mxu1 %v9083_v1  ;;  %8038 = vmatprep.subr.bf16.mxu0 %v9084_v16 }
0x103c   :  { %v5942_v32 = vadd.f32 %v5941_v17, %v5927_v28  ;;  %8105 = vmatprep.subr.bf16.mxu1 %v9084_v16 }
0x103e   :  { %v5943_v11 = vadd.f32 %v5942_v32, %v5928_v47  ;;  %8039 = vmatpush3.bf16.msra.mxu0 %v9084_v16 }
0x103f   :  { %8107 = vmatpush3.bf16.msra.mxu1 %v9084_v16 }
0x1040   :  { %v5944_v60 = vadd.f32 %v5943_v11, %v5929_v62 }
0x1042   :  { %v5945_v12 = vadd.f32 %v5944_v60, %v5930_v30 }
0x1044   :  { %v5946_v51 = vadd.f32 %v5945_v12, %v5931_v20 }
0x1046   :  { %v5947_v27 = vadd.f32 %v5946_v51, %v5932_v23 }
0x1048   :  { %v5948_v33 = vadd.f32 %v5947_v27, %v5933_v26 }
0x104a   :  { %v5949_v36 = vadd.f32 %v5948_v33, %v5934_v29 }
0x104c   :  { %v5950_v3 = vadd.f32 %v5949_v36, %v5935_v54 }
0x104e   :  { %v5951_v34 = vadd.f32 %v5950_v3, %v5936_v13 }
0x1050   :  { %v5952_v56 = vadd.f32 %v5951_v34, %v5937_v31 }
0x1052   :  { %v5953_v37 = vadd.f32 %v5952_v56, %v5938_v35 }
0x1054   :  { %v5954_v15 = vrot.slane %v5953_v37, 4 }
0x1056   :  { %v5955_v63 = vadd.f32 %v5954_v15, %v5953_v37 }
0x1058   :  { %v5956_v38 = vrot.slane %v5955_v63, 2 }
0x105a   :  { %v5957_v24 = vadd.f32 %v5956_v38, %v5955_v63 }
0x105c   :  { %v5958_v19 = vrot.slane %v5957_v24, 1 }
0x105e   :  { %v5959_v48 = vadd.f32 %v5958_v19, %v5957_v24 }
0x1060   :  { %5965 = vrot.lane.b32.xlu1 %v5959_v48, %s9781_s8  ;;  %5961 = vrot.lane.b32.xlu0 %v5959_v48, %s9810_s19 }
0x1064   :  { %5969 = vrot.lane.b32.xlu0 %v5959_v48, %s9808_s10 }
0x1068   :  { %5999 = vrot.lane.b32.xlu0 %v5998_v0, %s9808_s10 }
0x10d2   :  { %v5962_v40 = vpop.permute.xlu0 %5961  ;;  %v5966_v49 = vpop.permute.xlu1 %5965 }
0x10d3   :  { %v5964_v41 = vadd.f32 %v5962_v40, %v5959_v48 }
0x10d5   :  { %v5968_v43 = vadd.f32 %v5966_v49, %v5964_v41 }
0x10d6   :  { %v5970_v44 = vpop.permute.xlu0 %5969 }
0x10d7   :  { %v5972_v45 = vadd.f32 %v5970_v44, %v5968_v43 }
0x10d9   :  { %v5973_v46 = vmul.f32 0.001953125, %v5972_v45 }
0x10da   :  { %v6000_v28 = vpop.permute.xlu0 %5999 }
0x10db   :  { %v5974_v57 = vadd.f32 1e-05, %v5973_v46  ;;  %v6008_v12 = vsel %vm4778_vm2, %v5715_v39, %v6000_v28 }
0x10dd   :  { %9103 = vrsqrt.f32 %v5974_v57 }
0x10e7   :  { %v9104_v5 = vpop.eup %9103 }
0x10e8   :  { %v5976_v8 = vmul.f32 %v9104_v5, %v5714_v50 }
0x10ea   :  { %v5981_v14 = vrot.slane %v5976_v8, %v10357_v2 }
0x10ec   :  { %5985 = vrot.lane.b32.xlu0 %v5981_v14, %s9781_s8  ;;  %5982 = vrot.lane.b32.xlu1 %v5981_v14, %s9808_s10 }
0x10f0   :  { %5988 = vrot.lane.b32.xlu1 %v5981_v14, %s9810_s19  ;;  %6005 = vrot.lane.b32.xlu0 %v5998_v0, %s9810_s19 }
0x10f4   :  { %6002 = vrot.lane.b32.xlu1 %v5998_v0, %s9781_s8 }
0x115e   :  { %v5983_v17 = vpop.permute.xlu1 %5982  ;;  %v5986_v32 = vpop.permute.xlu0 %5985 }
0x115f   :  { %v5991_v47 = vsel %vm4778_vm2, %v5976_v8, %v5983_v17 }
0x1160   :  { %v5992_v62 = vsel %vm5457_vm9, %v5991_v47, %v5986_v32 }
0x1162   :  { %v5989_v11 = vpop.permute.xlu1 %5988  ;;  %v6006_v20 = vpop.permute.xlu0 %6005 }
0x1163   :  { %v5993_v30 = vsel %vm5249_vm8, %v5992_v62, %v5989_v11 }
0x1164   :  { %v6014_v60 = vrot.slane %v5993_v30, %v10357_v2 }
0x1166   :  { %v6003_v23 = vpop.permute.xlu1 %6002  ;;  %v6025_v51 = vmul.f32 %v6014_v60, %v11019_v61  ;;  %v6026_v26 = vmul.f32 %v6014_v60, %v11024_v22  ;;  %v6023_v29 = vmul.f32 %v6014_v60, %v11010_v58  ;;  %v6024_v33 = vmul.f32 %v6014_v60, %v11014_v18 }
0x1167   :  { %v6009_v27 = vsel %vm5457_vm9, %v6008_v12, %v6003_v23  ;;  %v6015_v54 = vmul.f32 %v6014_v60, %v10982_v59  ;;  %v6016_v13 = vmul.f32 %v6014_v60, %v10984_v6  ;;  %v6017_v3 = vmul.f32 %v6014_v60, %v10986_v4 }
0x1168   :  { %v6010_v36 = vsel %vm5249_vm8, %v6009_v27, %v6006_v20  ;;  %v6018_v31 = vmul.f32 %v6014_v60, %v10992_v7  ;;  %v6019_v22 = vmul.f32 %v6014_v60, %v10994_v10  ;;  %v6020_v34 = vmul.f32 %v6014_v60, %v10998_v9 }
0x1169   :  { %v6034_v61 = vrot.slane %v6010_v36, %v10357_v2  ;;  %v6029_v58 = vmul.f32 %v6014_v60, %v11039_v25  ;;  %v6030_v18 = vmul.f32 %v6014_v60, %v11044_v53  ;;  %v6027_v59 = vmul.f32 %v6014_v60, %v11029_v52 }
0x116a   :  { %v6028_v35 = vmul.f32 %v6014_v60, %v11034_v21  ;;  %v6021_v6 = vmul.f32 %v6014_v60, %v11002_v55  ;;  %v6022_v8 = vmul.f32 %v6014_v60, %v11006_v42 }
0x116b   :  { %v6045_v56 = vadd.f32 %v6034_v61, %v6025_v51  ;;  %v6046_v4 = vadd.f32 %v6034_v61, %v6026_v26  ;;  %v6043_v37 = vadd.f32 %v6034_v61, %v6023_v29  ;;  %v6044_v7 = vadd.f32 %v6034_v61, %v6024_v33 }
0x116c   :  { %v6035_v15 = vadd.f32 %v6034_v61, %v6015_v54  ;;  %v6036_v2 = vadd.f32 %v6034_v61, %v6016_v13  ;;  %v6037_v63 = vadd.f32 %v6034_v61, %v6017_v3  ;;  %v6038_v10 = vadd.f32 %v6034_v61, %v6018_v31 }
0x116d   :  { %v6061_v38 = vmax.f32 %v6045_v56, 0.0  ;;  %v6062_v9 = vmax.f32 %v6046_v4, 0.0  ;;  %v6059_v24 = vmax.f32 %v6043_v37, 0.0  ;;  %v6060_v25 = vmax.f32 %v6044_v7, 0.0 }
0x116e   :  { %v6051_v19 = vmax.f32 %v6035_v15, 0.0  ;;  %v6052_v53 = vmax.f32 %v6036_v2, 0.0  ;;  %v6053_v48 = vmax.f32 %v6037_v63, 0.0  ;;  %v6054_v52 = vmax.f32 %v6038_v10, 0.0 }
0x116f   :  { %v8235_v39 = vpack.i.bf16 %v6062_v9, %v6061_v38  ;;  %v8230_v21 = vpack.i.bf16 %v6060_v25, %v6059_v24  ;;  %v6039_v0 = vadd.f32 %v6034_v61, %v6019_v22  ;;  %v6040_v55 = vadd.f32 %v6034_v61, %v6020_v34 }
0x1170   :  { %v6227_v40 = vpack.c.bf16 %v6052_v53, %v6051_v19  ;;  %v6228_v41 = vpack.c.bf16 %v6054_v52, %v6053_v48  ;;  %v6049_v49 = vadd.f32 %v6034_v61, %v6029_v58  ;;  %v6050_v43 = vadd.f32 %v6034_v61, %v6030_v18 }
0x1171   :  { %8236 = vrot.lane.b32.xlu0 %v8235_v39, %s9810_s19  ;;  %8231 = vrot.lane.b32.xlu1 %v8230_v21, %s9810_s19  ;;  %v6055_v44 = vmax.f32 %v6039_v0, 0.0  ;;  %v6056_v45 = vmax.f32 %v6040_v55, 0.0  ;;  %v6047_v46 = vadd.f32 %v6034_v61, %v6027_v59  ;;  %v6048_v57 = vadd.f32 %v6034_v61, %v6028_v35 }
0x1172   :  { %8040 = vmatprep.mubr.msk.bf16.mxu0 %vm4778_vm2, %v6227_v40  ;;  %v6065_v50 = vmax.f32 %v6049_v49, 0.0  ;;  %v6066_v5 = vmax.f32 %v6050_v43, 0.0  ;;  %v6041_v28 = vadd.f32 %v6034_v61, %v6021_v6  ;;  %v6042_v47 = vadd.f32 %v6034_v61, %v6022_v8 }
0x1173   :  { %8041 = vmatmul.mubr.msk.bf16.vlgmr.msra.gmra.mrb[28].mxu0 %vm4778_vm2, %v6228_v41  ;;  %v6229_v1 = vpack.c.bf16 %v6056_v45, %v6055_v44  ;;  %v6063_v14 = vmax.f32 %v6047_v46, 0.0  ;;  %v6064_v16 = vmax.f32 %v6048_v57, 0.0  ;;  %v8255_v30 = vpack.i.bf16 %v6054_v52, %v6053_v48 }
0x1174   :  { %v8245_v17 = vpack.i.bf16 %v6066_v5, %v6065_v50  ;;  %v6057_v62 = vmax.f32 %v6041_v28, 0.0  ;;  %v6058_v11 = vmax.f32 %v6042_v47, 0.0  ;;  %v8250_v20 = vpack.i.bf16 %v6052_v53, %v6051_v19 }
0x1175   :  { %8044 = vmatprep.mubr.msk.bf16.mxu0 %vm4778_vm2, %v6229_v1  ;;  %v8240_v32 = vpack.i.bf16 %v6064_v16, %v6063_v14  ;;  %v6231_v60 = vpack.c.bf16 %v6060_v25, %v6059_v24  ;;  %v8260_v23 = vpack.i.bf16 %v6056_v45, %v6055_v44  ;;  %v6232_v51 = vpack.c.bf16 %v6062_v9, %v6061_v38 }
0x1176   :  { %8246 = vrot.lane.b32.xlu0 %v8245_v17, %s9810_s19  ;;  %v6230_v42 = vpack.c.bf16 %v6058_v11, %v6057_v62  ;;  %v8265_v12 = vpack.i.bf16 %v6058_v11, %v6057_v62  ;;  %v6233_v26 = vpack.c.bf16 %v6064_v16, %v6063_v14  ;;  %v6234_v27 = vpack.c.bf16 %v6066_v5, %v6065_v50 }
0x1177   :  { %8241 = vrot.lane.b32.xlu1 %v8240_v32, %s9810_s19 }
0x117a   :  { %8256 = vrot.lane.b32.xlu0 %v8255_v30, %s9781_s8 }
0x117b   :  { %8251 = vrot.lane.b32.xlu1 %v8250_v20, %s9781_s8  ;;  %8045 = vmatmul.mubr.msk.bf16.gmra.mrb[32].mxu0 %vm4778_vm2, %v6230_v42 }
0x117c   :  { %8048 = vmatprep.mubr.msk.bf16.mxu0 %vm4778_vm2, %v6231_v60 }
0x117e   :  { %8266 = vrot.lane.b32.xlu0 %v8265_v12, %s9781_s8 }
0x117f   :  { %8261 = vrot.lane.b32.xlu1 %v8260_v23, %s9781_s8 }
0x1182   :  { %8276 = vrot.lane.b32.xlu0 %v8235_v39, %s9781_s8 }
0x1183   :  { %8271 = vrot.lane.b32.xlu1 %v8230_v21, %s9781_s8  ;;  %8049 = vmatmul.mubr.msk.bf16.gmra.mrb[36].mxu0 %vm4778_vm2, %v6232_v51 }
0x1184   :  { %8052 = vmatprep.mubr.msk.bf16.mxu0 %vm4778_vm2, %v6233_v26 }
0x1186   :  { %8286 = vrot.lane.b32.xlu0 %v8245_v17, %s9781_s8 }
0x1187   :  { %8281 = vrot.lane.b32.xlu1 %v8240_v32, %s9781_s8 }
0x118a   :  { %8296 = vrot.lane.b32.xlu0 %v8255_v30, %s9808_s10 }
0x118b   :  { %8291 = vrot.lane.b32.xlu1 %v8250_v20, %s9808_s10  ;;  %8053 = vmatmul.mubr.msk.bf16.gmra.mrb[40].mxu0 %vm4778_vm2, %v6234_v27 }
0x118e   :  { %8306 = vrot.lane.b32.xlu0 %v8265_v12, %s9808_s10 }
0x118f   :  { %8301 = vrot.lane.b32.xlu1 %v8260_v23, %s9808_s10 }
0x1192   :  { %8316 = vrot.lane.b32.xlu0 %v8230_v21, %s9808_s10 }
0x1193   :  { %8311 = vrot.lane.b32.xlu1 %v8250_v20, %s9810_s19 }
0x1196   :  { %8326 = vrot.lane.b32.xlu0 %v8235_v39, %s9808_s10 }
0x1197   :  { %8321 = vrot.lane.b32.xlu1 %v8255_v30, %s9810_s19 }
0x119a   :  { %8336 = vrot.lane.b32.xlu0 %v8240_v32, %s9808_s10 }
0x119b   :  { %8331 = vrot.lane.b32.xlu1 %v8260_v23, %s9810_s19 }
0x119e   :  { %8346 = vrot.lane.b32.xlu0 %v8245_v17, %s9808_s10 }
0x119f   :  { %8341 = vrot.lane.b32.xlu1 %v8265_v12, %s9810_s19 }
0x11e3   :  { %v8237_v29 = vpop.permute.xlu0 %8236  ;;  %v8232_v33 = vpop.permute.xlu1 %8231 }
0x11e4   :  { %v8239_v54 = vunpack.i.h.bf16 %v8237_v29  ;;  %v8238_v36 = vunpack.i.l.bf16 %v8237_v29  ;;  %v8234_v13 = vunpack.i.h.bf16 %v8232_v33  ;;  %v8233_v3 = vunpack.i.l.bf16 %v8232_v33 }
0x11e6   :  { %v6240_v31 = vpack.c.bf16 %v8239_v54, %v8238_v36  ;;  %v6239_v61 = vpack.c.bf16 %v8234_v13, %v8233_v3 }
0x11e8   :  { %v8247_v22 = vpop.permute.xlu0 %8246  ;;  %8064 = vmatprep.mubr.msk.bf16.mxu1 %vm4778_vm2, %v6239_v61 }
0x11e9   :  { %v8242_v34 = vpop.permute.xlu1 %8241  ;;  %8065 = vmatmul.mubr.msk.bf16.vlgmr.msra.gmra.mrb[56].mxu1 %vm4778_vm2, %v6240_v31  ;;  %v8249_v59 = vunpack.i.h.bf16 %v8247_v22  ;;  %v8248_v35 = vunpack.i.l.bf16 %v8247_v22 }
0x11ea   :  { %v8244_v58 = vunpack.i.h.bf16 %v8242_v34  ;;  %v8243_v18 = vunpack.i.l.bf16 %v8242_v34 }
0x11eb   :  { %v6242_v7 = vpack.c.bf16 %v8249_v59, %v8248_v35 }
0x11ec   :  { %v6241_v6 = vpack.c.bf16 %v8244_v58, %v8243_v18  ;;  %v8257_v15 = vpop.permute.xlu0 %8256 }
0x11ed   :  { %v8252_v56 = vpop.permute.xlu1 %8251  ;;  %v8259_v10 = vunpack.i.h.bf16 %v8257_v15  ;;  %v8258_v38 = vunpack.i.l.bf16 %v8257_v15 }
0x11ee   :  { %v8254_v4 = vunpack.i.h.bf16 %v8252_v56  ;;  %v8253_v37 = vunpack.i.l.bf16 %v8252_v56  ;;  %8068 = vmatprep.mubr.msk.bf16.mxu1 %vm4778_vm2, %v6241_v6 }
0x11ef   :  { %v6244_v19 = vpack.c.bf16 %v8259_v10, %v8258_v38 }
0x11f0   :  { %v6243_v2 = vpack.c.bf16 %v8254_v4, %v8253_v37  ;;  %v8267_v53 = vpop.permute.xlu0 %8266 }
0x11f1   :  { %v8262_v63 = vpop.permute.xlu1 %8261  ;;  %8069 = vmatmul.mubr.msk.bf16.gmra.mrb[60].mxu1 %vm4778_vm2, %v6242_v7  ;;  %v8269_v39 = vunpack.i.h.bf16 %v8267_v53  ;;  %v8268_v21 = vunpack.i.l.bf16 %v8267_v53 }
0x11f2   :  { %8072 = vmatprep.mubr.msk.bf16.mxu1 %vm4778_vm2, %v6243_v2  ;;  %v8264_v9 = vunpack.i.h.bf16 %v8262_v63  ;;  %v8263_v24 = vunpack.i.l.bf16 %v8262_v63 }
0x11f3   :  { %v6246_v49 = vpack.c.bf16 %v8269_v39, %v8268_v21  ;;  %v11143_v21 = vld [vmem:[#allocation28] ss:$0 sm:$0xff] }
0x11f4   :  { %v6245_v48 = vpack.c.bf16 %v8264_v9, %v8263_v24  ;;  %v8277_v40 = vpop.permute.xlu0 %8276 }
0x11f5   :  { %v8272_v25 = vpop.permute.xlu1 %8271  ;;  %v8279_v45 = vunpack.i.h.bf16 %v8277_v40  ;;  %v8278_v46 = vunpack.i.l.bf16 %v8277_v40 }
0x11f6   :  { %v8274_v0 = vunpack.i.h.bf16 %v8272_v25  ;;  %v8273_v55 = vunpack.i.l.bf16 %v8272_v25 }
0x11f7   :  { %v6248_v16 = vpack.c.bf16 %v8279_v45, %v8278_v46 }
0x11f8   :  { %v6247_v43 = vpack.c.bf16 %v8274_v0, %v8273_v55  ;;  %v8287_v57 = vpop.permute.xlu0 %8286 }
0x11f9   :  { %v8282_v52 = vpop.permute.xlu1 %8281  ;;  %8073 = vmatmul.mubr.msk.bf16.gmra.mrb[64].mxu1 %vm4778_vm2, %v6244_v19  ;;  %v8289_v30 = vunpack.i.h.bf16 %v8287_v57  ;;  %v8288_v20 = vunpack.i.l.bf16 %v8287_v57 }
0x11fa   :  { %8076 = vmatprep.mubr.msk.bf16.mxu1 %vm4778_vm2, %v6245_v48  ;;  %v8284_v50 = vunpack.i.h.bf16 %v8282_v52  ;;  %v8283_v5 = vunpack.i.l.bf16 %v8282_v52 }
0x11fb   :  { %v6250_v27 = vpack.c.bf16 %v8289_v30, %v8288_v20 }
0x11fc   :  { %v6249_v28 = vpack.c.bf16 %v8284_v50, %v8283_v5  ;;  %v8297_v47 = vpop.permute.xlu0 %8296 }
0x11fd   :  { %v8292_v41 = vpop.permute.xlu1 %8291  ;;  %v8299_v31 = vunpack.i.h.bf16 %v8297_v47  ;;  %v8298_v61 = vunpack.i.l.bf16 %v8297_v47 }
0x11fe   :  { %v8294_v42 = vunpack.i.h.bf16 %v8292_v41  ;;  %v8293_v60 = vunpack.i.l.bf16 %v8292_v41 }
0x11ff   :  { %v6252_v59 = vpack.c.bf16 %v8299_v31, %v8298_v61 }
0x1200   :  { %v8307_v29 = vpop.permute.xlu0 %8306  ;;  %v6251_v33 = vpack.c.bf16 %v8294_v42, %v8293_v60 }
0x1201   :  { %v8302_v44 = vpop.permute.xlu1 %8301  ;;  %8077 = vmatmul.mubr.msk.bf16.gmra.mrb[68].mxu1 %vm4778_vm2, %v6246_v49  ;;  %v8309_v6 = vunpack.i.h.bf16 %v8307_v29  ;;  %v8308_v56 = vunpack.i.l.bf16 %v8307_v29 }
0x1202   :  { %8080 = vmatprep.mubr.msk.bf16.mxu1 %vm4778_vm2, %v6247_v43  ;;  %v8304_v22 = vunpack.i.h.bf16 %v8302_v44  ;;  %v8303_v34 = vunpack.i.l.bf16 %v8302_v44 }
0x1203   :  { %v6254_v15 = vpack.c.bf16 %v8309_v6, %v8308_v56 }
0x1204   :  { %v8317_v18 = vpop.permute.xlu0 %8316  ;;  %v6253_v35 = vpack.c.bf16 %v8304_v22, %v8303_v34 }
0x1205   :  { %v8312_v8 = vpop.permute.xlu1 %8311  ;;  %v8319_v37 = vunpack.i.h.bf16 %v8317_v18  ;;  %v8318_v7 = vunpack.i.l.bf16 %v8317_v18 }
0x1206   :  { %v8314_v1 = vunpack.i.h.bf16 %v8312_v8  ;;  %v8313_v14 = vunpack.i.l.bf16 %v8312_v8 }
0x1207   :  { %v6255_v2 = vpack.c.bf16 %v8319_v37, %v8318_v7 }
0x1208   :  { %v6235_v17 = vpack.c.bf16 %v8314_v1, %v8313_v14  ;;  %v8327_v4 = vpop.permute.xlu0 %8326 }
0x1209   :  { %v8322_v32 = vpop.permute.xlu1 %8321  ;;  %8081 = vmatmul.mubr.msk.bf16.gmra.mrb[72].mxu1 %vm4778_vm2, %v6248_v16  ;;  %v8329_v10 = vunpack.i.h.bf16 %v8327_v4  ;;  %v8328_v38 = vunpack.i.l.bf16 %v8327_v4 }
0x120a   :  { %v8324_v62 = vunpack.i.h.bf16 %v8322_v32  ;;  %v8323_v11 = vunpack.i.l.bf16 %v8322_v32  ;;  %8056 = vmatprep.mubr.msk.bf16.mxu0 %vm4778_vm2, %v6235_v17  ;;  %8084 = vmatprep.mubr.msk.bf16.mxu1 %vm4778_vm2, %v6249_v28 }
0x120b   :  { %v6256_v25 = vpack.c.bf16 %v8329_v10, %v8328_v38 }
0x120c   :  { %v6236_v12 = vpack.c.bf16 %v8324_v62, %v8323_v11  ;;  %v8337_v63 = vpop.permute.xlu0 %8336 }
0x120d   :  { %v8332_v23 = vpop.permute.xlu1 %8331  ;;  %v8339_v9 = vunpack.i.h.bf16 %v8337_v63  ;;  %v8338_v24 = vunpack.i.l.bf16 %v8337_v63 }
0x120e   :  { %v8334_v51 = vunpack.i.h.bf16 %v8332_v23  ;;  %v8333_v26 = vunpack.i.l.bf16 %v8332_v23  ;;  %8057 = vmatmul.mubr.msk.bf16.gmra.mrb[44].mxu0 %vm4778_vm2, %v6236_v12 }
0x120f   :  { %v6257_v19 = vpack.c.bf16 %v8339_v9, %v8338_v24 }
0x1210   :  { %v6237_v54 = vpack.c.bf16 %v8334_v51, %v8333_v26  ;;  %v8347_v53 = vpop.permute.xlu0 %8346 }
0x1211   :  { %v8342_v36 = vpop.permute.xlu1 %8341  ;;  %8085 = vmatmul.mubr.msk.bf16.gmra.mrb[76].mxu1 %vm4778_vm2, %v6250_v27  ;;  %v8349_v48 = vunpack.i.h.bf16 %v8347_v53  ;;  %v8348_v52 = vunpack.i.l.bf16 %v8347_v53 }
0x1212   :  { %v8344_v13 = vunpack.i.h.bf16 %v8342_v36  ;;  %v8343_v3 = vunpack.i.l.bf16 %v8342_v36  ;;  %8060 = vmatprep.mubr.msk.bf16.mxu0 %vm4778_vm2, %v6237_v54  ;;  %8088 = vmatprep.mubr.msk.bf16.mxu1 %vm4778_vm2, %v6251_v33 }
0x1213   :  { %v6258_v39 = vpack.c.bf16 %v8349_v48, %v8348_v52 }
0x1214   :  { %v6238_v58 = vpack.c.bf16 %v8344_v13, %v8343_v3 }
0x1216   :  { %8061 = vmatmul.mubr.msk.bf16.gmra.mrb[48].mxu0 %vm4778_vm2, %v6238_v58 }
0x1219   :  { %8089 = vmatmul.mubr.msk.bf16.gmra.mrb[80].mxu1 %vm4778_vm2, %v6252_v59 }
0x121a   :  { %8092 = vmatprep.mubr.msk.bf16.mxu1 %vm4778_vm2, %v6253_v35 }
0x1221   :  { %8093 = vmatmul.mubr.msk.bf16.gmra.mrb[84].mxu1 %vm4778_vm2, %v6254_v15 }
0x1222   :  { %8096 = vmatprep.mubr.msk.bf16.mxu1 %vm4778_vm2, %v6255_v2 }
0x1229   :  { %8097 = vmatmul.mubr.msk.bf16.gmra.mrb[88].mxu1 %vm4778_vm2, %v6256_v25 }
0x122a   :  { %8100 = vmatprep.mubr.msk.bf16.mxu1 %vm4778_vm2, %v6257_v19 }
0x1231   :  { %8101 = vmatmul.mubr.msk.bf16.gmra.mrb[92].mxu1 %vm4778_vm2, %v6258_v39 }
0x1246   :  { %v8042_v0 = vpop.f32.mrb[28].mxu0 }
0x1247   :  { %v6421_v55 = vadd.f32 %v8042_v0, %v11143_v21  ;;  %v6412_v40 = vpop.f32.mrb[29].mxu0 }
0x1248   :  { %v6413_v41 = vadd.f32 %v11143_v21, %v6412_v40  ;;  %v8043_v49 = vpop.f32.mrb[30].mxu0 }
0x1249   :  { %v7731_v43 = vmul.f32 -1.442695, %v6421_v55  ;;  %v6424_v44 = vadd.f32 %v8043_v49, %v11143_v21  ;;  %v6415_v45 = vpop.f32.mrb[31].mxu0 }
0x124a   :  { %v7729_v46 = vmul.f32 -1.442695, %v6413_v41  ;;  %v6416_v57 = vadd.f32 %v11143_v21, %v6415_v45 }
0x124b   :  { %9105 = vpow2.f32 %v7731_v43  ;;  %v7732_v50 = vmul.f32 -1.442695, %v6424_v44 }
0x124c   :  { %9107 = vpow2.f32 %v7729_v46  ;;  %v7730_v5 = vmul.f32 -1.442695, %v6416_v57 }
0x124d   :  { %9109 = vpow2.f32 %v7732_v50 }
0x124e   :  { %9111 = vpow2.f32 %v7730_v5  ;;  %v8046_v8 = vpop.f32.mrb[32].mxu0 }
0x124f   :  { %v6437_v1 = vadd.f32 %v8046_v8, %v11143_v21  ;;  %v6428_v14 = vpop.f32.mrb[33].mxu0 }
0x1250   :  { %v6429_v16 = vadd.f32 %v11143_v21, %v6428_v14  ;;  %v8047_v28 = vpop.f32.mrb[34].mxu0 }
0x1251   :  { %v7735_v17 = vmul.f32 -1.442695, %v6437_v1  ;;  %v6440_v47 = vadd.f32 %v8047_v28, %v11143_v21  ;;  %v6431_v32 = vpop.f32.mrb[35].mxu0 }
0x1252   :  { %v7733_v62 = vmul.f32 -1.442695, %v6429_v16  ;;  %v6432_v11 = vadd.f32 %v11143_v21, %v6431_v32 }
0x1253   :  { %9113 = vpow2.f32 %v7735_v17  ;;  %v7736_v30 = vmul.f32 -1.442695, %v6440_v47 }
0x1254   :  { %9115 = vpow2.f32 %v7733_v62  ;;  %v7734_v20 = vmul.f32 -1.442695, %v6432_v11 }
0x1255   :  { %v9106_v42 = vpop.eup %9105  ;;  %9117 = vpow2.f32 %v7736_v30 }
0x1256   :  { %v9108_v60 = vpop.eup %9107  ;;  %v6861_v12 = vadd.f32 1.0, %v9106_v42  ;;  %9119 = vpow2.f32 %v7734_v20  ;;  %v8050_v23 = vpop.f32.mrb[36].mxu0 }
0x1257   :  { %v9110_v51 = vpop.eup %9109  ;;  %v6859_v26 = vadd.f32 1.0, %v9108_v60  ;;  %v6453_v27 = vadd.f32 %v8050_v23, %v11143_v21  ;;  %v6444_v29 = vpop.f32.mrb[37].mxu0 }
0x1258   :  { %v9112_v33 = vpop.eup %9111  ;;  %9121 = vrcp.f32 %v6861_v12  ;;  %v6862_v54 = vadd.f32 1.0, %v9110_v51  ;;  %v6445_v36 = vadd.f32 %v11143_v21, %v6444_v29  ;;  %v8051_v13 = vpop.f32.mrb[38].mxu0 }
0x1259   :  { %9123 = vrcp.f32 %v6859_v26  ;;  %v6860_v3 = vadd.f32 1.0, %v9112_v33  ;;  %v7739_v31 = vmul.f32 -1.442695, %v6453_v27  ;;  %v6456_v61 = vadd.f32 %v8051_v13, %v11143_v21  ;;  %v6447_v22 = vpop.f32.mrb[39].mxu0 }
0x125a   :  { %9125 = vrcp.f32 %v6862_v54  ;;  %v7737_v34 = vmul.f32 -1.442695, %v6445_v36  ;;  %v6448_v58 = vadd.f32 %v11143_v21, %v6447_v22 }
0x125b   :  { %9127 = vrcp.f32 %v6860_v3  ;;  %v7740_v18 = vmul.f32 -1.442695, %v6456_v61 }
0x125c   :  { %9129 = vpow2.f32 %v7739_v31  ;;  %v7738_v59 = vmul.f32 -1.442695, %v6448_v58 }
0x125d   :  { %v9114_v35 = vpop.eup %9113  ;;  %9131 = vpow2.f32 %v7737_v34 }
0x125e   :  { %v9116_v6 = vpop.eup %9115  ;;  %v6865_v56 = vadd.f32 1.0, %v9114_v35  ;;  %9133 = vpow2.f32 %v7740_v18  ;;  %v8054_v4 = vpop.f32.mrb[40].mxu0 }
0x125f   :  { %v9118_v37 = vpop.eup %9117  ;;  %v6863_v7 = vadd.f32 1.0, %v9116_v6  ;;  %9135 = vpow2.f32 %v7738_v59  ;;  %v6469_v15 = vadd.f32 %v8054_v4, %v11143_v21  ;;  %v6460_v2 = vpop.f32.mrb[41].mxu0 }
0x1260   :  { %v9120_v63 = vpop.eup %9119  ;;  %9137 = vrcp.f32 %v6865_v56  ;;  %v6866_v10 = vadd.f32 1.0, %v9118_v37  ;;  %v6461_v38 = vadd.f32 %v11143_v21, %v6460_v2  ;;  %v8055_v9 = vpop.f32.mrb[42].mxu0 }
0x1261   :  { %9139 = vrcp.f32 %v6863_v7  ;;  %v6864_v24 = vadd.f32 1.0, %v9120_v63  ;;  %v7743_v25 = vmul.f32 -1.442695, %v6469_v15  ;;  %v6472_v19 = vadd.f32 %v8055_v9, %v11143_v21  ;;  %v6463_v53 = vpop.f32.mrb[43].mxu0 }
0x1262   :  { %v9122_v48 = vpop.eup %9121  ;;  %9141 = vrcp.f32 %v6866_v10  ;;  %v7741_v52 = vmul.f32 -1.442695, %v6461_v38  ;;  %v6464_v39 = vadd.f32 %v11143_v21, %v6463_v53 }
0x1263   :  { %v9124_v0 = vpop.eup %9123  ;;  %7053 = vst [vmem:[%s11449_s21 + $0x10] sm:$0xff] %v9122_v48  ;;  %9143 = vrcp.f32 %v6864_v24  ;;  %v7744_v55 = vmul.f32 -1.442695, %v6472_v19 }
0x1264   :  { %v9126_v40 = vpop.eup %9125  ;;  %7051 = vst [vmem:[%s11449_s21] sm:$0xff] %v9124_v0  ;;  %9145 = vpow2.f32 %v7743_v25  ;;  %v7742_v41 = vmul.f32 -1.442695, %v6464_v39 }
0x1265   :  { %v9128_v49 = vpop.eup %9127  ;;  %7054 = vst [vmem:[%s11449_s21 + $0x18] sm:$0xff] %v9126_v40  ;;  %9147 = vpow2.f32 %v7741_v52 }
0x1266   :  { %v9130_v43 = vpop.eup %9129  ;;  %7052 = vst [vmem:[%s11449_s21 + $0x8] sm:$0xff] %v9128_v49  ;;  %9149 = vpow2.f32 %v7744_v55 }
0x1267   :  { %v9132_v44 = vpop.eup %9131  ;;  %v6869_v45 = vadd.f32 1.0, %v9130_v43  ;;  %9151 = vpow2.f32 %v7742_v41 }
0x1268   :  { %v9134_v46 = vpop.eup %9133  ;;  %v6867_v57 = vadd.f32 1.0, %v9132_v44 }
0x1269   :  { %v9136_v50 = vpop.eup %9135  ;;  %9153 = vrcp.f32 %v6869_v45  ;;  %v6870_v5 = vadd.f32 1.0, %v9134_v46 }
0x126a   :  { %v9138_v8 = vpop.eup %9137  ;;  %9155 = vrcp.f32 %v6867_v57  ;;  %v6868_v1 = vadd.f32 1.0, %v9136_v50 }
0x126b   :  { %v9140_v14 = vpop.eup %9139  ;;  %7057 = vst [vmem:[%s11449_s21 + $0x30] sm:$0xff] %v9138_v8  ;;  %9157 = vrcp.f32 %v6870_v5 }
0x126c   :  { %v9142_v16 = vpop.eup %9141  ;;  %7055 = vst [vmem:[%s11449_s21 + $0x20] sm:$0xff] %v9140_v14  ;;  %9159 = vrcp.f32 %v6868_v1 }
0x126d   :  { %v9144_v28 = vpop.eup %9143  ;;  %7058 = vst [vmem:[%s11449_s21 + $0x38] sm:$0xff] %v9142_v16 }
0x126e   :  { %v9146_v17 = vpop.eup %9145  ;;  %7056 = vst [vmem:[%s11449_s21 + $0x28] sm:$0xff] %v9144_v28 }
0x126f   :  { %v9148_v47 = vpop.eup %9147  ;;  %v6873_v32 = vadd.f32 1.0, %v9146_v17 }
0x1270   :  { %v9150_v62 = vpop.eup %9149  ;;  %v6871_v11 = vadd.f32 1.0, %v9148_v47 }
0x1271   :  { %v9152_v30 = vpop.eup %9151  ;;  %9161 = vrcp.f32 %v6873_v32  ;;  %v6874_v20 = vadd.f32 1.0, %v9150_v62 }
0x1272   :  { %9163 = vrcp.f32 %v6871_v11  ;;  %v6872_v42 = vadd.f32 1.0, %v9152_v30 }
0x1273   :  { %v9154_v60 = vpop.eup %9153  ;;  %9165 = vrcp.f32 %v6874_v20 }
0x1274   :  { %v9156_v12 = vpop.eup %9155  ;;  %7061 = vst [vmem:[%s11449_s21 + $0x50] sm:$0xff] %v9154_v60  ;;  %9167 = vrcp.f32 %v6872_v42 }
0x1275   :  { %v9158_v23 = vpop.eup %9157  ;;  %7059 = vst [vmem:[%s11449_s21 + $0x40] sm:$0xff] %v9156_v12 }
0x1276   :  { %v9160_v51 = vpop.eup %9159  ;;  %7062 = vst [vmem:[%s11449_s21 + $0x58] sm:$0xff] %v9158_v23 }
0x1277   :  { %7060 = vst [vmem:[%s11449_s21 + $0x48] sm:$0xff] %v9160_v51 }
0x127b   :  { %v9162_v26 = vpop.eup %9161 }
0x127c   :  { %v9164_v27 = vpop.eup %9163  ;;  %7065 = vst [vmem:[%s11449_s21 + $0x70] sm:$0xff] %v9162_v26 }
0x127d   :  { %v9166_v29 = vpop.eup %9165  ;;  %7063 = vst [vmem:[%s11449_s21 + $0x60] sm:$0xff] %v9164_v27 }
0x127e   :  { %v9168_v33 = vpop.eup %9167  ;;  %7066 = vst [vmem:[%s11449_s21 + $0x78] sm:$0xff] %v9166_v29 }
0x127f   :  { %7064 = vst [vmem:[%s11449_s21 + $0x68] sm:$0xff] %v9168_v33 }
0x12bc   :  { %v8066_v54 = vpop.f32.mrb[56].mxu1 }
0x12bd   :  { %v6517_v36 = vadd.f32 %v8066_v54, %v11143_v21  ;;  %v6508_v13 = vpop.f32.mrb[57].mxu1 }
0x12be   :  { %v6509_v3 = vadd.f32 %v11143_v21, %v6508_v13  ;;  %v8067_v31 = vpop.f32.mrb[58].mxu1 }
0x12bf   :  { %v7755_v61 = vmul.f32 -1.442695, %v6517_v36  ;;  %v6520_v22 = vadd.f32 %v8067_v31, %v11143_v21  ;;  %v6511_v34 = vpop.f32.mrb[59].mxu1 }
0x12c0   :  { %v7753_v58 = vmul.f32 -1.442695, %v6509_v3  ;;  %v6512_v18 = vadd.f32 %v11143_v21, %v6511_v34 }
0x12c1   :  { %9169 = vpow2.f32 %v7755_v61  ;;  %v7756_v59 = vmul.f32 -1.442695, %v6520_v22 }
0x12c2   :  { %9171 = vpow2.f32 %v7753_v58  ;;  %v7754_v35 = vmul.f32 -1.442695, %v6512_v18 }
0x12c3   :  { %9173 = vpow2.f32 %v7756_v59 }
0x12c4   :  { %9175 = vpow2.f32 %v7754_v35  ;;  %v8070_v6 = vpop.f32.mrb[60].mxu1 }
0x12c5   :  { %v6533_v56 = vadd.f32 %v8070_v6, %v11143_v21  ;;  %v6524_v4 = vpop.f32.mrb[61].mxu1 }
0x12c6   :  { %v6525_v37 = vadd.f32 %v11143_v21, %v6524_v4  ;;  %v8071_v7 = vpop.f32.mrb[62].mxu1 }
0x12c7   :  { %v7759_v15 = vmul.f32 -1.442695, %v6533_v56  ;;  %v6536_v2 = vadd.f32 %v8071_v7, %v11143_v21  ;;  %v6527_v63 = vpop.f32.mrb[63].mxu1 }
0x12c8   :  { %v7757_v10 = vmul.f32 -1.442695, %v6525_v37  ;;  %v6528_v38 = vadd.f32 %v11143_v21, %v6527_v63 }
0x12c9   :  { %9177 = vpow2.f32 %v7759_v15  ;;  %v7760_v9 = vmul.f32 -1.442695, %v6536_v2 }
0x12ca   :  { %9179 = vpow2.f32 %v7757_v10  ;;  %v7758_v24 = vmul.f32 -1.442695, %v6528_v38 }
0x12cb   :  { %v9170_v25 = vpop.eup %9169  ;;  %9181 = vpow2.f32 %v7760_v9 }
0x12cc   :  { %v9172_v19 = vpop.eup %9171  ;;  %v6885_v53 = vadd.f32 1.0, %v9170_v25  ;;  %9183 = vpow2.f32 %v7758_v24  ;;  %v8074_v48 = vpop.f32.mrb[64].mxu1 }
0x12cd   :  { %v9174_v52 = vpop.eup %9173  ;;  %v6883_v39 = vadd.f32 1.0, %v9172_v19  ;;  %v6549_v0 = vadd.f32 %v8074_v48, %v11143_v21  ;;  %v6540_v55 = vpop.f32.mrb[65].mxu1 }
0x12ce   :  { %v9176_v40 = vpop.eup %9175  ;;  %9185 = vrcp.f32 %v6885_v53  ;;  %v6886_v41 = vadd.f32 1.0, %v9174_v52  ;;  %v6541_v49 = vadd.f32 %v11143_v21, %v6540_v55  ;;  %v8075_v43 = vpop.f32.mrb[66].mxu1 }
0x12cf   :  { %9187 = vrcp.f32 %v6883_v39  ;;  %v6884_v44 = vadd.f32 1.0, %v9176_v40  ;;  %v7763_v45 = vmul.f32 -1.442695, %v6549_v0  ;;  %v6552_v46 = vadd.f32 %v8075_v43, %v11143_v21  ;;  %v6543_v57 = vpop.f32.mrb[67].mxu1 }
0x12d0   :  { %9189 = vrcp.f32 %v6886_v41  ;;  %v7761_v50 = vmul.f32 -1.442695, %v6541_v49  ;;  %v6544_v5 = vadd.f32 %v11143_v21, %v6543_v57 }
0x12d1   :  { %9191 = vrcp.f32 %v6884_v44  ;;  %v7764_v8 = vmul.f32 -1.442695, %v6552_v46 }
0x12d2   :  { %9193 = vpow2.f32 %v7763_v45  ;;  %v7762_v1 = vmul.f32 -1.442695, %v6544_v5 }
0x12d3   :  { %v9178_v14 = vpop.eup %9177  ;;  %9195 = vpow2.f32 %v7761_v50 }
0x12d4   :  { %v9180_v16 = vpop.eup %9179  ;;  %v6889_v28 = vadd.f32 1.0, %v9178_v14  ;;  %9197 = vpow2.f32 %v7764_v8  ;;  %v8078_v17 = vpop.f32.mrb[68].mxu1 }
0x12d5   :  { %v9182_v47 = vpop.eup %9181  ;;  %v6887_v32 = vadd.f32 1.0, %v9180_v16  ;;  %9199 = vpow2.f32 %v7762_v1  ;;  %v6565_v62 = vadd.f32 %v8078_v17, %v11143_v21  ;;  %v6556_v11 = vpop.f32.mrb[69].mxu1 }
0x12d6   :  { %v9184_v30 = vpop.eup %9183  ;;  %9201 = vrcp.f32 %v6889_v28  ;;  %v6890_v20 = vadd.f32 1.0, %v9182_v47  ;;  %v6557_v42 = vadd.f32 %v11143_v21, %v6556_v11  ;;  %v8079_v60 = vpop.f32.mrb[70].mxu1 }
0x12d7   :  { %9203 = vrcp.f32 %v6887_v32  ;;  %v6888_v12 = vadd.f32 1.0, %v9184_v30  ;;  %v7767_v23 = vmul.f32 -1.442695, %v6565_v62  ;;  %v6568_v51 = vadd.f32 %v8079_v60, %v11143_v21  ;;  %v6559_v26 = vpop.f32.mrb[71].mxu1 }
0x12d8   :  { %v9186_v27 = vpop.eup %9185  ;;  %9205 = vrcp.f32 %v6890_v20  ;;  %v7765_v29 = vmul.f32 -1.442695, %v6557_v42  ;;  %v6560_v33 = vadd.f32 %v11143_v21, %v6559_v26 }
0x12d9   :  { %v9188_v54 = vpop.eup %9187  ;;  %7077 = vst [vmem:[%s11449_s21 + $0xd0] sm:$0xff] %v9186_v27  ;;  %9207 = vrcp.f32 %v6888_v12  ;;  %v7768_v36 = vmul.f32 -1.442695, %v6568_v51 }
0x12da   :  { %v9190_v13 = vpop.eup %9189  ;;  %7075 = vst [vmem:[%s11449_s21 + $0xc0] sm:$0xff] %v9188_v54  ;;  %9209 = vpow2.f32 %v7767_v23  ;;  %v7766_v3 = vmul.f32 -1.442695, %v6560_v33 }
0x12db   :  { %v9192_v31 = vpop.eup %9191  ;;  %7078 = vst [vmem:[%s11449_s21 + $0xd8] sm:$0xff] %v9190_v13  ;;  %9211 = vpow2.f32 %v7765_v29 }
0x12dc   :  { %v9194_v61 = vpop.eup %9193  ;;  %7076 = vst [vmem:[%s11449_s21 + $0xc8] sm:$0xff] %v9192_v31  ;;  %9213 = vpow2.f32 %v7768_v36  ;;  %v8082_v22 = vpop.f32.mrb[72].mxu1 }
0x12dd   :  { %v9196_v34 = vpop.eup %9195  ;;  %v6893_v58 = vadd.f32 1.0, %v9194_v61  ;;  %9215 = vpow2.f32 %v7766_v3  ;;  %v6581_v18 = vadd.f32 %v8082_v22, %v11143_v21  ;;  %v6572_v59 = vpop.f32.mrb[73].mxu1 }
0x12de   :  { %v9198_v35 = vpop.eup %9197  ;;  %v6891_v6 = vadd.f32 1.0, %v9196_v34  ;;  %v6573_v56 = vadd.f32 %v11143_v21, %v6572_v59  ;;  %v8083_v4 = vpop.f32.mrb[74].mxu1 }
0x12df   :  { %v9200_v37 = vpop.eup %9199  ;;  %9217 = vrcp.f32 %v6893_v58  ;;  %v6894_v7 = vadd.f32 1.0, %v9198_v35  ;;  %v7771_v15 = vmul.f32 -1.442695, %v6581_v18  ;;  %v6584_v2 = vadd.f32 %v8083_v4, %v11143_v21  ;;  %v6575_v63 = vpop.f32.mrb[75].mxu1 }
0x12e0   :  { %v9202_v10 = vpop.eup %9201  ;;  %9219 = vrcp.f32 %v6891_v6  ;;  %v6892_v38 = vadd.f32 1.0, %v9200_v37  ;;  %v7769_v9 = vmul.f32 -1.442695, %v6573_v56  ;;  %v6576_v0 = vadd.f32 %v11143_v21, %v6575_v63 }
0x12e1   :  { %v9204_v24 = vpop.eup %9203  ;;  %7081 = vst [vmem:[%s11449_s21 + $0xf0] sm:$0xff] %v9202_v10  ;;  %9221 = vrcp.f32 %v6894_v7  ;;  %v7772_v25 = vmul.f32 -1.442695, %v6584_v2  ;;  %v8058_v19 = vpop.f32.mrb[44].mxu0 }
0x12e2   :  { %v9206_v53 = vpop.eup %9205  ;;  %7079 = vst [vmem:[%s11449_s21 + $0xe0] sm:$0xff] %v9204_v24  ;;  %9223 = vrcp.f32 %v6892_v38  ;;  %v6485_v48 = vadd.f32 %v8058_v19, %v11143_v21  ;;  %v6476_v52 = vpop.f32.mrb[45].mxu0  ;;  %v7770_v17 = vmul.f32 -1.442695, %v6576_v0 }
0x12e3   :  { %v9208_v39 = vpop.eup %9207  ;;  %7082 = vst [vmem:[%s11449_s21 + $0xf8] sm:$0xff] %v9206_v53  ;;  %9225 = vpow2.f32 %v7771_v15  ;;  %v8059_v55 = vpop.f32.mrb[46].mxu0  ;;  %v6477_v49 = vadd.f32 %v11143_v21, %v6476_v52 }
0x12e4   :  { %v9210_v40 = vpop.eup %9209  ;;  %7080 = vst [vmem:[%s11449_s21 + $0xe8] sm:$0xff] %v9208_v39  ;;  %9227 = vpow2.f32 %v7769_v9  ;;  %v7747_v41 = vmul.f32 -1.442695, %v6485_v48  ;;  %v6479_v43 = vpop.f32.mrb[47].mxu0  ;;  %v6488_v57 = vadd.f32 %v8059_v55, %v11143_v21 }
0x12e5   :  { %v8086_v44 = vpop.f32.mrb[76].mxu1  ;;  %v9212_v45 = vpop.eup %9211  ;;  %v6897_v46 = vadd.f32 1.0, %v9210_v40  ;;  %9229 = vpow2.f32 %v7772_v25  ;;  %v6480_v1 = vadd.f32 %v11143_v21, %v6479_v43  ;;  %v7745_v11 = vmul.f32 -1.442695, %v6477_v49 }
0x12e6   :  { %v6588_v50 = vpop.f32.mrb[77].mxu1  ;;  %v9214_v5 = vpop.eup %9213  ;;  %v6895_v8 = vadd.f32 1.0, %v9212_v45  ;;  %9231 = vpow2.f32 %v7747_v41  ;;  %v6597_v47 = vadd.f32 %v8086_v44, %v11143_v21  ;;  %v7748_v20 = vmul.f32 -1.442695, %v6488_v57 }
0x12e7   :  { %v8087_v14 = vpop.f32.mrb[78].mxu1  ;;  %v9216_v16 = vpop.eup %9215  ;;  %9233 = vrcp.f32 %v6897_v46  ;;  %v6898_v28 = vadd.f32 1.0, %v9214_v5  ;;  %v7746_v12 = vmul.f32 -1.442695, %v6480_v1  ;;  %v6589_v33 = vadd.f32 %v11143_v21, %v6588_v50 }
0x12e8   :  { %v6591_v32 = vpop.f32.mrb[79].mxu1  ;;  %9235 = vrcp.f32 %v6895_v8  ;;  %v6896_v62 = vadd.f32 1.0, %v9216_v16  ;;  %v7775_v26 = vmul.f32 -1.442695, %v6597_v47  ;;  %v6600_v3 = vadd.f32 %v8087_v14, %v11143_v21 }
0x12e9   :  { %v9218_v30 = vpop.eup %9217  ;;  %9237 = vrcp.f32 %v6898_v28  ;;  %v8062_v42 = vpop.f32.mrb[48].mxu0  ;;  %v6592_v35 = vadd.f32 %v11143_v21, %v6591_v32  ;;  %v7773_v37 = vmul.f32 -1.442695, %v6589_v33 }
0x12ea   :  { %v9220_v60 = vpop.eup %9219  ;;  %7085 = vst [vmem:[%s11449_s21 + $0x110] sm:$0xff] %v9218_v30  ;;  %9239 = vrcp.f32 %v6896_v62  ;;  %v6492_v23 = vpop.f32.mrb[49].mxu0  ;;  %v6501_v34 = vadd.f32 %v8062_v42, %v11143_v21  ;;  %v7776_v2 = vmul.f32 -1.442695, %v6600_v3 }
0x12eb   :  { %v9222_v51 = vpop.eup %9221  ;;  %7083 = vst [vmem:[%s11449_s21 + $0x100] sm:$0xff] %v9220_v60  ;;  %9241 = vpow2.f32 %v7770_v17  ;;  %v8063_v27 = vpop.f32.mrb[50].mxu0  ;;  %v7774_v9 = vmul.f32 -1.442695, %v6592_v35  ;;  %v6493_v53 = vadd.f32 %v11143_v21, %v6492_v23 }
0x12ec   :  { %v9224_v29 = vpop.eup %9223  ;;  %7086 = vst [vmem:[%s11449_s21 + $0x118] sm:$0xff] %v9222_v51  ;;  %9243 = vpow2.f32 %v7745_v11  ;;  %v6495_v54 = vpop.f32.mrb[51].mxu0  ;;  %v7751_v10 = vmul.f32 -1.442695, %v6501_v34  ;;  %v6504_v0 = vadd.f32 %v8063_v27, %v11143_v21 }
0x12ed   :  { %v8090_v36 = vpop.f32.mrb[80].mxu1  ;;  %v9226_v13 = vpop.eup %9225  ;;  %7084 = vst [vmem:[%s11449_s21 + $0x108] sm:$0xff] %v9224_v29  ;;  %9245 = vpow2.f32 %v7748_v20  ;;  %v6496_v49 = vadd.f32 %v11143_v21, %v6495_v54  ;;  %v7749_v5 = vmul.f32 -1.442695, %v6493_v53 }
0x12ee   :  { %v11272_v31 = vpop.f32.mrb[81].mxu1  ;;  %v9228_v61 = vpop.eup %9227  ;;  %v6901_v22 = vadd.f32 1.0, %v9226_v13  ;;  %9247 = vpow2.f32 %v7746_v12  ;;  %v6613_v46 = vadd.f32 %v8090_v36, %v11143_v21  ;;  %v7752_v14 = vmul.f32 -1.442695, %v6504_v0 }
0x12ef   :  { %v11275_v58 = vpop.f32.mrb[82].mxu1  ;;  %v9230_v18 = vpop.eup %9229  ;;  %v6899_v59 = vadd.f32 1.0, %v9228_v61  ;;  %9249 = vpow2.f32 %v7775_v26  ;;  %v7750_v28 = vmul.f32 -1.442695, %v6496_v49  ;;  %v6605_v11 = vadd.f32 %v11143_v21, %v11272_v31 }
0x12f0   :  { %v11278_v6 = vpop.f32.mrb[83].mxu1  ;;  %v9232_v56 = vpop.eup %9231  ;;  %9251 = vrcp.f32 %v6901_v22  ;;  %v6902_v4 = vadd.f32 1.0, %v9230_v18  ;;  %v7779_v47 = vmul.f32 -1.442695, %v6613_v46  ;;  %v6616_v42 = vadd.f32 %v11275_v58, %v11143_v21 }
0x12f1   :  { %v9234_v7 = vpop.eup %9233  ;;  %9253 = vrcp.f32 %v6899_v59  ;;  %v6877_v15 = vadd.f32 1.0, %v9232_v56  ;;  %v6608_v51 = vadd.f32 %v11143_v21, %v11278_v6  ;;  %v7777_v13 = vmul.f32 -1.442695, %v6605_v11 }
0x12f2   :  { %v9236_v63 = vpop.eup %9235  ;;  %7089 = vst [vmem:[%s11449_s21 + $0x130] sm:$0xff] %v9234_v7  ;;  %9255 = vrcp.f32 %v6902_v4  ;;  %v7780_v22 = vmul.f32 -1.442695, %v6616_v42 }
0x12f3   :  { %v9238_v38 = vpop.eup %9237  ;;  %7087 = vst [vmem:[%s11449_s21 + $0x120] sm:$0xff] %v9236_v63  ;;  %9257 = vrcp.f32 %v6877_v15  ;;  %v7778_v58 = vmul.f32 -1.442695, %v6608_v51 }
0x12f4   :  { %v9240_v24 = vpop.eup %9239  ;;  %7090 = vst [vmem:[%s11449_s21 + $0x138] sm:$0xff] %v9238_v38  ;;  %9259 = vpow2.f32 %v7773_v37  ;;  %v8094_v25 = vpop.f32.mrb[84].mxu1 }
0x12f5   :  { %v9242_v19 = vpop.eup %9241  ;;  %7088 = vst [vmem:[%s11449_s21 + $0x128] sm:$0xff] %v9240_v24  ;;  %9261 = vpow2.f32 %v7776_v2  ;;  %v6620_v48 = vpop.f32.mrb[85].mxu1  ;;  %v6629_v33 = vadd.f32 %v8094_v25, %v11143_v21 }
0x12f6   :  { %v9244_v52 = vpop.eup %9243  ;;  %v6900_v39 = vadd.f32 1.0, %v9242_v19  ;;  %9263 = vpow2.f32 %v7751_v10  ;;  %v11294_v55 = vpop.f32.mrb[86].mxu1  ;;  %v6621_v3 = vadd.f32 %v11143_v21, %v6620_v48 }
0x12f7   :  { %v9246_v40 = vpop.eup %9245  ;;  %v6875_v41 = vadd.f32 1.0, %v9244_v52  ;;  %9265 = vpow2.f32 %v7774_v9  ;;  %v11297_v43 = vpop.f32.mrb[87].mxu1  ;;  %v7783_v59 = vmul.f32 -1.442695, %v6629_v33  ;;  %v6632_v7 = vadd.f32 %v11294_v55, %v11143_v21 }
0x12f8   :  { %v9248_v44 = vpop.eup %9247  ;;  %9267 = vrcp.f32 %v6900_v39  ;;  %v6878_v45 = vadd.f32 1.0, %v9246_v40  ;;  %v7781_v56 = vmul.f32 -1.442695, %v6621_v3  ;;  %v6624_v63 = vadd.f32 %v11143_v21, %v11297_v43 }
0x12f9   :  { %v9250_v57 = vpop.eup %9249  ;;  %9269 = vrcp.f32 %v6875_v41  ;;  %v6876_v50 = vadd.f32 1.0, %v9248_v44  ;;  %v7784_v39 = vmul.f32 -1.442695, %v6632_v7 }
0x12fa   :  { %v9252_v8 = vpop.eup %9251  ;;  %9271 = vrcp.f32 %v6878_v45  ;;  %v6905_v1 = vadd.f32 1.0, %v9250_v57  ;;  %v7782_v40 = vmul.f32 -1.442695, %v6624_v63 }
0x12fb   :  { %v9254_v16 = vpop.eup %9253  ;;  %7093 = vst [vmem:[%s11449_s21 + $0x150] sm:$0xff] %v9252_v8  ;;  %9273 = vrcp.f32 %v6876_v50 }
0x12fc   :  { %v9256_v17 = vpop.eup %9255  ;;  %7091 = vst [vmem:[%s11449_s21 + $0x140] sm:$0xff] %v9254_v16  ;;  %9275 = vrcp.f32 %v6905_v1  ;;  %v8098_v32 = vpop.f32.mrb[88].mxu1 }
0x12fd   :  { %v9258_v62 = vpop.eup %9257  ;;  %7094 = vst [vmem:[%s11449_s21 + $0x158] sm:$0xff] %v9256_v17  ;;  %9277 = vpow2.f32 %v7749_v5  ;;  %v6636_v30 = vpop.f32.mrb[89].mxu1  ;;  %v6645_v24 = vadd.f32 %v8098_v32, %v11143_v21 }
0x12fe   :  { %v9260_v20 = vpop.eup %9259  ;;  %7069 = vst [vmem:[%s11449_s21 + $0x90] sm:$0xff] %v9258_v62  ;;  %9279 = vpow2.f32 %v7752_v14  ;;  %v11316_v60 = vpop.f32.mrb[90].mxu1  ;;  %v6637_v53 = vadd.f32 %v11143_v21, %v6636_v30 }
0x12ff   :  { %v9262_v12 = vpop.eup %9261  ;;  %v6903_v23 = vadd.f32 1.0, %v9260_v20  ;;  %9281 = vpow2.f32 %v7750_v28  ;;  %v11320_v26 = vpop.f32.mrb[91].mxu1  ;;  %v7787_v49 = vmul.f32 -1.442695, %v6645_v24  ;;  %v6648_v57 = vadd.f32 %v11316_v60, %v11143_v21 }
0x1300   :  { %v9264_v27 = vpop.eup %9263  ;;  %v6906_v29 = vadd.f32 1.0, %v9262_v12  ;;  %9283 = vpow2.f32 %v7779_v47  ;;  %v7785_v44 = vmul.f32 -1.442695, %v6637_v53  ;;  %v6640_v8 = vadd.f32 %v11143_v21, %v11320_v26 }
0x1301   :  { %v9266_v54 = vpop.eup %9265  ;;  %9285 = vrcp.f32 %v6903_v23  ;;  %v6881_v36 = vadd.f32 1.0, %v9264_v27  ;;  %v7788_v11 = vmul.f32 -1.442695, %v6648_v57 }
0x1302   :  { %v9268_v31 = vpop.eup %9267  ;;  %9287 = vrcp.f32 %v6906_v29  ;;  %v6904_v61 = vadd.f32 1.0, %v9266_v54  ;;  %v7786_v42 = vmul.f32 -1.442695, %v6640_v8 }
0x1303   :  { %v9270_v34 = vpop.eup %9269  ;;  %7092 = vst [vmem:[%s11449_s21 + $0x148] sm:$0xff] %v9268_v31  ;;  %9289 = vrcp.f32 %v6881_v36 }
0x1304   :  { %v9272_v18 = vpop.eup %9271  ;;  %7067 = vst [vmem:[%s11449_s21 + $0x80] sm:$0xff] %v9270_v34  ;;  %9291 = vrcp.f32 %v6904_v61  ;;  %v8102_v35 = vpop.f32.mrb[92].mxu1 }
0x1305   :  { %v9274_v6 = vpop.eup %9273  ;;  %7070 = vst [vmem:[%s11449_s21 + $0x98] sm:$0xff] %v9272_v18  ;;  %9293 = vpow2.f32 %v7777_v13  ;;  %v6652_v4 = vpop.f32.mrb[93].mxu1  ;;  %v6661_v16 = vadd.f32 %v8102_v35, %v11143_v21 }
0x1306   :  { %v9276_v37 = vpop.eup %9275  ;;  %7068 = vst [vmem:[%s11449_s21 + $0x88] sm:$0xff] %v9274_v6  ;;  %9295 = vpow2.f32 %v7780_v22  ;;  %v11338_v15 = vpop.f32.mrb[94].mxu1  ;;  %v6653_v47 = vadd.f32 %v11143_v21, %v6652_v4 }
0x1307   :  { %v9278_v2 = vpop.eup %9277  ;;  %7097 = vst [vmem:[%s11449_s21 + $0x170] sm:$0xff] %v9276_v37  ;;  %9297 = vpow2.f32 %v7778_v58  ;;  %v11345_v10 = vpop.f32.mrb[95].mxu1  ;;  %v7791_v12 = vmul.f32 -1.442695, %v6661_v16  ;;  %v6664_v27 = vadd.f32 %v11338_v15, %v11143_v21 }
0x1308   :  { %v9280_v38 = vpop.eup %9279  ;;  %v6879_v9 = vadd.f32 1.0, %v9278_v2  ;;  %9299 = vpow2.f32 %v7783_v59  ;;  %v7789_v51 = vmul.f32 -1.442695, %v6653_v47  ;;  %v6656_v33 = vadd.f32 %v11143_v21, %v11345_v10 }
0x1309   :  { %v9282_v25 = vpop.eup %9281  ;;  %v6882_v19 = vadd.f32 1.0, %v9280_v38  ;;  %9301 = vpow2.f32 %v7781_v56  ;;  %v7792_v22 = vmul.f32 -1.442695, %v6664_v27 }
0x130a   :  { %v9284_v48 = vpop.eup %9283  ;;  %9303 = vrcp.f32 %v6879_v9  ;;  %v6880_v52 = vadd.f32 1.0, %v9282_v25  ;;  %v7790_v18 = vmul.f32 -1.442695, %v6656_v33 }
0x130b   :  { %v9286_v0 = vpop.eup %9285  ;;  %9305 = vrcp.f32 %v6882_v19  ;;  %v6909_v55 = vadd.f32 1.0, %v9284_v48 }
0x130c   :  { %v9288_v41 = vpop.eup %9287  ;;  %7095 = vst [vmem:[%s11449_s21 + $0x160] sm:$0xff] %v9286_v0  ;;  %9307 = vrcp.f32 %v6880_v52 }
0x130d   :  { %v9290_v43 = vpop.eup %9289  ;;  %7098 = vst [vmem:[%s11449_s21 + $0x178] sm:$0xff] %v9288_v41  ;;  %9309 = vrcp.f32 %v6909_v55 }
0x130e   :  { %v9292_v45 = vpop.eup %9291  ;;  %7073 = vst [vmem:[%s11449_s21 + $0xb0] sm:$0xff] %v9290_v43  ;;  %9311 = vpow2.f32 %v7784_v39 }
0x130f   :  { %v9294_v46 = vpop.eup %9293  ;;  %7096 = vst [vmem:[%s11449_s21 + $0x168] sm:$0xff] %v9292_v45  ;;  %9313 = vpow2.f32 %v7782_v40 }
0x1310   :  { %v9296_v50 = vpop.eup %9295  ;;  %v6907_v5 = vadd.f32 1.0, %v9294_v46  ;;  %9315 = vpow2.f32 %v7787_v49 }
0x1311   :  { %v9298_v1 = vpop.eup %9297  ;;  %v6910_v14 = vadd.f32 1.0, %v9296_v50  ;;  %9317 = vpow2.f32 %v7785_v44 }
0x1312   :  { %v9300_v28 = vpop.eup %9299  ;;  %9319 = vrcp.f32 %v6907_v5  ;;  %v6908_v17 = vadd.f32 1.0, %v9298_v1 }
0x1313   :  { %v9302_v32 = vpop.eup %9301  ;;  %9321 = vrcp.f32 %v6910_v14  ;;  %v6913_v62 = vadd.f32 1.0, %v9300_v28 }
0x1314   :  { %v9304_v30 = vpop.eup %9303  ;;  %9323 = vrcp.f32 %v6908_v17  ;;  %v6911_v20 = vadd.f32 1.0, %v9302_v32 }
0x1315   :  { %v9306_v60 = vpop.eup %9305  ;;  %7071 = vst [vmem:[%s11449_s21 + $0xa0] sm:$0xff] %v9304_v30  ;;  %9325 = vrcp.f32 %v6913_v62 }
0x1316   :  { %v9308_v23 = vpop.eup %9307  ;;  %7074 = vst [vmem:[%s11449_s21 + $0xb8] sm:$0xff] %v9306_v60  ;;  %9327 = vrcp.f32 %v6911_v20 }
0x1317   :  { %v9310_v26 = vpop.eup %9309  ;;  %7072 = vst [vmem:[%s11449_s21 + $0xa8] sm:$0xff] %v9308_v23  ;;  %9329 = vpow2.f32 %v7788_v11 }
0x1318   :  { %v9312_v29 = vpop.eup %9311  ;;  %7101 = vst [vmem:[%s11449_s21 + $0x190] sm:$0xff] %v9310_v26  ;;  %9331 = vpow2.f32 %v7786_v42 }
0x1319   :  { %v9314_v54 = vpop.eup %9313  ;;  %v6914_v36 = vadd.f32 1.0, %v9312_v29  ;;  %9333 = vpow2.f32 %v7791_v12 }
0x131a   :  { %v9316_v13 = vpop.eup %9315  ;;  %v6912_v3 = vadd.f32 1.0, %v9314_v54  ;;  %9335 = vpow2.f32 %v7789_v51 }
0x131b   :  { %v9318_v31 = vpop.eup %9317  ;;  %9337 = vrcp.f32 %v6914_v36  ;;  %v6917_v61 = vadd.f32 1.0, %v9316_v13 }
0x131c   :  { %v9320_v34 = vpop.eup %9319  ;;  %9339 = vrcp.f32 %v6912_v3  ;;  %v6915_v58 = vadd.f32 1.0, %v9318_v31 }
0x131d   :  { %v9322_v59 = vpop.eup %9321  ;;  %7099 = vst [vmem:[%s11449_s21 + $0x180] sm:$0xff] %v9320_v34  ;;  %9341 = vrcp.f32 %v6917_v61 }
0x131e   :  { %v9324_v21 = vpop.eup %9323  ;;  %7102 = vst [vmem:[%s11449_s21 + $0x198] sm:$0xff] %v9322_v59  ;;  %9343 = vrcp.f32 %v6915_v58 }
0x131f   :  { %v9326_v35 = vpop.eup %9325  ;;  %7100 = vst [vmem:[%s11449_s21 + $0x188] sm:$0xff] %v9324_v21  ;;  %9345 = vpow2.f32 %v7792_v22 }
0x1320   :  { %v9328_v6 = vpop.eup %9327  ;;  %7105 = vst [vmem:[%s11449_s21 + $0x1b0] sm:$0xff] %v9326_v35  ;;  %9347 = vpow2.f32 %v7790_v18 }
0x1321   :  { %v9330_v56 = vpop.eup %9329  ;;  %7103 = vst [vmem:[%s11449_s21 + $0x1a0] sm:$0xff] %v9328_v6 }
0x1322   :  { %v9332_v4 = vpop.eup %9331  ;;  %v6918_v37 = vadd.f32 1.0, %v9330_v56 }
0x1323   :  { %v9334_v7 = vpop.eup %9333  ;;  %v6916_v15 = vadd.f32 1.0, %v9332_v4 }
0x1324   :  { %v9336_v2 = vpop.eup %9335  ;;  %9349 = vrcp.f32 %v6918_v37  ;;  %v6921_v63 = vadd.f32 1.0, %v9334_v7 }
0x1325   :  { %v9338_v10 = vpop.eup %9337  ;;  %9351 = vrcp.f32 %v6916_v15  ;;  %v6919_v38 = vadd.f32 1.0, %v9336_v2 }
0x1326   :  { %v9340_v9 = vpop.eup %9339  ;;  %7106 = vst [vmem:[%s11449_s21 + $0x1b8] sm:$0xff] %v9338_v10  ;;  %9353 = vrcp.f32 %v6921_v63 }
0x1327   :  { %v9342_v24 = vpop.eup %9341  ;;  %7104 = vst [vmem:[%s11449_s21 + $0x1a8] sm:$0xff] %v9340_v9  ;;  %9355 = vrcp.f32 %v6919_v38 }
0x1328   :  { %v9344_v25 = vpop.eup %9343  ;;  %7109 = vst [vmem:[%s11449_s21 + $0x1d0] sm:$0xff] %v9342_v24 }
0x1329   :  { %v9346_v19 = vpop.eup %9345  ;;  %7107 = vst [vmem:[%s11449_s21 + $0x1c0] sm:$0xff] %v9344_v25 }
0x132a   :  { %v9348_v53 = vpop.eup %9347  ;;  %v6922_v48 = vadd.f32 1.0, %v9346_v19 }
0x132b   :  { %v6920_v52 = vadd.f32 1.0, %v9348_v53 }
0x132c   :  { %9357 = vrcp.f32 %v6922_v48 }
0x132d   :  { %9359 = vrcp.f32 %v6920_v52 }
0x132e   :  { %v9350_v39 = vpop.eup %9349 }
0x132f   :  { %v9352_v0 = vpop.eup %9351  ;;  %7110 = vst [vmem:[%s11449_s21 + $0x1d8] sm:$0xff] %v9350_v39 }
0x1330   :  { %v9354_v55 = vpop.eup %9353  ;;  %7108 = vst [vmem:[%s11449_s21 + $0x1c8] sm:$0xff] %v9352_v0 }
0x1331   :  { %v9356_v40 = vpop.eup %9355  ;;  %7113 = vst [vmem:[%s11449_s21 + $0x1f0] sm:$0xff] %v9354_v55 }
0x1332   :  { %7111 = vst [vmem:[%s11449_s21 + $0x1e0] sm:$0xff] %v9356_v40 }
0x1336   :  { %v9358_v41 = vpop.eup %9357 }
0x1337   :  { %v9360_v49 = vpop.eup %9359  ;;  %7114 = vst [vmem:[%s11449_s21 + $0x1f8] sm:$0xff] %v9358_v41 }
0x1338   :  { %7112 = vst [vmem:[%s11449_s21 + $0x1e8] sm:$0xff] %v9360_v49 }
0x1339   :  { %7119 = vsyncpa [#allocation3], 1 }
0x133a   :  { %7120 = vsyncpa [#allocation5], 1 }
0x133b   :  { %7121 = vsyncpa [#allocation8], 1 }
0x133c   :  { %7122 = vsyncpa [#allocation11], 1 }
0x133d   :  { %7123 = vsyncpa [#allocation14], 1 }
0x133e   :  { %7124 = vsyncpa [#allocation17], 1 }
0x133f   :  { %7125 = vsyncpa [#allocation20], 1 }
0x1340   :  { %7126 = vsyncpa [#allocation23], 1 }
0x1341   :  { %7127 = vsyncpa [#allocation26], 1 }
0x1342   :  { %7128 = vsyncpa [#allocation29], 1 }

</bundles_post_ra>
